<compile_context>
chip_gen: v7x
topology: tpu7x:2x2x1
jax: 0.10.0
libtpu: 0.0.40
codegen_flags: <defaults>
</compile_context>

<pallas_src>
import jax
import jax.numpy as jnp
from jax import lax
from jax.experimental import pallas as pl
from jax.experimental.pallas import tpu as pltpu


def _make_step_kernel(inv_n: float, tb: int, x_resident: bool):
    """Build the per-tile SGD-step kernel.  inv_n = 1 / (B_total * D_out_total)."""

    def kernel(lr_ref, x_ref, y_ref, w_ref, loss_ref, w_out_ref, grad_acc, loss_acc):
        # grid = (nj, nk): j tiles D_out ("parallel"), k tiles B ("arbitrary" reduction).
        k = pl.program_id(1)
        nk = pl.num_programs(1)

        @pl.when(k == 0)
        def _init():
            grad_acc[...] = jnp.zeros_like(grad_acc)
            loss_acc[...] = jnp.zeros_like(loss_acc)

        if x_resident:
            # x is the whole (B, D_in) array, resident in VMEM (fetched once);
            # slice out this step's batch tile.
            row0 = pl.multiple_of(k * tb, tb)
            x = x_ref[pl.ds(row0, tb), :]          # (tb, D_in) native (bf16) dtype
        else:
            x = x_ref[...]                          # streamed (tb, D_in) tile

        # Forward matmul on the MXU: bf16-in / f32-accumulate fast path.
        pred = jnp.dot(x, w_ref[...], preferred_element_type=jnp.float32)  # (tb, tn) f32
        diff = pred - y_ref[...].astype(jnp.float32)                       # f32 VPU math

        # Loss partial: pure-VPU elementwise accumulation (no per-step XLU reduce).
        loss_acc[...] += diff * diff

        # Gradient partial: contract the batch axis directly — the MXU consumes the
        # transposed-LHS feed natively, no materialized x.T / per-step vxpose.
        grad_acc[...] += lax.dot_general(
            x, diff.astype(x.dtype),
            dimension_numbers=(((0,), (0,)), ((), ())),
            preferred_element_type=jnp.float32)                            # (D_in, tn) f32

        @pl.when(k == nk - 1)
        def _finalize():
            lr = lr_ref[0]
            # W tile re-read here (only place it is needed as a full vreg value);
            # the inner loop above only feeds it to the MXU.
            w_new = w_ref[...].astype(jnp.float32) - (2.0 * inv_n) * lr * grad_acc[...]
            w_out_ref[...] = w_new.astype(w_out_ref.dtype)
            # Single reduction per j tile; lane-dense (8, 128) store of the
            # already-1/N-scaled partial. Wrapper sums one element per j tile.
            part = (jnp.sum(loss_acc[...]) * inv_n).reshape(1, 1)
            loss_ref[...] = jnp.broadcast_to(part, loss_ref.shape)

    return kernel


def trainer_forward(x, y, w, lr, *, tb=256, tn=256,
                    max_x_resident_bytes=8 * 1024 * 1024):
    """BaseTrainer.forward(*batch): one optimization step, returns (loss, W_new)."""
    B, D_in = x.shape
    B2, D_out = y.shape
    assert B2 == B and w.shape == (D_in, D_out)

    tb = min(tb, B)
    tn = min(tn, D_out)
    assert B % tb == 0 and D_out % tn == 0
    assert tn == D_out or tn % 128 == 0
    # Keep x/W lane-dense; non-multiple-of-128 D_in would force padded layouts.
    assert D_in % 128 == 0, "D_in must be a multiple of 128 (lane-dense layout)"

    nj = D_out // tn          # D_out tiles -> "parallel" grid axis (keep even for v7x 2 TCs)
    nk = B // tb              # batch tiles -> "arbitrary" reduction axis (last)
    inv_n = 1.0 / float(B * D_out)

    x_bytes = x.size * x.dtype.itemsize
    x_resident = x_bytes <= max_x_resident_bytes

    lr_arr = jnp.asarray([lr], dtype=jnp.float32)
    kernel = _make_step_kernel(inv_n, tb, x_resident)

    if x_resident:
        # Constant block index across the whole grid -> fetched from HBM exactly once.
        x_spec = pl.BlockSpec((B, D_in), lambda j, k: (0, 0))
        x_hbm_reads = 1
    else:
        # Streaming fallback: x is re-streamed once per D_out tile.
        # TODO(synk): if DMA is exposed for small D_in, add pipeline_mode=pl.Buffered(3).
        x_spec = pl.BlockSpec((tb, D_in), lambda j, k: (k, 0))
        x_hbm_reads = nj

    bytes_accessed = (x_hbm_reads * x_bytes
                      + y.size * y.dtype.itemsize
                      + 2 * w.size * w.dtype.itemsize
                      + nj * 8 * 128 * 4)
    cost = pl.CostEstimate(flops=4 * B * D_in * D_out, transcendentals=0,
                           bytes_accessed=bytes_accessed)

    # VMEM footprint: pipelined buffers + scratch accumulators (+2x headroom),
    # capped at 32 MiB so the same config stays safe on v7x (64 MiB physical);
    # v5e/v6e (128 MiB) could raise this for much larger tiles.
    dbl = 2
    vmem_est = ((x_bytes if x_resident else dbl * tb * D_in * x.dtype.itemsize)
                + dbl * tb * tn * y.dtype.itemsize
                + 2 * dbl * D_in * tn * w.dtype.itemsize      # W in + W_new out
                + dbl * 8 * 128 * 4                           # loss partial out
                + D_in * tn * 4                               # grad accumulator
                + tb * tn * 4)                                # loss accumulator
    vmem_limit = min(32 * 1024 * 1024, max(2 * vmem_est, 8 * 1024 * 1024))

    loss_parts, w_new = pl.pallas_call(
        kernel,
        grid_spec=pltpu.PrefetchScalarGridSpec(
            num_scalar_prefetch=0,
            grid=(nj, nk),
            in_specs=[
                pl.BlockSpec(memory_space=pltpu.SMEM),            # lr scalar
                x_spec,                                           # x (resident or tiled)
                pl.BlockSpec((tb, tn), lambda j, k: (k, j)),      # y  (batch, out tile)
                pl.BlockSpec((D_in, tn), lambda j, k: (0, j)),    # W  (out tile)
            ],
            out_specs=(
                pl.BlockSpec((8, 128), lambda j, k: (j, 0)),      # per-j loss partial
                pl.BlockSpec((D_in, tn), lambda j, k: (0, j)),    # W_new (out tile)
            ),
            scratch_shapes=[
                pltpu.VMEM((D_in, tn), jnp.float32),              # grad accumulator
                pltpu.VMEM((tb, tn), jnp.float32),                # elementwise loss acc
            ],
        ),
        out_shape=(
            jax.ShapeDtypeStruct((nj * 8, 128), jnp.float32),     # loss partials
            jax.ShapeDtypeStruct((D_in, D_out), w.dtype),         # updated W
        ),
        input_output_aliases={3: 1},                              # W aliases W_new (P8)
        compiler_params=pltpu.CompilerParams(
            dimension_semantics=("parallel", "arbitrary"),
            vmem_limit_bytes=vmem_limit,
        ),
        cost_estimate=cost,
    )(lr_arr, x, y, w)

    # Each per-j (8,128) block is a broadcast of one already-scaled partial value.
    loss = jnp.sum(loss_parts[::8, 0])
    # TODO(synk): self.scheduler.step() — host-side LR schedule update, no kernel math.
    return loss, w_new


def _reference(x, y, w, lr):
    hi = lax.Precision.HIGHEST
    pred = jnp.dot(x, w, precision=hi)
    diff = pred - y
    n = diff.size
    loss = jnp.sum(diff * diff) / n
    grad = (2.0 / n) * jnp.dot(x.T, diff, precision=hi)
    return loss, w - lr * grad


if __name__ == "__main__":
    key = jax.random.PRNGKey(0)
    kx, ky, kw = jax.random.split(key, 3)

    # MXU-shaped demo sizes: grid (nj=2, nk=2) with 256x256 tiles; nj is even so
    # the "parallel" axis load-balances across v7x's two TensorCores.
    B, D_in, D_out = 512, 256, 512
    # bf16 operands = native fast MXU path on v5e/v6e/v7x (f32 would hit the
    # multi-pass emulation); accumulation inside the kernel stays f32.
    x = jax.random.normal(kx, (B, D_in), dtype=jnp.float32).astype(jnp.bfloat16)
    y = jax.random.normal(ky, (B, D_out), dtype=jnp.float32).astype(jnp.bfloat16)
    w = (0.05 * jax.random.normal(kw, (D_in, D_out), dtype=jnp.float32)).astype(jnp.bfloat16)
    lr = 0.1

    # Reference in f32 on the exact bf16-representable inputs, computed BEFORE the
    # kernel call (W's HBM buffer may be aliased into the kernel output).
    loss_ref, w_ref = _reference(x.astype(jnp.float32), y.astype(jnp.float32),
                                 w.astype(jnp.float32), lr)
    w_copy = jnp.copy(w)   # fresh buffer for the second call (W is aliased in->out)

    # Path 1: x fully VMEM-resident (single HBM fetch) — default for these sizes.
    loss1, w_new1 = trainer_forward(x, y, w, lr)
    # Path 2: streaming-x fallback (used when B*D_in exceeds the VMEM budget).
    loss2, w_new2 = trainer_forward(x, y, w_copy, lr, max_x_resident_bytes=0)
    jax.block_until_ready((loss1, w_new1, loss2, w_new2))

    for loss, w_new in ((loss1, w_new1), (loss2, w_new2)):
        # bf16 products are exact in f32, so the loss tracks the f32 reference tightly.
        assert jnp.allclose(loss, loss_ref, rtol=5e-3, atol=5e-3), (loss, loss_ref)
        # W_new is stored in bf16; the dominant error is that final bf16 cast
        # (expected quantization, per the review's correctness note).
        assert jnp.allclose(w_new.astype(jnp.float32), w_ref, rtol=1e-2, atol=1e-3)

    print("KERNEL_OK")
</pallas_src>

<mosaic_0001>
module attributes {stable_mosaic.version = 11 : i64} {
  func.func @kernel(%arg0: i32, %arg1: i32, %arg2: memref<1xf32, #tpu.memory_space<smem>>, %arg3: memref<512x256xbf16, #tpu.memory_space<vmem>>, %arg4: memref<256x256xbf16, #tpu.memory_space<vmem>>, %arg5: memref<256x256xbf16, #tpu.memory_space<vmem>>, %arg6: memref<8x128xf32, #tpu.memory_space<vmem>>, %arg7: memref<256x256xbf16, #tpu.memory_space<vmem>>, %arg8: memref<256x256xf32, #tpu.memory_space<vmem>>, %arg9: memref<256x256xf32, #tpu.memory_space<vmem>>) attributes {dimension_semantics = [#tpu.dimension_semantics<parallel>, #tpu.dimension_semantics<arbitrary>], iteration_bounds = array<i64: 2, 2>, scalar_prefetch = 0 : i64, scratch_operands = 2 : i64, tpu.core_type = #tpu.core_type<tc>, window_params = [{transform_indices = @transform_0, window_bounds = array<i64: 1>}, {pipeline_mode = #tpu.pipeline_mode<synchronous>, transform_indices = @transform_1, window_bounds = array<i64: 512, 256>}, {transform_indices = @transform_2, window_bounds = array<i64: 256, 256>}, {transform_indices = @transform_3, window_bounds = array<i64: 256, 256>}, {transform_indices = @transform_4, window_bounds = array<i64: 8, 128>}, {transform_indices = @transform_5, window_bounds = array<i64: 256, 256>}]} {
    %c0_i32 = arith.constant 0 : i32
    %0 = arith.cmpi eq, %arg1, %c0_i32 : i32
    %1 = arith.extui %0 : i1 to i32
    %c0_i32_0 = arith.constant 0 : i32
    %2 = arith.cmpi ne, %1, %c0_i32_0 : i32
    scf.if %2 {
      %cst_15 = arith.constant 0.000000e+00 : f32
      %24 = vector.broadcast %cst_15 : f32 to vector<256x256xf32>
      %c0_16 = arith.constant 0 : index
      %c0_17 = arith.constant 0 : index
      %25 = vector.load %arg8[%c0_16, %c0_17] : memref<256x256xf32, #tpu.memory_space<vmem>>, vector<256x256xf32>
      tpu.vector_store %arg8[%c0_16, %c0_17], %24 {strides = array<i32>} : memref<256x256xf32, #tpu.memory_space<vmem>>, vector<256x256xf32>,
      %cst_18 = arith.constant 0.000000e+00 : f32
      %26 = vector.broadcast %cst_18 : f32 to vector<256x256xf32>
      %c0_19 = arith.constant 0 : index
      %c0_20 = arith.constant 0 : index
      %27 = vector.load %arg9[%c0_19, %c0_20] : memref<256x256xf32, #tpu.memory_space<vmem>>, vector<256x256xf32>
      tpu.vector_store %arg9[%c0_19, %c0_20], %26 {strides = array<i32>} : memref<256x256xf32, #tpu.memory_space<vmem>>, vector<256x256xf32>,
    } else {
    }
    %c256_i32 = arith.constant 256 : i32
    %3 = arith.muli %arg1, %c256_i32 : i32
    %4 = tpu.assume_multiple %3, 256 : i32
    %5 = arith.index_cast %4 : i32 to index
    %c0 = arith.constant 0 : index
    %6 = vector.load %arg3[%5, %c0] : memref<512x256xbf16, #tpu.memory_space<vmem>>, vector<256x256xbf16>
    %c0_1 = arith.constant 0 : index
    %c0_2 = arith.constant 0 : index
    %7 = vector.load %arg5[%c0_1, %c0_2] : memref<256x256xbf16, #tpu.memory_space<vmem>>, vector<256x256xbf16>
    %cst = arith.constant dense<0.000000e+00> : vector<256x256xf32>
    %8 = tpu.matmul %6, %7, %cst {dimension_numbers = #tpu.dot_dimension_numbers<[1], [0], [0], [1], [0, 0, 1, 1], [], []>} : vector<256x256xbf16>, vector<256x256xbf16>, vector<256x256xf32> -> vector<256x256xf32>
    %c0_3 = arith.constant 0 : index
    %c0_4 = arith.constant 0 : index
    %9 = vector.load %arg4[%c0_3, %c0_4] : memref<256x256xbf16, #tpu.memory_space<vmem>>, vector<256x256xbf16>
    %10 = arith.extf %9 : vector<256x256xbf16> to vector<256x256xf32>
    %11 = arith.subf %8, %10 : vector<256x256xf32>
    %c0_5 = arith.constant 0 : index
    %c0_6 = arith.constant 0 : index
    %12 = vector.load %arg9[%c0_5, %c0_6] : memref<256x256xf32, #tpu.memory_space<vmem>>, vector<256x256xf32>
    %13 = arith.mulf %11, %11 : vector<256x256xf32>
    %14 = arith.addf %12, %13 : vector<256x256xf32>
    %c0_7 = arith.constant 0 : index
    %c0_8 = arith.constant 0 : index
    %15 = vector.load %arg9[%c0_7, %c0_8] : memref<256x256xf32, #tpu.memory_space<vmem>>, vector<256x256xf32>
    tpu.vector_store %arg9[%c0_7, %c0_8], %14 {strides = array<i32>} : memref<256x256xf32, #tpu.memory_space<vmem>>, vector<256x256xf32>,
    %c0_9 = arith.constant 0 : index
    %c0_10 = arith.constant 0 : index
    %16 = vector.load %arg8[%c0_9, %c0_10] : memref<256x256xf32, #tpu.memory_space<vmem>>, vector<256x256xf32>
    %17 = arith.truncf %11 : vector<256x256xf32> to vector<256x256xbf16>
    %cst_11 = arith.constant dense<0.000000e+00> : vector<256x256xf32>
    %18 = tpu.matmul %6, %17, %cst_11 {dimension_numbers = #tpu.dot_dimension_numbers<[0], [0], [1], [1], [0, 1, 1, 1], [], []>} : vector<256x256xbf16>, vector<256x256xbf16>, vector<256x256xf32> -> vector<256x256xf32>
    %19 = arith.addf %16, %18 : vector<256x256xf32>
    %c0_12 = arith.constant 0 : index
    %c0_13 = arith.constant 0 : index
    %20 = vector.load %arg8[%c0_12, %c0_13] : memref<256x256xf32, #tpu.memory_space<vmem>>, vector<256x256xf32>
    tpu.vector_store %arg8[%c0_12, %c0_13], %19 {strides = array<i32>} : memref<256x256xf32, #tpu.memory_space<vmem>>, vector<256x256xf32>,
    %c1_i32 = arith.constant 1 : i32
    %21 = arith.cmpi eq, %arg1, %c1_i32 : i32
    %22 = arith.extui %21 : i1 to i32
    %c0_i32_14 = arith.constant 0 : i32
    %23 = arith.cmpi ne, %22, %c0_i32_14 : i32
    scf.if %23 {
      %c0_15 = arith.constant 0 : index
      %24 = memref.load %arg2[%c0_15] : memref<1xf32, #tpu.memory_space<smem>>
      %c0_16 = arith.constant 0 : index
      %c0_17 = arith.constant 0 : index
      %25 = vector.load %arg5[%c0_16, %c0_17] : memref<256x256xbf16, #tpu.memory_space<vmem>>, vector<256x256xbf16>
      %26 = arith.extf %25 : vector<256x256xbf16> to vector<256x256xf32>
      %cst_18 = arith.constant 7.62939453E-6 : f32
      %27 = arith.mulf %cst_18, %24 : f32
      %c0_19 = arith.constant 0 : index
      %c0_20 = arith.constant 0 : index
      %28 = vector.load %arg8[%c0_19, %c0_20] : memref<256x256xf32, #tpu.memory_space<vmem>>, vector<256x256xf32>
      %29 = vector.broadcast %27 : f32 to vector<256x256xf32>
      %30 = arith.mulf %29, %28 : vector<256x256xf32>
      %31 = arith.subf %26, %30 : vector<256x256xf32>
      %32 = arith.truncf %31 : vector<256x256xf32> to vector<256x256xbf16>
      %c0_21 = arith.constant 0 : index
      %c0_22 = arith.constant 0 : index
      %33 = vector.load %arg7[%c0_21, %c0_22] : memref<256x256xbf16, #tpu.memory_space<vmem>>, vector<256x256xbf16>
      tpu.vector_store %arg7[%c0_21, %c0_22], %32 {strides = array<i32>} : memref<256x256xbf16, #tpu.memory_space<vmem>>, vector<256x256xbf16>,
      %c0_23 = arith.constant 0 : index
      %c0_24 = arith.constant 0 : index
      %34 = vector.load %arg9[%c0_23, %c0_24] : memref<256x256xf32, #tpu.memory_space<vmem>>, vector<256x256xf32>
      %35 = vector.shape_cast %34 : vector<256x256xf32> to vector<1x256x256xf32>
      %cst_25 = arith.constant dense<0.000000e+00> : vector<1xf32>
      %36 = vector.multi_reduction <add>, %35, %cst_25 [1, 2] : vector<1x256x256xf32> to vector<1xf32>
      %37 = vector.shape_cast %36 : vector<1xf32> to vector<1x1x1xf32>
      %38 = vector.extract %37[0, 0, 0] : f32 from vector<1x1x1xf32>
      %cst_26 = arith.constant 3.81469727E-6 : f32
      %39 = arith.mulf %38, %cst_26 : f32
      %40 = vector.broadcast %39 : f32 to vector<1x1xf32>
      %41 = vector.shape_cast %40 : vector<1x1xf32> to vector<1x1xf32>
      %42 = vector.broadcast %41 : vector<1x1xf32> to vector<8x128xf32>
      %c0_27 = arith.constant 0 : index
      %c0_28 = arith.constant 0 : index
      %43 = vector.load %arg6[%c0_27, %c0_28] : memref<8x128xf32, #tpu.memory_space<vmem>>, vector<8x128xf32>
      tpu.vector_store %arg6[%c0_27, %c0_28], %42 {strides = array<i32>} : memref<8x128xf32, #tpu.memory_space<vmem>>, vector<8x128xf32>,
    } else {
    }
    return
  }
  func.func @transform_0(%arg0: i32, %arg1: i32) -> i32 {
    %c0_i32 = arith.constant 0 : i32
    %c0_i32_0 = arith.constant 0 : i32
    return %c0_i32 : i32
  }
  func.func @transform_1(%arg0: i32, %arg1: i32) -> (i32, i32) {
    %c0_i32 = arith.constant 0 : i32
    %c0_i32_0 = arith.constant 0 : i32
    %c0_i32_1 = arith.constant 0 : i32
    return %c0_i32, %c0_i32_0 : i32, i32
  }
  func.func @transform_2(%arg0: i32, %arg1: i32) -> (i32, i32) {
    %c0_i32 = arith.constant 0 : i32
    return %arg1, %arg0 : i32, i32
  }
  func.func @transform_3(%arg0: i32, %arg1: i32) -> (i32, i32) {
    %c0_i32 = arith.constant 0 : i32
    %c0_i32_0 = arith.constant 0 : i32
    return %c0_i32, %arg0 : i32, i32
  }
  func.func @transform_4(%arg0: i32, %arg1: i32) -> (i32, i32) {
    %c0_i32 = arith.constant 0 : i32
    %c0_i32_0 = arith.constant 0 : i32
    return %arg0, %c0_i32 : i32, i32
  }
  func.func @transform_5(%arg0: i32, %arg1: i32) -> (i32, i32) {
    %c0_i32 = arith.constant 0 : i32
    %c0_i32_0 = arith.constant 0 : i32
    return %c0_i32, %arg0 : i32, i32
  }
}

</mosaic_0001>

<bundles_post_ra>
// kernel: tpu_custom_call.1
= control target key start
LH: loop header
LB: loop body
LE: loop exit
PB: predicated region body
PF: predicated region fallthrough
CT: control target
= control target key end

     0   :  { %s4999_s0 = inlined_call_operand.<no memory space> [shape: f32[1], index: 0, kind: input, shape index: {}]   ;;  %s5000_s1 = inlined_call_operand.hbm [shape: bf16[512,256], index: 1, kind: input, shape index: {}]   ;;  %s5001_s2 = inlined_call_operand.vmem [shape: bf16[512,512], index: 2, kind: input, shape index: {}]   ;;  %s5002_s3 = inlined_call_operand.hbm [shape: bf16[256,512], index: 3, kind: input, shape index: {}, may-alias: {3,5}]   ;;  %s5003_s4 = inlined_call_operand.hbm [shape: f32[16,128], index: 4, kind: output, shape index: {0}]   ;;  %s5004_s5 = inlined_call_operand.hbm [shape: bf16[256,512], index: 5, kind: output, shape index: {1}, may-alias: {3,5}]  }
   0x1   :  { %5057 = sst [smem:[#allocation65_spill]] %s5003_s4 }
   0x2   :  { %5058 = sst [smem:[#allocation66_spill]] %s5004_s5 }
   0x3   :  { %11 = sst [smem:[#allocation4]] %s4999_s0 }
   0x4   :  { %12 = vsyncpa [#allocation6], 0 }
   0x5   :  { %13 = vsyncpa [#allocation10], 0 }
   0x6   :  { %15 = vsyncpa [#allocation10 + $0x1], 0 }
   0x7   :  { %16 = vsyncpa [#allocation7], 0 }
   0x8   :  { %18 = vsyncpa [#allocation7 + $0x1], 0 }
   0x9   :  { %19 = vsyncpa [#allocation13], 0 }
   0xa   :  { %21 = vsyncpa [#allocation13 + $0x1], 0  ;;  %s3552_s20 = smov 0   ;;  %s3554_s21 = smov 0  }
   0xb   :  { %s3556_s22 = smov 0   ;;  %s3558_s23 = smov 0  }
   0xc   :  { %s3560_s24 = smov 0   ;;  %s3562_s25 = smov 0  }
   0xd   :  { %s3564_s0 = smov 0   ;;  %s3566_s26 = smov 0  }
   0xe   :  { %s3568_s27 = smov 0   ;;  %s3570_s28 = smov 0  }
   0xf LB: > { %5059 = sst [smem:[#allocation18_spill]] %s3468_s20  ;;  %s2923_s29 = sadd.s32 4294967295, %s3504_s28   ;;  %s3504_s28 = sphi %s3570_s28, %s27_s28   ;;  %s3500_s27 = sphi %s3568_s27, %s5266_s27   ;;  %s3496_s26 = sphi %s3566_s26, %s5265_s26   ;;  %s3492_s0 = sphi %s3564_s0, %s5264_s0   ;;  %s3488_s25 = sphi %s3562_s25, %s5263_s25   ;;  %s3484_s24 = sphi %s3560_s24, %s5262_s24   ;;  %s3480_s23 = sphi %s3558_s23, %s5261_s23   ;;  %s3476_s22 = sphi %s3556_s22, %s5260_s22   ;;  %s3472_s21 = sphi %s3554_s21, %s5259_s21   ;;  %s3468_s20 = sphi %s3552_s20, %s5258_s20  }
  0x10   : > { %s2924_s30 = sadd.s32 4294967294, %s3504_s28   ;;  %s36_s6 = sadd.s32 1, %s3496_s26 }
  0x11   : > { %s39_s7 = sadd.s32 1, %s3500_s27  ;;  %p37_p0 = scmp.ge.s32.totalorder %s36_s6, 2 }
  0x12   : > { %s90_s8 = sadd.s32 1, %s3484_s24  ;;  %p97_p1 = scmp.ne.s32.totalorder %s3484_s24, %s3480_s23 }
  0x13   : > { %p98_p2 = scmp.eq.s32.totalorder %s3504_s28, 0  ;;  %s5268_s6 = smov (%p37_p0, %s36_s6), 0 }
  0x14   : > { %5060 = sst [smem:[#allocation19_spill]] %s5268_s6  ;;  %s5270_s7 = smov (!%p37_p0, %s39_s7), %s3500_s27 }
  0x15   : > { %s85_s9 = ssub.s32 %s3496_s26, %s5268_s6  ;;  %p3615_p3 = por %p98_p2, %p97_p1 }
  0x16   : > { %p41_p4 = scmp.ge.s32.totalorder %s5270_s7, 2  ;;  %s116_s11 = sadd.s32 1, %s3476_s22 }
  0x17   : > { %s5061_s10 = scalar_select %p3615_p3, 1, 0 }
  0x18   : > { %p123_p5 = scmp.ne.s32.totalorder %s3476_s22, %s3472_s21  ;;  %p129_p6 = scmp.ne.s32.totalorder %s3472_s21, %s3468_s20 }
  0x19   : > { %s5272_s7 = smov (%p41_p4, %s5270_s7), 0  ;;  %p3633_p8 = scmp.eq.s32.totalorder %s2923_s29, 0 }
  0x1a   : > { %5062 = sst [smem:[#allocation20_spill]] %s5272_s7  ;;  %p3629_p7 = por %p123_p5, %p98_p2 }
  0x1b   : > { %s5064_s13 = scalar_select %p3633_p8, 1, 0 }
  0x1c   : > { %s5063_s12 = scalar_select %p3629_p7, 1, 0 }
  0x1d   : > { %s86_s14 = ssub.s32 %s3500_s27, %s5272_s7  ;;  %p153_p9 = scmp.eq.s32.totalorder %s2923_s29, 3 }
  0x1e   : > { %s87_s15 = sor.u32 %s86_s14, %s85_s9  ;;  %p114_p10 = scmp.eq.s32.totalorder %s86_s14, 0 }
  0x1f   : > { %p88_p11 = scmp.eq.s32.totalorder %s87_s15, 0  ;;  %p3644_p12 = por %p3633_p8, %p129_p6 }
  0x20   : > { %s3649_s17 = scalar_select %p114_p10, %s3476_s22, %s116_s11  }
  0x21   : > { %s5065_s16 = scalar_select %p3644_p12, 1, 0 }
  0x22   : > { %5066 = sst [smem:[#allocation21_spill]] %s3649_s17  ;;  %p3657_p13 = por %p153_p9, %p123_p5 }
  0x23   : > { %s3652_s18 = scalar_select %p88_p11, %s3484_s24, %s90_s8  }
  0x24   : > { %s5068_s19 = scalar_select %p3657_p13, 1, 0 }
  0x25   : > { %5067 = sst [smem:[#allocation22_spill]] %s3652_s18  ;;  %p159_p0 = scmp.eq.s32.totalorder %s2924_s30, 3 }
  0x26   : > { %p2925_p1 = scmp.ge.s32.totalorder %s3504_s28, 1  ;;  %p192_p2 = scmp.lt.s32.totalorder %s3504_s28, 5 }
  0x27   : > { %p3666_p4 = por %p159_p0, %p129_p6  ;;  %s3506_s8 = smov [#allocation5]  }
  0x28   : > { %p3670_p7 = pnand %p2925_p1, %p192_p2  ;;  %s207_s11 = sshll.u32 %s3506_s8, 4  ;;  %s208_s11 = int_to_ptr.vmem [resolvable:$true] %s207_s11 }
  0x29   : > { %s5069_s29 = scalar_select %p3666_p4, 1, 0 }
  0x2a   : > { %s5071_s9 = scalar_select %p3670_p7, 1, 0 }
  0x2b   : > { %5070 = sst [smem:[#allocation23_spill]] %s5069_s29  ;;  %p3098_p5 = pneg %p3670_p7 }
  0x2c   : > { %s3298_s7 = scalar_lea.hbm %s5000_s1, 8192 }
  0x2d   : > { %p3678_p9 = pnand %p3098_p5, %p3633_p8  ;;  %p3299_p6 = scmp.ne.s32.totalorder %s5000_s1, %s3298_s7 }
  0x2e   : > { %p3305_p1 = scmp.lt.u32.totalorder %s3298_s7, %s5000_s1 }
  0x2f   : > { %p3300_p10 = pneg %p3678_p9 }
  0x31   : > { %p3301_p11 = pnand %p3300_p10, %p3299_p6 }
  0x33   : > { %p3302_p0 = pneg %p3301_p11 }
  0x35   : > { %p3307_p2 = pnand %p3305_p1, %p3302_p0 }
  0x37   : > { %3310 = shalt.err (!%p3307_p2)
}
  0x38   : > { %s3311_s29 = scalar_lea.vmem %s208_s11, 8192  ;;  %p3319_p12 = scmp.lt.s32.totalorder %s208_s11, %s208_s11 }
  0x39   : > { %p3312_p5 = scmp.ne.s32.totalorder %s208_s11, %s3311_s29  ;;  %p3320_p8 = scmp.lt.s32.totalorder %s3311_s29, %s3311_s29 }
  0x3b   : > { %p3314_p4 = pnand %p3312_p5, %p3300_p10  ;;  %p3321_p7 = por %p3320_p8, %p3319_p12 }
  0x3d   : > { %p3315_p13 = pneg %p3314_p4 }
  0x3f   : > { %p3322_p3 = pnand %p3321_p7, %p3315_p13 }
  0x41   : > { %3325 = shalt.err (!%p3322_p3)
}
  0x42   : > { %s3507_s6 = smov 128   ;;  %s3508_s18 = smov 8  }
  0x43   : > { %3101 = dma.hbm_to_vmem [thread:$0]  (!%p3678_p9), %s5000_s1, 8192, %s208_s11, [#allocation6], %s3507_s6, %s3507_s6, %s3508_s18  }
  0x44   : > { %p2927_p6 = scmp.ge.s32.totalorder %s3504_s28, 4 }
  0x45   : > { %p5073_p11 = scmp.ne.s32.totalorder (!%p2927_p6), %s5061_s10, 0 }
  0x46   : > { %217 = sbr.rel (%p2927_p6) target bundleno = 128 (0x80), region = 24 }
  0x4d   : > { %220 = sbr.rel (!%p5073_p11) target bundleno = 100 (0x64), region = 28  ;;  %s222_s7 = sand.u32 (%p5073_p11), 1, %s3484_s24  }
  0x4e   : > { %s2930_s17 = sshll.u32 (%p5073_p11), %s3500_s27, 1  ;;  %s2928_s29 = sshll.u32 (%p5073_p11), %s222_s7, 8 }
  0x4f   : > { %s3050_s8 = sshll.u32 (%p5073_p11), %s3496_s26, 7  ;;  %s3712_s10 = scalar_lea.vmem (%p5073_p11), [#allocation8], %s2928_s29 }
  0x50   : > { %s228_s20 = sadd.s32 (%p5073_p11), %s3050_s8, %s2930_s17 }
  0x51   : > { %s2932_s5 = sshll.u32 (%p5073_p11), %s228_s20, 2 }
  0x52   : > { %s3707_s14 = scalar_lea.vmem (%p5073_p11), %s5001_s2, %s2932_s5 }
  0x53   : > { %v320_v0 = vld [vmem:[%s3707_s14] sm:$0xff] (%p5073_p11)  ;;  %v322_v1 = vld [vmem:[%s3707_s14 + $0x10] sm:$0xff] (%p5073_p11) }
  0x54   : > { %v324_v2 = vld [vmem:[%s3707_s14 + $0x20] sm:$0xff]  ;;  %321 = vst [vmem:[%s3712_s10] sm:$0xff] %v320_v0  ;;  %323 = vst [vmem:[%s3712_s10 + $0x8] sm:$0xff] %v322_v1  ;;  %v326_v3 = vld [vmem:[%s3707_s14 + $0x30] sm:$0xff] }
  0x55   : > { %325 = vst [vmem:[%s3712_s10 + $0x10] sm:$0xff] %v324_v2  ;;  %v328_v4 = vld [vmem:[%s3707_s14 + $0x40] sm:$0xff]  ;;  %v330_v5 = vld [vmem:[%s3707_s14 + $0x50] sm:$0xff]  ;;  %327 = vst [vmem:[%s3712_s10 + $0x18] sm:$0xff] %v326_v3 }
  0x56   : > { %329 = vst [vmem:[%s3712_s10 + $0x20] sm:$0xff] %v328_v4  ;;  %331 = vst [vmem:[%s3712_s10 + $0x28] sm:$0xff] %v330_v5  ;;  %v332_v6 = vld [vmem:[%s3707_s14 + $0x60] sm:$0xff]  ;;  %v334_v7 = vld [vmem:[%s3707_s14 + $0x70] sm:$0xff] }
  0x57   : > { %v336_v8 = vld [vmem:[%s3707_s14 + $0x80] sm:$0xff]  ;;  %333 = vst [vmem:[%s3712_s10 + $0x30] sm:$0xff] %v332_v6  ;;  %335 = vst [vmem:[%s3712_s10 + $0x38] sm:$0xff] %v334_v7  ;;  %v338_v9 = vld [vmem:[%s3707_s14 + $0x90] sm:$0xff] }
  0x58   : > { %337 = vst [vmem:[%s3712_s10 + $0x40] sm:$0xff] %v336_v8  ;;  %v340_v10 = vld [vmem:[%s3707_s14 + $0xa0] sm:$0xff]  ;;  %v342_v11 = vld [vmem:[%s3707_s14 + $0xb0] sm:$0xff]  ;;  %339 = vst [vmem:[%s3712_s10 + $0x48] sm:$0xff] %v338_v9 }
  0x59   : > { %341 = vst [vmem:[%s3712_s10 + $0x50] sm:$0xff] %v340_v10  ;;  %343 = vst [vmem:[%s3712_s10 + $0x58] sm:$0xff] %v342_v11  ;;  %v344_v12 = vld [vmem:[%s3707_s14 + $0xc0] sm:$0xff]  ;;  %v346_v13 = vld [vmem:[%s3707_s14 + $0xd0] sm:$0xff] }
  0x5a   : > { %v348_v14 = vld [vmem:[%s3707_s14 + $0xe0] sm:$0xff]  ;;  %345 = vst [vmem:[%s3712_s10 + $0x60] sm:$0xff] %v344_v12  ;;  %347 = vst [vmem:[%s3712_s10 + $0x68] sm:$0xff] %v346_v13  ;;  %v350_v15 = vld [vmem:[%s3707_s14 + $0xf0] sm:$0xff] }
  0x5b   : > { %349 = vst [vmem:[%s3712_s10 + $0x70] sm:$0xff] %v348_v14  ;;  %v352_v16 = vld [vmem:[%s3707_s14 + $0x100] sm:$0xff]  ;;  %v354_v17 = vld [vmem:[%s3707_s14 + $0x110] sm:$0xff]  ;;  %351 = vst [vmem:[%s3712_s10 + $0x78] sm:$0xff] %v350_v15 }
  0x5c   : > { %353 = vst [vmem:[%s3712_s10 + $0x80] sm:$0xff] %v352_v16  ;;  %355 = vst [vmem:[%s3712_s10 + $0x88] sm:$0xff] %v354_v17  ;;  %v356_v18 = vld [vmem:[%s3707_s14 + $0x120] sm:$0xff]  ;;  %v358_v19 = vld [vmem:[%s3707_s14 + $0x130] sm:$0xff] }
  0x5d   : > { %v360_v20 = vld [vmem:[%s3707_s14 + $0x140] sm:$0xff]  ;;  %357 = vst [vmem:[%s3712_s10 + $0x90] sm:$0xff] %v356_v18  ;;  %359 = vst [vmem:[%s3712_s10 + $0x98] sm:$0xff] %v358_v19  ;;  %v362_v21 = vld [vmem:[%s3707_s14 + $0x150] sm:$0xff] }
  0x5e   : > { %361 = vst [vmem:[%s3712_s10 + $0xa0] sm:$0xff] %v360_v20  ;;  %v364_v22 = vld [vmem:[%s3707_s14 + $0x160] sm:$0xff]  ;;  %v366_v23 = vld [vmem:[%s3707_s14 + $0x170] sm:$0xff]  ;;  %363 = vst [vmem:[%s3712_s10 + $0xa8] sm:$0xff] %v362_v21 }
  0x5f   : > { %365 = vst [vmem:[%s3712_s10 + $0xb0] sm:$0xff] %v364_v22  ;;  %367 = vst [vmem:[%s3712_s10 + $0xb8] sm:$0xff] %v366_v23  ;;  %v368_v24 = vld [vmem:[%s3707_s14 + $0x180] sm:$0xff]  ;;  %v370_v25 = vld [vmem:[%s3707_s14 + $0x190] sm:$0xff] }
  0x60   : > { %v372_v26 = vld [vmem:[%s3707_s14 + $0x1a0] sm:$0xff]  ;;  %369 = vst [vmem:[%s3712_s10 + $0xc0] sm:$0xff] %v368_v24  ;;  %371 = vst [vmem:[%s3712_s10 + $0xc8] sm:$0xff] %v370_v25  ;;  %v374_v27 = vld [vmem:[%s3707_s14 + $0x1b0] sm:$0xff] }
  0x61   : > { %373 = vst [vmem:[%s3712_s10 + $0xd0] sm:$0xff] %v372_v26  ;;  %v376_v28 = vld [vmem:[%s3707_s14 + $0x1c0] sm:$0xff]  ;;  %v378_v29 = vld [vmem:[%s3707_s14 + $0x1d0] sm:$0xff]  ;;  %375 = vst [vmem:[%s3712_s10 + $0xd8] sm:$0xff] %v374_v27 }
  0x62   : > { %377 = vst [vmem:[%s3712_s10 + $0xe0] sm:$0xff] %v376_v28  ;;  %379 = vst [vmem:[%s3712_s10 + $0xe8] sm:$0xff] %v378_v29  ;;  %v380_v30 = vld [vmem:[%s3707_s14 + $0x1e0] sm:$0xff]  ;;  %v382_v31 = vld [vmem:[%s3707_s14 + $0x1f0] sm:$0xff] }
  0x63   : > { %381 = vst [vmem:[%s3712_s10 + $0xf0] sm:$0xff] %v380_v30  ;;  %383 = vst [vmem:[%s3712_s10 + $0xf8] sm:$0xff] %v382_v31 }
  0x64 PF: > { %s390_s4 = sand.u32 1, %s3476_s22   ;;  %s3051_s5 = sshll.u32 %s3500_s27, 7 }
  0x65   : > { %s2933_s20 = sshll.u32 %s390_s4, 8  ;;  %s3780_s18 = scalar_lea.hbm %s5002_s3, %s3051_s5 }
  0x66   : > { %s394_s15 = scalar_lea.vmem [#allocation9], %s2933_s20  ;;  %s3784_s17 = scalar_lea.sflag [#allocation10], %s390_s4 }
  0x67   : > { %s401_s7 = sshll.u32 %s394_s15, 4  ;;  %s3326_s29 = scalar_lea.hbm %s3780_s18, 4096  ;;  %s3782_s7 = int_to_ptr.vmem [resolvable:$true] %s401_s7 }
  0x68   : > { %p3327_p3 = scmp.ne.s32.totalorder %s3780_s18, %s3326_s29  ;;  %p5074_p7 = scmp.ne.s32.totalorder %s5063_s12, 0 }
  0x69   : > { %s3330_s14 = scalar_lea.hbm %s5002_s3, 8192  ;;  %p3331_p13 = scmp.lt.u32.totalorder %s3780_s18, %s5002_s3 }
  0x6a   : > { %p3328_p8 = pnand %p3327_p3, %p5074_p7  ;;  %p3332_p4 = scmp.lt.u32.totalorder %s3330_s14, %s3326_s29 }
  0x6b   : > { %p3334_p10 = scmp.lt.u32.totalorder %s3326_s29, %s3780_s18 }
  0x6c   : > { %p3329_p12 = pneg %p3328_p8  ;;  %p3333_p9 = por %p3332_p4, %p3331_p13 }
  0x6e   : > { %p3335_p0 = por %p3334_p10, %p3333_p9 }
  0x70   : > { %p3336_p1 = pnand %p3335_p0, %p3329_p12 }
  0x72   : > { %3339 = shalt.err (!%p3336_p1)
}
  0x73   : > { %s3340_s4 = scalar_lea.vmem %s3782_s7, 4096  ;;  %s3509_s20 = smov [#allocation9]  }
  0x74   : > { %p3341_p2 = scmp.ne.s32.totalorder %s3782_s7, %s3340_s4  ;;  %s3344_s11 = sshll.u32 %s3509_s20, 4  ;;  %s3345_s11 = int_to_ptr.vmem [resolvable:$false] %s3344_s11 }
  0x75   : > { %s3346_s6 = scalar_lea.vmem %s3345_s11, 8192  ;;  %p3347_p11 = scmp.lt.s32.totalorder %s3782_s7, %s3345_s11 }
  0x76   : > { %p3342_p5 = pnand %p3341_p2, %p5074_p7  ;;  %p3348_p3 = scmp.lt.s32.totalorder %s3346_s6, %s3340_s4 }
  0x78   : > { %p3343_p6 = pneg %p3342_p5  ;;  %p3349_p8 = por %p3348_p3, %p3347_p11 }
  0x7a   : > { %p3350_p13 = pnand %p3349_p8, %p3343_p6 }
  0x7c   : > { %3353 = shalt.err (!%p3350_p13)
}
  0x7d   : > { %s3510_s15 = smov 256   ;;  %s3511_s29 = smov 128  }
  0x7e   : > { %s3512_s8 = smov 8  }
  0x7f   : > { %3090 = dma.hbm_to_vmem [thread:$0]  (%p5074_p7), %s3780_s18, 4096, %s3782_s7, %s3784_s17, %s3510_s15, %s3511_s29, %s3512_s8  }
  0x80 PF: > { %p5075_p12 = scmp.ne.s32.totalorder %s5071_s9, 0 }
  0x81   : > { %p5076_p4 = scmp.ne.s32.totalorder (!%p5075_p12), %s5064_s13, 0 }
  0x82   : > { %413 = sbr.rel (%p5075_p12) target bundleno = 1426 (0x592), region = 70 }
  0x89   : > { %3451 = dma.done.wait (%p5076_p4), [#allocation6], 8192  }
  0x8a   : > { %3453 = vsyncadd (%p5076_p4), [#allocation6], 4294959104  ;;  %s420_s30 = sand.u32 1, %s3480_s23   ;;  %s3816_s14 = sand.u32 1, %s3472_s21  }
  0x8b   : > { %s2938_s12 = sshll.u32 %s420_s30, 8  ;;  %s2939_s18 = sshll.u32 %s3816_s14, 8 }
  0x8c   : > { %s3819_s7 = scalar_lea.vmem [#allocation8], %s2938_s12  ;;  %s427_s9 = scalar_lea.sflag [#allocation10], %s3816_s14 }
  0x8d   : > { %s3822_s17 = scalar_lea.vmem [#allocation9], %s2939_s18  ;;  %p5077_p7 = scmp.ne.s32.totalorder %s5065_s16, 0 }
  0x8f   : > { %3455 = dma.done.wait (%p5077_p7), %s427_s9, 4096  }
  0x90   : > { %3457 = vsyncadd (%p5077_p7), %s427_s9, 4294963200  ;;  %s2940_s13 = sshll.u32 %s3816_s14, 3  ;;  %s3831_s23 = scalar_lea.vmem [#allocation12], %s2939_s18 }
  0x91   : > { %s3829_s10 = scalar_lea.vmem [#allocation11], %s2940_s13  ;;  %p2942_p9 = scmp.ne.s32.totalorder %s3488_s25, 0 }
  0x92   : > { %v3513_v32 = vmov (!%p2942_p9), 0.0  }
  0x93   : > { %473 = sbr.rel (%p2942_p9) target bundleno = 211 (0xd3), region = 86  ;;  %474 = vst [vmem:[#allocation2] sm:$0xff] (!%p2942_p9), %v3513_v32  ;;  %475 = vst [vmem:[#allocation2 + $0x8] sm:$0xff] (!%p2942_p9), %v3513_v32 }
  0x94   : > { %476 = vst [vmem:[#allocation2 + $0x10] sm:$0xff] (!%p2942_p9), %v3513_v32  ;;  %477 = vst [vmem:[#allocation2 + $0x18] sm:$0xff] (!%p2942_p9), %v3513_v32 }
  0x95   : > { %478 = vst [vmem:[#allocation2 + $0x20] sm:$0xff] (!%p2942_p9), %v3513_v32  ;;  %479 = vst [vmem:[#allocation2 + $0x28] sm:$0xff] (!%p2942_p9), %v3513_v32 }
  0x96   : > { %480 = vst [vmem:[#allocation2 + $0x30] sm:$0xff] (!%p2942_p9), %v3513_v32  ;;  %481 = vst [vmem:[#allocation2 + $0x38] sm:$0xff] (!%p2942_p9), %v3513_v32 }
  0x97   : > { %482 = vst [vmem:[#allocation2 + $0x40] sm:$0xff] (!%p2942_p9), %v3513_v32  ;;  %483 = vst [vmem:[#allocation2 + $0x48] sm:$0xff] (!%p2942_p9), %v3513_v32 }
  0x98   : > { %484 = vst [vmem:[#allocation2 + $0x50] sm:$0xff] (!%p2942_p9), %v3513_v32  ;;  %485 = vst [vmem:[#allocation2 + $0x58] sm:$0xff] (!%p2942_p9), %v3513_v32 }
  0x99   : > { %486 = vst [vmem:[#allocation2 + $0x60] sm:$0xff] (!%p2942_p9), %v3513_v32  ;;  %487 = vst [vmem:[#allocation2 + $0x68] sm:$0xff] (!%p2942_p9), %v3513_v32 }
  0x9a   : > { %488 = vst [vmem:[#allocation2 + $0x70] sm:$0xff] %v3513_v32  ;;  %489 = vst [vmem:[#allocation2 + $0x78] sm:$0xff] %v3513_v32 }
  0x9b   : > { %490 = vst [vmem:[#allocation2 + $0x80] sm:$0xff] %v3513_v32  ;;  %491 = vst [vmem:[#allocation2 + $0x88] sm:$0xff] %v3513_v32 }
  0x9c   : > { %492 = vst [vmem:[#allocation2 + $0x90] sm:$0xff] %v3513_v32  ;;  %493 = vst [vmem:[#allocation2 + $0x98] sm:$0xff] %v3513_v32 }
  0x9d   : > { %494 = vst [vmem:[#allocation2 + $0xa0] sm:$0xff] %v3513_v32  ;;  %495 = vst [vmem:[#allocation2 + $0xa8] sm:$0xff] %v3513_v32 }
  0x9e   : > { %496 = vst [vmem:[#allocation2 + $0xb0] sm:$0xff] %v3513_v32  ;;  %497 = vst [vmem:[#allocation2 + $0xb8] sm:$0xff] %v3513_v32 }
  0x9f   : > { %498 = vst [vmem:[#allocation2 + $0xc0] sm:$0xff] %v3513_v32  ;;  %499 = vst [vmem:[#allocation2 + $0xc8] sm:$0xff] %v3513_v32 }
  0xa0   : > { %500 = vst [vmem:[#allocation2 + $0xd0] sm:$0xff] %v3513_v32  ;;  %501 = vst [vmem:[#allocation2 + $0xd8] sm:$0xff] %v3513_v32 }
  0xa1   : > { %502 = vst [vmem:[#allocation2 + $0xe0] sm:$0xff] %v3513_v32  ;;  %503 = vst [vmem:[#allocation2 + $0xe8] sm:$0xff] %v3513_v32 }
  0xa2   : > { %504 = vst [vmem:[#allocation2 + $0xf0] sm:$0xff] %v3513_v32  ;;  %505 = vst [vmem:[#allocation2 + $0xf8] sm:$0xff] %v3513_v32 }
  0xa3   : > { %506 = vst [vmem:[#allocation2 + $0x100] sm:$0xff] %v3513_v32  ;;  %507 = vst [vmem:[#allocation2 + $0x108] sm:$0xff] %v3513_v32 }
  0xa4   : > { %508 = vst [vmem:[#allocation2 + $0x110] sm:$0xff] %v3513_v32  ;;  %509 = vst [vmem:[#allocation2 + $0x118] sm:$0xff] %v3513_v32 }
  0xa5   : > { %510 = vst [vmem:[#allocation2 + $0x120] sm:$0xff] %v3513_v32  ;;  %511 = vst [vmem:[#allocation2 + $0x128] sm:$0xff] %v3513_v32 }
  0xa6   : > { %512 = vst [vmem:[#allocation2 + $0x130] sm:$0xff] %v3513_v32  ;;  %513 = vst [vmem:[#allocation2 + $0x138] sm:$0xff] %v3513_v32 }
  0xa7   : > { %514 = vst [vmem:[#allocation2 + $0x140] sm:$0xff] %v3513_v32  ;;  %515 = vst [vmem:[#allocation2 + $0x148] sm:$0xff] %v3513_v32 }
  0xa8   : > { %516 = vst [vmem:[#allocation2 + $0x150] sm:$0xff] %v3513_v32  ;;  %517 = vst [vmem:[#allocation2 + $0x158] sm:$0xff] %v3513_v32 }
  0xa9   : > { %518 = vst [vmem:[#allocation2 + $0x160] sm:$0xff] %v3513_v32  ;;  %519 = vst [vmem:[#allocation2 + $0x168] sm:$0xff] %v3513_v32 }
  0xaa   : > { %520 = vst [vmem:[#allocation2 + $0x170] sm:$0xff] %v3513_v32  ;;  %521 = vst [vmem:[#allocation2 + $0x178] sm:$0xff] %v3513_v32 }
  0xab   : > { %522 = vst [vmem:[#allocation2 + $0x180] sm:$0xff] %v3513_v32  ;;  %523 = vst [vmem:[#allocation2 + $0x188] sm:$0xff] %v3513_v32 }
  0xac   : > { %524 = vst [vmem:[#allocation2 + $0x190] sm:$0xff] %v3513_v32  ;;  %525 = vst [vmem:[#allocation2 + $0x198] sm:$0xff] %v3513_v32 }
  0xad   : > { %526 = vst [vmem:[#allocation2 + $0x1a0] sm:$0xff] %v3513_v32  ;;  %527 = vst [vmem:[#allocation2 + $0x1a8] sm:$0xff] %v3513_v32 }
  0xae   : > { %528 = vst [vmem:[#allocation2 + $0x1b0] sm:$0xff] %v3513_v32  ;;  %529 = vst [vmem:[#allocation2 + $0x1b8] sm:$0xff] %v3513_v32 }
  0xaf   : > { %530 = vst [vmem:[#allocation2 + $0x1c0] sm:$0xff] %v3513_v32  ;;  %531 = vst [vmem:[#allocation2 + $0x1c8] sm:$0xff] %v3513_v32 }
  0xb0   : > { %532 = vst [vmem:[#allocation2 + $0x1d0] sm:$0xff] %v3513_v32  ;;  %533 = vst [vmem:[#allocation2 + $0x1d8] sm:$0xff] %v3513_v32 }
  0xb1   : > { %534 = vst [vmem:[#allocation2 + $0x1e0] sm:$0xff] %v3513_v32  ;;  %535 = vst [vmem:[#allocation2 + $0x1e8] sm:$0xff] %v3513_v32 }
  0xb2   : > { %536 = vst [vmem:[#allocation2 + $0x1f0] sm:$0xff] %v3513_v32  ;;  %537 = vst [vmem:[#allocation2 + $0x1f8] sm:$0xff] %v3513_v32 }
  0xb3   : > { %538 = vst [vmem:[#allocation3] sm:$0xff] %v3513_v32  ;;  %539 = vst [vmem:[#allocation3 + $0x8] sm:$0xff] %v3513_v32 }
  0xb4   : > { %540 = vst [vmem:[#allocation3 + $0x10] sm:$0xff] %v3513_v32  ;;  %541 = vst [vmem:[#allocation3 + $0x18] sm:$0xff] %v3513_v32 }
  0xb5   : > { %542 = vst [vmem:[#allocation3 + $0x20] sm:$0xff] %v3513_v32  ;;  %543 = vst [vmem:[#allocation3 + $0x28] sm:$0xff] %v3513_v32 }
  0xb6   : > { %544 = vst [vmem:[#allocation3 + $0x30] sm:$0xff] %v3513_v32  ;;  %545 = vst [vmem:[#allocation3 + $0x38] sm:$0xff] %v3513_v32 }
  0xb7   : > { %546 = vst [vmem:[#allocation3 + $0x40] sm:$0xff] %v3513_v32  ;;  %547 = vst [vmem:[#allocation3 + $0x48] sm:$0xff] %v3513_v32 }
  0xb8   : > { %548 = vst [vmem:[#allocation3 + $0x50] sm:$0xff] %v3513_v32  ;;  %549 = vst [vmem:[#allocation3 + $0x58] sm:$0xff] %v3513_v32 }
  0xb9   : > { %550 = vst [vmem:[#allocation3 + $0x60] sm:$0xff] %v3513_v32  ;;  %551 = vst [vmem:[#allocation3 + $0x68] sm:$0xff] %v3513_v32 }
  0xba   : > { %552 = vst [vmem:[#allocation3 + $0x70] sm:$0xff] %v3513_v32  ;;  %553 = vst [vmem:[#allocation3 + $0x78] sm:$0xff] %v3513_v32 }
  0xbb   : > { %554 = vst [vmem:[#allocation3 + $0x80] sm:$0xff] %v3513_v32  ;;  %555 = vst [vmem:[#allocation3 + $0x88] sm:$0xff] %v3513_v32 }
  0xbc   : > { %556 = vst [vmem:[#allocation3 + $0x90] sm:$0xff] %v3513_v32  ;;  %557 = vst [vmem:[#allocation3 + $0x98] sm:$0xff] %v3513_v32 }
  0xbd   : > { %558 = vst [vmem:[#allocation3 + $0xa0] sm:$0xff] %v3513_v32  ;;  %559 = vst [vmem:[#allocation3 + $0xa8] sm:$0xff] %v3513_v32 }
  0xbe   : > { %560 = vst [vmem:[#allocation3 + $0xb0] sm:$0xff] %v3513_v32  ;;  %561 = vst [vmem:[#allocation3 + $0xb8] sm:$0xff] %v3513_v32 }
  0xbf   : > { %562 = vst [vmem:[#allocation3 + $0xc0] sm:$0xff] %v3513_v32  ;;  %563 = vst [vmem:[#allocation3 + $0xc8] sm:$0xff] %v3513_v32 }
  0xc0   : > { %564 = vst [vmem:[#allocation3 + $0xd0] sm:$0xff] %v3513_v32  ;;  %565 = vst [vmem:[#allocation3 + $0xd8] sm:$0xff] %v3513_v32 }
  0xc1   : > { %566 = vst [vmem:[#allocation3 + $0xe0] sm:$0xff] %v3513_v32  ;;  %567 = vst [vmem:[#allocation3 + $0xe8] sm:$0xff] %v3513_v32 }
  0xc2   : > { %568 = vst [vmem:[#allocation3 + $0xf0] sm:$0xff] %v3513_v32  ;;  %569 = vst [vmem:[#allocation3 + $0xf8] sm:$0xff] %v3513_v32 }
  0xc3   : > { %570 = vst [vmem:[#allocation3 + $0x100] sm:$0xff] %v3513_v32  ;;  %571 = vst [vmem:[#allocation3 + $0x108] sm:$0xff] %v3513_v32 }
  0xc4   : > { %572 = vst [vmem:[#allocation3 + $0x110] sm:$0xff] %v3513_v32  ;;  %573 = vst [vmem:[#allocation3 + $0x118] sm:$0xff] %v3513_v32 }
  0xc5   : > { %574 = vst [vmem:[#allocation3 + $0x120] sm:$0xff] %v3513_v32  ;;  %575 = vst [vmem:[#allocation3 + $0x128] sm:$0xff] %v3513_v32 }
  0xc6   : > { %576 = vst [vmem:[#allocation3 + $0x130] sm:$0xff] %v3513_v32  ;;  %577 = vst [vmem:[#allocation3 + $0x138] sm:$0xff] %v3513_v32 }
  0xc7   : > { %578 = vst [vmem:[#allocation3 + $0x140] sm:$0xff] %v3513_v32  ;;  %579 = vst [vmem:[#allocation3 + $0x148] sm:$0xff] %v3513_v32 }
  0xc8   : > { %580 = vst [vmem:[#allocation3 + $0x150] sm:$0xff] %v3513_v32  ;;  %581 = vst [vmem:[#allocation3 + $0x158] sm:$0xff] %v3513_v32 }
  0xc9   : > { %582 = vst [vmem:[#allocation3 + $0x160] sm:$0xff] %v3513_v32  ;;  %583 = vst [vmem:[#allocation3 + $0x168] sm:$0xff] %v3513_v32 }
  0xca   : > { %584 = vst [vmem:[#allocation3 + $0x170] sm:$0xff] %v3513_v32  ;;  %585 = vst [vmem:[#allocation3 + $0x178] sm:$0xff] %v3513_v32 }
  0xcb   : > { %586 = vst [vmem:[#allocation3 + $0x180] sm:$0xff] %v3513_v32  ;;  %587 = vst [vmem:[#allocation3 + $0x188] sm:$0xff] %v3513_v32 }
  0xcc   : > { %588 = vst [vmem:[#allocation3 + $0x190] sm:$0xff] %v3513_v32  ;;  %589 = vst [vmem:[#allocation3 + $0x198] sm:$0xff] %v3513_v32 }
  0xcd   : > { %590 = vst [vmem:[#allocation3 + $0x1a0] sm:$0xff] %v3513_v32  ;;  %591 = vst [vmem:[#allocation3 + $0x1a8] sm:$0xff] %v3513_v32 }
  0xce   : > { %592 = vst [vmem:[#allocation3 + $0x1b0] sm:$0xff] %v3513_v32  ;;  %593 = vst [vmem:[#allocation3 + $0x1b8] sm:$0xff] %v3513_v32 }
  0xcf   : > { %594 = vst [vmem:[#allocation3 + $0x1c0] sm:$0xff] %v3513_v32  ;;  %595 = vst [vmem:[#allocation3 + $0x1c8] sm:$0xff] %v3513_v32 }
  0xd0   : > { %596 = vst [vmem:[#allocation3 + $0x1d0] sm:$0xff] %v3513_v32  ;;  %597 = vst [vmem:[#allocation3 + $0x1d8] sm:$0xff] %v3513_v32 }
  0xd1   : > { %598 = vst [vmem:[#allocation3 + $0x1e0] sm:$0xff] %v3513_v32  ;;  %599 = vst [vmem:[#allocation3 + $0x1e8] sm:$0xff] %v3513_v32 }
  0xd2   : > { %600 = vst [vmem:[#allocation3 + $0x1f0] sm:$0xff] %v3513_v32  ;;  %601 = vst [vmem:[#allocation3 + $0x1f8] sm:$0xff] %v3513_v32 }
  0xd3 PF: > { %v3202_v33 = vld [vmem:[%s3822_s17 + $0x4] ss:$8 sps:$4 sm:$0xff]   ;;  %v3204_v34 = vld [vmem:[%s3822_s17] ss:$8 sps:$4 sm:$0xff]   ;;  %v3205_v35 = vld [vmem:[%s3822_s17 + $0x14] ss:$8 sps:$4 sm:$0xff]  }
  0xd4   : > { %992 = vmatprep.subr.bf16.mxu0 %v3202_v33  ;;  %v3207_v36 = vld [vmem:[%s3822_s17 + $0x10] ss:$8 sps:$4 sm:$0xff]   ;;  %v3208_v37 = vld [vmem:[%s3822_s17 + $0x24] ss:$8 sps:$4 sm:$0xff]   ;;  %v3210_v38 = vld [vmem:[%s3822_s17 + $0x20] ss:$8 sps:$4 sm:$0xff]  }
  0xd5   : > { %993 = vmatpush1.bf16.msra.mxu0 %v3204_v34  ;;  %v3211_v39 = vld [vmem:[%s3822_s17 + $0x34] ss:$8 sps:$4 sm:$0xff]   ;;  %v3213_v40 = vld [vmem:[%s3822_s17 + $0x30] ss:$8 sps:$4 sm:$0xff]   ;;  %v3214_v41 = vld [vmem:[%s3822_s17 + $0x44] ss:$8 sps:$4 sm:$0xff]  }
  0xd6   : > { %994 = vmatprep.subr.bf16.mxu0 %v3205_v35  ;;  %v3216_v42 = vld [vmem:[%s3822_s17 + $0x40] ss:$8 sps:$4 sm:$0xff]   ;;  %v3217_v43 = vld [vmem:[%s3822_s17 + $0x54] ss:$8 sps:$4 sm:$0xff]   ;;  %s2943_s16 = sshll.u32 %s3488_s25, 8  ;;  %p3010_p10 = scmp.ne.s32.totalorder %s3488_s25, 1 }
  0xd7   : > { %v3219_v44 = vld [vmem:[%s3822_s17 + $0x50] ss:$8 sps:$4 sm:$0xff]   ;;  %v3220_v45 = vld [vmem:[%s3822_s17 + $0x64] ss:$8 sps:$4 sm:$0xff]   ;;  %s3976_s5 = scalar_lea.vmem [#allocation5], %s2943_s16 }
  0xd8   : > { %v3979_v46 = vld [vmem:[%s3976_s5 + $0x4] ss:$8 sps:$4 sm:$0xff]   ;;  %v3222_v47 = vld [vmem:[%s3822_s17 + $0x60] ss:$8 sps:$4 sm:$0xff]   ;;  %v3223_v49 = vld [vmem:[%s3822_s17 + $0x74] ss:$8 sps:$4 sm:$0xff]  }
  0xd9   : > { %995 = vmatpush1.bf16.msra.mxu0 %v3207_v36  ;;  %v3983_v48 = vld [vmem:[%s3976_s5] ss:$8 sps:$4 sm:$0xff]   ;;  %1024 = vmatprep.mubr.bf16.mxu0 %v3979_v46  ;;  %v3225_v50 = vld [vmem:[%s3822_s17 + $0x70] ss:$8 sps:$4 sm:$0xff]   ;;  %v3226_v52 = vld [vmem:[%s3822_s17 + $0x84] ss:$8 sps:$4 sm:$0xff]  }
  0xda   : > { %996 = vmatprep.subr.bf16.mxu0 %v3208_v37  ;;  %1697 = vxpose.xlu1.c.b16.start [1/8] %v3983_v48, 128  ;;  %v3990_v51 = vld [vmem:[%s3976_s5 + $0x10] ss:$8 sps:$4 sm:$0xff]   ;;  %v3228_v53 = vld [vmem:[%s3822_s17 + $0x80] ss:$8 sps:$4 sm:$0xff]   ;;  %v3229_v55 = vld [vmem:[%s3822_s17 + $0x94] ss:$8 sps:$4 sm:$0xff]  }
  0xdb   : > { %v3996_v54 = vld [vmem:[%s3976_s5 + $0x20] ss:$8 sps:$4 sm:$0xff]   ;;  %v3231_v57 = vld [vmem:[%s3822_s17 + $0x90] ss:$8 sps:$4 sm:$0xff]   ;;  %v3232_v59 = vld [vmem:[%s3822_s17 + $0xa4] ss:$8 sps:$4 sm:$0xff]  }
  0xdc   : > { %v4000_v56 = vld [vmem:[%s3976_s5 + $0x80] ss:$8 sps:$4 sm:$0xff]   ;;  %v4005_v58 = vld [vmem:[%s3976_s5 + $0x30] ss:$8 sps:$4 sm:$0xff]   ;;  %v3235_v62 = vld [vmem:[%s3822_s17 + $0xb4] ss:$8 sps:$4 sm:$0xff]  }
  0xdd   : > { %997 = vmatpush1.bf16.msra.mxu0 %v3210_v38  ;;  %1729 = vxpose.xlu0.c.b16.start [1/8] %v4000_v56, 128  ;;  %v4010_v60 = vld [vmem:[%s3976_s5 + $0x90] ss:$8 sps:$4 sm:$0xff]   ;;  %v3234_v61 = vld [vmem:[%s3822_s17 + $0xa0] ss:$8 sps:$4 sm:$0xff]   ;;  %v3238_v3 = vld [vmem:[%s3822_s17 + $0xc4] ss:$8 sps:$4 sm:$0xff]  }
  0xde   : > { %998 = vmatprep.subr.bf16.mxu0 %v3211_v39  ;;  %1698 = vxpose.xlu1.c.b16.cont [2/8] %v3990_v51, 128  ;;  %v4016_v63 = vld [vmem:[%s3976_s5 + $0x40] ss:$8 sps:$4 sm:$0xff]   ;;  %v3237_v1 = vld [vmem:[%s3822_s17 + $0xb0] ss:$8 sps:$4 sm:$0xff]   ;;  %v3241_v7 = vld [vmem:[%s3822_s17 + $0xd4] ss:$8 sps:$4 sm:$0xff]  }
  0xdf   : > { %v4020_v0 = vld [vmem:[%s3976_s5 + $0xa0] ss:$8 sps:$4 sm:$0xff]   ;;  %v4025_v2 = vld [vmem:[%s3976_s5 + $0x50] ss:$8 sps:$4 sm:$0xff]   ;;  %v3244_v11 = vld [vmem:[%s3822_s17 + $0xe4] ss:$8 sps:$4 sm:$0xff]  }
  0xe0   : > { %v4030_v4 = vld [vmem:[%s3976_s5 + $0xb0] ss:$8 sps:$4 sm:$0xff]   ;;  %v3240_v5 = vld [vmem:[%s3822_s17 + $0xc0] ss:$8 sps:$4 sm:$0xff]   ;;  %v3247_v14 = vld [vmem:[%s3822_s17 + $0xf4] ss:$8 sps:$4 sm:$0xff]  }
  0xe1   : > { %999 = vmatpush1.bf16.msra.mxu0 %v3213_v40  ;;  %1730 = vxpose.xlu0.c.b16.cont [2/8] %v4010_v60, 128  ;;  %v4035_v6 = vld [vmem:[%s3976_s5 + $0x60] ss:$8 sps:$4 sm:$0xff]   ;;  %v3243_v9 = vld [vmem:[%s3822_s17 + $0xd0] ss:$8 sps:$4 sm:$0xff]   ;;  %v3253_v17 = vld [vmem:[%s3976_s5 + $0x14] ss:$8 sps:$4 sm:$0xff]  }
  0xe2   : > { %1000 = vmatprep.subr.bf16.mxu0 %v3214_v41  ;;  %1699 = vxpose.xlu1.c.b16.cont [3/8] %v3996_v54, 128  ;;  %v4040_v8 = vld [vmem:[%s3976_s5 + $0xc0] ss:$8 sps:$4 sm:$0xff]   ;;  %v4045_v10 = vld [vmem:[%s3976_s5 + $0x70] ss:$8 sps:$4 sm:$0xff]   ;;  %v3256_v19 = vld [vmem:[%s3976_s5 + $0x24] ss:$8 sps:$4 sm:$0xff]  }
  0xe3   : > { %v4050_v12 = vld [vmem:[%s3976_s5 + $0xd0] ss:$8 sps:$4 sm:$0xff]   ;;  %v3246_v13 = vld [vmem:[%s3822_s17 + $0xe0] ss:$8 sps:$4 sm:$0xff]   ;;  %v3274_v20 = vld [vmem:[%s3976_s5 + $0x84] ss:$8 sps:$4 sm:$0xff]  }
  0xe4   : > { %v4057_v15 = vld [vmem:[%s3976_s5 + $0xe0] ss:$8 sps:$4 sm:$0xff]   ;;  %v3249_v16 = vld [vmem:[%s3822_s17 + $0xf0] ss:$8 sps:$4 sm:$0xff]   ;;  %v3259_v21 = vld [vmem:[%s3976_s5 + $0x34] ss:$8 sps:$4 sm:$0xff]  }
  0xe5   : > { %1001 = vmatpush1.bf16.msra.mxu0 %v3216_v42  ;;  %1731 = vxpose.xlu0.c.b16.cont [3/8] %v4020_v0, 128  ;;  %v3297_v18 = vld [vmem:[%s3976_s5 + $0xf0] ss:$8 sps:$4 sm:$0xff]   ;;  %v3277_v22 = vld [vmem:[%s3976_s5 + $0x94] ss:$8 sps:$4 sm:$0xff]   ;;  %v3262_v23 = vld [vmem:[%s3976_s5 + $0x44] ss:$8 sps:$4 sm:$0xff]  }
  0xe6   : > { %1002 = vmatprep.subr.bf16.mxu0 %v3217_v43  ;;  %1700 = vxpose.xlu1.c.b16.cont [4/8] %v4005_v58, 128  ;;  %v3280_v24 = vld [vmem:[%s3976_s5 + $0xa4] ss:$8 sps:$4 sm:$0xff]   ;;  %v3265_v25 = vld [vmem:[%s3976_s5 + $0x54] ss:$8 sps:$4 sm:$0xff]  }
  0xe7   : > { %v3283_v26 = vld [vmem:[%s3976_s5 + $0xb4] ss:$8 sps:$4 sm:$0xff]   ;;  %v3268_v27 = vld [vmem:[%s3976_s5 + $0x64] ss:$8 sps:$4 sm:$0xff]  }
  0xe8   : > { %v3286_v28 = vld [vmem:[%s3976_s5 + $0xc4] ss:$8 sps:$4 sm:$0xff]   ;;  %v3271_v29 = vld [vmem:[%s3976_s5 + $0x74] ss:$8 sps:$4 sm:$0xff]  }
  0xe9   : > { %1003 = vmatpush1.bf16.msra.mxu0 %v3219_v44  ;;  %1732 = vxpose.xlu0.c.b16.cont [4/8] %v4030_v4, 128  ;;  %v3289_v30 = vld [vmem:[%s3976_s5 + $0xd4] ss:$8 sps:$4 sm:$0xff]   ;;  %v3292_v31 = vld [vmem:[%s3976_s5 + $0xe4] ss:$8 sps:$4 sm:$0xff]  }
  0xea   : > { %1004 = vmatprep.subr.bf16.mxu0 %v3220_v45  ;;  %1701 = vxpose.xlu1.c.b16.cont [5/8] %v4016_v63, 128  ;;  %v3295_v32 = vld [vmem:[%s3976_s5 + $0xf4] ss:$8 sps:$4 sm:$0xff]   ;;  %v1185_v33 = vld [vmem:[%s3819_s7] sm:$0xff]  ;;  %v1186_v34 = vld [vmem:[%s3819_s7 + $0x8] sm:$0xff] }
  0xeb   : > { %v1217_v35 = vunpack.c.l.bf16 %v1185_v33  ;;  %v1218_v36 = vunpack.c.h.bf16 %v1185_v33  ;;  %v1219_v37 = vunpack.c.l.bf16 %v1186_v34  ;;  %v1220_v39 = vunpack.c.h.bf16 %v1186_v34  ;;  %v1345_v42 = vld [vmem:[#allocation3] sm:$0xff]  ;;  %v1187_v45 = vld [vmem:[%s3819_s7 + $0x10] sm:$0xff] }
  0xed   : > { %1005 = vmatpush1.bf16.msra.mxu0 %v3222_v47  ;;  %1733 = vxpose.xlu0.c.b16.cont [5/8] %v4040_v8, 128 }
  0xee   : > { %1006 = vmatprep.subr.bf16.mxu0 %v3223_v49  ;;  %1702 = vxpose.xlu1.c.b16.cont [6/8] %v4025_v2, 128 }
  0xf1   : > { %1007 = vmatpush1.bf16.msra.mxu0 %v3225_v50  ;;  %1734 = vxpose.xlu0.c.b16.cont [6/8] %v4050_v12, 128 }
  0xf2   : > { %1008 = vmatprep.subr.bf16.mxu0 %v3226_v52  ;;  %1703 = vxpose.xlu1.c.b16.cont [7/8] %v4035_v6, 128  ;;  %v1347_v52 = vld [vmem:[#allocation3 + $0x10] sm:$0xff] }
  0xf5   : > { %1009 = vmatpush1.bf16.msra.mxu0 %v3228_v53  ;;  %1735 = vxpose.xlu0.c.b16.cont [7/8] %v4057_v15, 128 }
  0xf6   : > { %1010 = vmatprep.subr.bf16.mxu0 %v3229_v55  ;;  %1704 = vxpose.xlu1.c.b16.end [8/8] %v4045_v10, 128 }
  0xf9   : > { %1011 = vmatpush1.bf16.msra.mxu0 %v3231_v57  ;;  %1736 = vxpose.xlu0.c.b16.end [8/8] %v3297_v18, 128  ;;  %v1348_v57 = vld [vmem:[#allocation3 + $0x18] sm:$0xff] }
  0xfa   : > { %1012 = vmatprep.subr.bf16.mxu0 %v3232_v59  ;;  %1713 = vxpose.xlu1.c.b16.start [1/8] %v3979_v46, 128 }
  0xfd   : > { %1013 = vmatpush1.bf16.msra.mxu0 %v3234_v61  ;;  %1745 = vxpose.xlu0.c.b16.start [1/8] %v3274_v20, 128 }
  0xfe   : > { %1014 = vmatprep.subr.bf16.mxu0 %v3235_v62  ;;  %1714 = vxpose.xlu1.c.b16.cont [2/8] %v3253_v17, 128 }
 0x101   : > { %1015 = vmatpush1.bf16.msra.mxu0 %v3237_v1  ;;  %1746 = vxpose.xlu0.c.b16.cont [2/8] %v3277_v22, 128 }
 0x102   : > { %1016 = vmatprep.subr.bf16.mxu0 %v3238_v3  ;;  %1715 = vxpose.xlu1.c.b16.cont [3/8] %v3256_v19, 128 }
 0x105   : > { %1017 = vmatpush1.bf16.msra.mxu0 %v3240_v5  ;;  %1747 = vxpose.xlu0.c.b16.cont [3/8] %v3280_v24, 128 }
 0x106   : > { %1018 = vmatprep.subr.bf16.mxu0 %v3241_v7  ;;  %1716 = vxpose.xlu1.c.b16.cont [4/8] %v3259_v21, 128  ;;  %v1349_v7 = vld [vmem:[#allocation3 + $0x20] sm:$0xff] }
 0x109   : > { %1019 = vmatpush1.bf16.msra.mxu0 %v3243_v9  ;;  %1748 = vxpose.xlu0.c.b16.cont [4/8] %v3283_v26, 128 }
 0x10a   : > { %1020 = vmatprep.subr.bf16.mxu0 %v3244_v11  ;;  %1717 = vxpose.xlu1.c.b16.cont [5/8] %v3262_v23, 128 }
 0x10d   : > { %1021 = vmatpush1.bf16.msra.mxu0 %v3246_v13  ;;  %1749 = vxpose.xlu0.c.b16.cont [5/8] %v3286_v28, 128 }
 0x10e   : > { %1022 = vmatprep.subr.bf16.mxu0 %v3247_v14  ;;  %1718 = vxpose.xlu1.c.b16.cont [6/8] %v3265_v25, 128 }
 0x111   : > { %1023 = vmatpush1.bf16.msra.mxu0 %v3249_v16  ;;  %1750 = vxpose.xlu0.c.b16.cont [6/8] %v3289_v30, 128  ;;  %v1351_v16 = vld [vmem:[#allocation3 + $0x30] sm:$0xff] }
 0x112   : > { %1719 = vxpose.xlu1.c.b16.cont [7/8] %v3268_v27, 128 }
 0x114   : > { %1025 = vmatmul.mubr.bf16.vlgmr.msra.gmra.mrb[0].mxu0 %v3983_v48  ;;  %v1346_v48 = vld [vmem:[#allocation3 + $0x8] sm:$0xff] }
 0x115   : > { %1034 = vmatprep.mubr.bf16.mxu0 %v3253_v17  ;;  %1751 = vxpose.xlu0.c.b16.cont [7/8] %v3292_v31, 128 }
 0x116   : > { %1720 = vxpose.xlu1.c.b16.end [8/8] %v3271_v29, 128 }
 0x119   : > { %1752 = vxpose.xlu0.c.b16.end [8/8] %v3295_v32, 128 }
 0x11c   : > { %1035 = vmatmul.mubr.bf16.gmra.mrb[4].mxu0 %v3990_v51 }
 0x11d   : > { %1044 = vmatprep.mubr.bf16.mxu0 %v3256_v19 }
 0x124   : > { %1045 = vmatmul.mubr.bf16.gmra.mrb[8].mxu0 %v3996_v54  ;;  %v1188_v54 = vld [vmem:[%s3819_s7 + $0x18] sm:$0xff] }
 0x125   : > { %1054 = vmatprep.mubr.bf16.mxu0 %v3259_v21  ;;  %v1223_v1 = vunpack.c.l.bf16 %v1188_v54 }
 0x12c   : > { %1055 = vmatmul.mubr.bf16.gmra.mrb[12].mxu0 %v4005_v58  ;;  %v1221_v58 = vunpack.c.l.bf16 %v1187_v45 }
 0x12d   : > { %1064 = vmatprep.mubr.bf16.mxu0 %v3262_v23 }
 0x134   : > { %1065 = vmatmul.mubr.bf16.gmra.mrb[16].mxu0 %v4016_v63  ;;  %v1222_v63 = vunpack.c.h.bf16 %v1187_v45 }
 0x135   : > { %1074 = vmatprep.mubr.bf16.mxu0 %v3265_v25 }
 0x13c   : > { %1075 = vmatmul.mubr.bf16.gmra.mrb[20].mxu0 %v4025_v2 }
 0x13d   : > { %1084 = vmatprep.mubr.bf16.mxu0 %v3268_v27 }
 0x143   : > { %v1737_v46 = vpop.trf.xlu0 }
 0x144   : > { %1085 = vmatmul.mubr.bf16.gmra.mrb[24].mxu0 %v4035_v6  ;;  %1793 = vmatprep.mubr.bf16.mxu1 %v1737_v46  ;;  %v1192_v46 = vld [vmem:[%s3819_s7 + $0x38] sm:$0xff] }
 0x145   : > { %1094 = vmatprep.mubr.bf16.mxu0 %v3271_v29 }
 0x14c   : > { %1095 = vmatmul.mubr.bf16.gmra.mrb[28].mxu0 %v4045_v10  ;;  %v1189_v10 = vld [vmem:[%s3819_s7 + $0x20] sm:$0xff] }
 0x14d   : > { %1104 = vmatprep.mubr.bf16.mxu0 %v3274_v20  ;;  %v1225_v23 = vunpack.c.l.bf16 %v1189_v10  ;;  %v1226_v27 = vunpack.c.h.bf16 %v1189_v10  ;;  %v1194_v10 = vld [vmem:[%s3819_s7 + $0x48] sm:$0xff] }
 0x154   : > { %1105 = vmatmul.mubr.bf16.gmra.mrb[32].mxu0 %v4000_v56 }
 0x155   : > { %1114 = vmatprep.mubr.bf16.mxu0 %v3277_v22  ;;  %v1352_v22 = vld [vmem:[#allocation3 + $0x38] sm:$0xff] }
 0x15c   : > { %1115 = vmatmul.mubr.bf16.gmra.mrb[36].mxu0 %v4010_v60 }
 0x15d   : > { %1124 = vmatprep.mubr.bf16.mxu0 %v3280_v24 }
 0x164   : > { %1125 = vmatmul.mubr.bf16.gmra.mrb[40].mxu0 %v4020_v0 }
 0x165   : > { %1134 = vmatprep.mubr.bf16.mxu0 %v3283_v26 }
 0x16c   : > { %1135 = vmatmul.mubr.bf16.gmra.mrb[44].mxu0 %v4030_v4  ;;  %v1224_v4 = vunpack.c.h.bf16 %v1188_v54 }
 0x16d   : > { %1144 = vmatprep.mubr.bf16.mxu0 %v3286_v28 }
 0x174   : > { %1145 = vmatmul.mubr.bf16.gmra.mrb[48].mxu0 %v4040_v8 }
 0x175   : > { %1154 = vmatprep.mubr.bf16.mxu0 %v3289_v30 }
 0x17c   : > { %1155 = vmatmul.mubr.bf16.gmra.mrb[52].mxu0 %v4050_v12  ;;  %v1350_v12 = vld [vmem:[#allocation3 + $0x28] sm:$0xff] }
 0x17d   : > { %1164 = vmatprep.mubr.bf16.mxu0 %v3292_v31 }
 0x184   : > { %1165 = vmatmul.mubr.bf16.gmra.mrb[56].mxu0 %v4057_v15 }
 0x185   : > { %1174 = vmatprep.mubr.bf16.mxu0 %v3295_v32 }
 0x18c   : > { %1175 = vmatmul.mubr.bf16.gmra.mrb[60].mxu0 %v3297_v18  ;;  %v1190_v18 = vld [vmem:[%s3819_s7 + $0x28] sm:$0xff] }
 0x18d   : > { %v1227_v29 = vunpack.c.l.bf16 %v1190_v18  ;;  %v1228_v32 = vunpack.c.h.bf16 %v1190_v18 }
 0x1e7   : > { %v1026_v38 = vpop.f32.mrb[0].mxu0 }
 0x1e8   : > { %v1281_v40 = vsub.f32 %v1026_v38, %v1217_v35  ;;  %v1028_v41 = vpop.f32.mrb[1].mxu0  ;;  %v1353_v35 = vld [vmem:[#allocation3 + $0x40] sm:$0xff]  ;;  %v1191_v38 = vld [vmem:[%s3819_s7 + $0x30] sm:$0xff] }
 0x1e9   : > { %v1282_v43 = vsub.f32 %v1028_v41, %v1218_v36  ;;  %v1030_v44 = vpop.f32.mrb[2].mxu0 }
 0x1ea   : > { %v1409_v47 = vmul.f32 %v1281_v40, %v1281_v40  ;;  %v1283_v49 = vsub.f32 %v1030_v44, %v1219_v37  ;;  %v1032_v50 = vpop.f32.mrb[3].mxu0  ;;  %v1355_v44 = vld [vmem:[#allocation3 + $0x50] sm:$0xff] }
 0x1eb   : > { %v1410_v51 = vmul.f32 %v1282_v43, %v1282_v43  ;;  %v1284_v53 = vsub.f32 %v1032_v50, %v1220_v39  ;;  %v1356_v50 = vld [vmem:[#allocation3 + $0x58] sm:$0xff] }
 0x1ec   : > { %v1473_v55 = vadd.f32 %v1409_v47, %v1345_v42  ;;  %v1411_v56 = vmul.f32 %v1283_v49, %v1283_v49  ;;  %v1665_v59 = vpack.c.bf16 %v1283_v49, %v1281_v40  ;;  %v1354_v40 = vld [vmem:[#allocation3 + $0x48] sm:$0xff] }
 0x1ed   : > { %v1474_v60 = vadd.f32 %v1410_v51, %v1346_v48  ;;  %v1412_v61 = vmul.f32 %v1284_v53, %v1284_v53  ;;  %v1666_v62 = vpack.c.bf16 %v1284_v53, %v1282_v43  ;;  %v1229_v51 = vunpack.c.l.bf16 %v1191_v38 }
 0x1ee   : > { %1537 = vst [vmem:[#allocation3] sm:$0xff] %v1473_v55  ;;  %v1475_v0 = vadd.f32 %v1411_v56, %v1347_v52  ;;  %v1230_v55 = vunpack.c.h.bf16 %v1191_v38  ;;  %v1196_v38 = vld [vmem:[%s3819_s7 + $0x58] sm:$0xff] }
 0x1ef   : > { %1538 = vst [vmem:[#allocation3 + $0x8] sm:$0xff] %v1474_v60  ;;  %v1476_v2 = vadd.f32 %v1412_v61, %v1348_v57  ;;  %v1036_v3 = vpop.f32.mrb[4].mxu0  ;;  %1761 = vmatprep.subr.bf16.mxu1 %v1666_v62  ;;  %v1231_v57 = vunpack.c.l.bf16 %v1192_v46  ;;  %v1232_v60 = vunpack.c.h.bf16 %v1192_v46 }
 0x1f0   : > { %1539 = vst [vmem:[#allocation3 + $0x10] sm:$0xff] %v1475_v0  ;;  %v1285_v5 = vsub.f32 %v1036_v3, %v1221_v58  ;;  %v1038_v6 = vpop.f32.mrb[5].mxu0  ;;  %1762 = vmatpush1.bf16.msra.mxu1 %v1665_v59 }
 0x1f1   : > { %1540 = vst [vmem:[#allocation3 + $0x18] sm:$0xff] %v1476_v2  ;;  %v1286_v8 = vsub.f32 %v1038_v6, %v1222_v63  ;;  %v1040_v9 = vpop.f32.mrb[6].mxu0  ;;  %v1357_v63 = vld [vmem:[#allocation3 + $0x60] sm:$0xff] }
 0x1f2   : > { %v1413_v11 = vmul.f32 %v1285_v5, %v1285_v5  ;;  %v1287_v13 = vsub.f32 %v1040_v9, %v1223_v1  ;;  %v1042_v14 = vpop.f32.mrb[7].mxu0  ;;  %v1193_v2 = vld [vmem:[%s3819_s7 + $0x40] sm:$0xff] }
 0x1f3   : > { %v1414_v15 = vmul.f32 %v1286_v8, %v1286_v8  ;;  %v1288_v17 = vsub.f32 %v1042_v14, %v1224_v4  ;;  %v1358_v4 = vld [vmem:[#allocation3 + $0x68] sm:$0xff]  ;;  %v1360_v14 = vld [vmem:[#allocation3 + $0x78] sm:$0xff] }
 0x1f4   : > { %v1477_v19 = vadd.f32 %v1413_v11, %v1349_v7  ;;  %v1415_v20 = vmul.f32 %v1287_v13, %v1287_v13  ;;  %v1667_v21 = vpack.c.bf16 %v1287_v13, %v1285_v5 }
 0x1f5   : > { %v1478_v24 = vadd.f32 %v1414_v15, %v1350_v12  ;;  %v1416_v25 = vmul.f32 %v1288_v17, %v1288_v17  ;;  %v1668_v26 = vpack.c.bf16 %v1288_v17, %v1286_v8  ;;  %v1359_v8 = vld [vmem:[#allocation3 + $0x70] sm:$0xff]  ;;  %v1233_v15 = vunpack.c.l.bf16 %v1193_v2 }
 0x1f6   : > { %1541 = vst [vmem:[#allocation3 + $0x20] sm:$0xff] %v1477_v19  ;;  %v1479_v28 = vadd.f32 %v1415_v20, %v1351_v16  ;;  %v1234_v19 = vunpack.c.h.bf16 %v1193_v2  ;;  %v1198_v2 = vld [vmem:[%s3819_s7 + $0x68] sm:$0xff] }
 0x1f7   : > { %1542 = vst [vmem:[#allocation3 + $0x28] sm:$0xff] %v1478_v24  ;;  %v1480_v30 = vadd.f32 %v1416_v25, %v1352_v22  ;;  %v1046_v31 = vpop.f32.mrb[8].mxu0  ;;  %1763 = vmatprep.subr.bf16.mxu1 %v1668_v26  ;;  %v1236_v24 = vunpack.c.h.bf16 %v1194_v10 }
 0x1f8   : > { %1543 = vst [vmem:[#allocation3 + $0x30] sm:$0xff] %v1479_v28  ;;  %v1289_v33 = vsub.f32 %v1046_v31, %v1225_v23  ;;  %v1048_v34 = vpop.f32.mrb[9].mxu0  ;;  %1764 = vmatpush1.bf16.msra.mxu1 %v1667_v21  ;;  %v1235_v21 = vunpack.c.l.bf16 %v1194_v10 }
 0x1f9   : > { %1544 = vst [vmem:[#allocation3 + $0x38] sm:$0xff] %v1480_v30  ;;  %v1290_v36 = vsub.f32 %v1048_v34, %v1226_v27  ;;  %v1050_v37 = vpop.f32.mrb[10].mxu0  ;;  %v1361_v27 = vld [vmem:[#allocation3 + $0x80] sm:$0xff]  ;;  %v1195_v30 = vld [vmem:[%s3819_s7 + $0x50] sm:$0xff] }
 0x1fa   : > { %v1417_v39 = vmul.f32 %v1289_v33, %v1289_v33  ;;  %v1291_v41 = vsub.f32 %v1050_v37, %v1227_v29  ;;  %v1052_v42 = vpop.f32.mrb[11].mxu0 }
 0x1fb   : > { %v1418_v43 = vmul.f32 %v1290_v36, %v1290_v36  ;;  %v1292_v45 = vsub.f32 %v1052_v42, %v1228_v32  ;;  %v1362_v32 = vld [vmem:[#allocation3 + $0x88] sm:$0xff]  ;;  %v1364_v42 = vld [vmem:[#allocation3 + $0x98] sm:$0xff] }
 0x1fc   : > { %v1481_v47 = vadd.f32 %v1417_v39, %v1353_v35  ;;  %v1419_v48 = vmul.f32 %v1291_v41, %v1291_v41  ;;  %v1669_v49 = vpack.c.bf16 %v1291_v41, %v1289_v33 }
 0x1fd   : > { %v1482_v52 = vadd.f32 %v1418_v43, %v1354_v40  ;;  %v1420_v53 = vmul.f32 %v1292_v45, %v1292_v45  ;;  %v1670_v54 = vpack.c.bf16 %v1292_v45, %v1290_v36  ;;  %v1363_v36 = vld [vmem:[#allocation3 + $0x90] sm:$0xff]  ;;  %v1237_v43 = vunpack.c.l.bf16 %v1195_v30 }
 0x1fe   : > { %1545 = vst [vmem:[#allocation3 + $0x40] sm:$0xff] %v1481_v47  ;;  %v1483_v56 = vadd.f32 %v1419_v48, %v1355_v44  ;;  %v1238_v47 = vunpack.c.h.bf16 %v1195_v30  ;;  %v1200_v30 = vld [vmem:[%s3819_s7 + $0x78] sm:$0xff] }
 0x1ff   : > { %1546 = vst [vmem:[#allocation3 + $0x48] sm:$0xff] %v1482_v52  ;;  %v1484_v58 = vadd.f32 %v1420_v53, %v1356_v50  ;;  %v1056_v59 = vpop.f32.mrb[12].mxu0  ;;  %1765 = vmatprep.subr.bf16.mxu1 %v1670_v54  ;;  %v1240_v52 = vunpack.c.h.bf16 %v1196_v38 }
 0x200   : > { %1547 = vst [vmem:[#allocation3 + $0x50] sm:$0xff] %v1483_v56  ;;  %v1293_v61 = vsub.f32 %v1056_v59, %v1229_v51  ;;  %v1058_v62 = vpop.f32.mrb[13].mxu0  ;;  %1766 = vmatpush1.bf16.msra.mxu1 %v1669_v49  ;;  %v1239_v49 = vunpack.c.l.bf16 %v1196_v38 }
 0x201   : > { %1548 = vst [vmem:[#allocation3 + $0x58] sm:$0xff] %v1484_v58  ;;  %v1294_v0 = vsub.f32 %v1058_v62, %v1230_v55  ;;  %v1060_v1 = vpop.f32.mrb[14].mxu0  ;;  %v1365_v55 = vld [vmem:[#allocation3 + $0xa0] sm:$0xff] }
 0x202   : > { %v1421_v3 = vmul.f32 %v1293_v61, %v1293_v61  ;;  %v1295_v5 = vsub.f32 %v1060_v1, %v1231_v57  ;;  %v1062_v6 = vpop.f32.mrb[15].mxu0  ;;  %v1197_v58 = vld [vmem:[%s3819_s7 + $0x60] sm:$0xff] }
 0x203   : > { %v1422_v7 = vmul.f32 %v1294_v0, %v1294_v0  ;;  %v1296_v9 = vsub.f32 %v1062_v6, %v1232_v60  ;;  %v1366_v60 = vld [vmem:[#allocation3 + $0xa8] sm:$0xff]  ;;  %v1368_v6 = vld [vmem:[#allocation3 + $0xb8] sm:$0xff] }
 0x204   : > { %v1485_v11 = vadd.f32 %v1421_v3, %v1357_v63  ;;  %v1423_v12 = vmul.f32 %v1295_v5, %v1295_v5  ;;  %v1671_v13 = vpack.c.bf16 %v1295_v5, %v1293_v61 }
 0x205   : > { %v1486_v16 = vadd.f32 %v1422_v7, %v1358_v4  ;;  %v1424_v17 = vmul.f32 %v1296_v9, %v1296_v9  ;;  %v1672_v18 = vpack.c.bf16 %v1296_v9, %v1294_v0  ;;  %v1367_v0 = vld [vmem:[#allocation3 + $0xb0] sm:$0xff]  ;;  %v1241_v7 = vunpack.c.l.bf16 %v1197_v58 }
 0x206   : > { %1549 = vst [vmem:[#allocation3 + $0x60] sm:$0xff] %v1485_v11  ;;  %v1487_v20 = vadd.f32 %v1423_v12, %v1359_v8  ;;  %v1242_v11 = vunpack.c.h.bf16 %v1197_v58  ;;  %v1202_v58 = vld [vmem:[%s3819_s7 + $0x88] sm:$0xff] }
 0x207   : > { %1550 = vst [vmem:[#allocation3 + $0x68] sm:$0xff] %v1486_v16  ;;  %v1488_v22 = vadd.f32 %v1424_v17, %v1360_v14  ;;  %v1066_v23 = vpop.f32.mrb[16].mxu0  ;;  %1767 = vmatprep.subr.bf16.mxu1 %v1672_v18  ;;  %v1244_v16 = vunpack.c.h.bf16 %v1198_v2 }
 0x208   : > { %1551 = vst [vmem:[#allocation3 + $0x70] sm:$0xff] %v1487_v20  ;;  %v1297_v25 = vsub.f32 %v1066_v23, %v1233_v15  ;;  %v1068_v26 = vpop.f32.mrb[17].mxu0  ;;  %1768 = vmatpush1.bf16.msra.mxu1 %v1671_v13  ;;  %v1243_v13 = vunpack.c.l.bf16 %v1198_v2 }
 0x209   : > { %1552 = vst [vmem:[#allocation3 + $0x78] sm:$0xff] %v1488_v22  ;;  %v1298_v28 = vsub.f32 %v1068_v26, %v1234_v19  ;;  %v1070_v29 = vpop.f32.mrb[18].mxu0  ;;  %v1369_v19 = vld [vmem:[#allocation3 + $0xc0] sm:$0xff]  ;;  %v1199_v22 = vld [vmem:[%s3819_s7 + $0x70] sm:$0xff] }
 0x20a   : > { %v1425_v31 = vmul.f32 %v1297_v25, %v1297_v25  ;;  %v1299_v33 = vsub.f32 %v1070_v29, %v1235_v21  ;;  %v1072_v34 = vpop.f32.mrb[19].mxu0 }
 0x20b   : > { %v1426_v35 = vmul.f32 %v1298_v28, %v1298_v28  ;;  %v1300_v37 = vsub.f32 %v1072_v34, %v1236_v24  ;;  %v1370_v24 = vld [vmem:[#allocation3 + $0xc8] sm:$0xff]  ;;  %v1372_v34 = vld [vmem:[#allocation3 + $0xd8] sm:$0xff] }
 0x20c   : > { %v1489_v39 = vadd.f32 %v1425_v31, %v1361_v27  ;;  %v1427_v40 = vmul.f32 %v1299_v33, %v1299_v33  ;;  %v1673_v41 = vpack.c.bf16 %v1299_v33, %v1297_v25 }
 0x20d   : > { %v1490_v44 = vadd.f32 %v1426_v35, %v1362_v32  ;;  %v1428_v45 = vmul.f32 %v1300_v37, %v1300_v37  ;;  %v1674_v46 = vpack.c.bf16 %v1300_v37, %v1298_v28  ;;  %v1371_v28 = vld [vmem:[#allocation3 + $0xd0] sm:$0xff]  ;;  %v1245_v35 = vunpack.c.l.bf16 %v1199_v22 }
 0x20e   : > { %1553 = vst [vmem:[#allocation3 + $0x80] sm:$0xff] %v1489_v39  ;;  %v1491_v48 = vadd.f32 %v1427_v40, %v1363_v36  ;;  %v1246_v39 = vunpack.c.h.bf16 %v1199_v22  ;;  %v1204_v22 = vld [vmem:[%s3819_s7 + $0x98] sm:$0xff] }
 0x20f   : > { %1554 = vst [vmem:[#allocation3 + $0x88] sm:$0xff] %v1490_v44  ;;  %v1492_v50 = vadd.f32 %v1428_v45, %v1364_v42  ;;  %v1076_v51 = vpop.f32.mrb[20].mxu0  ;;  %1769 = vmatprep.subr.bf16.mxu1 %v1674_v46  ;;  %v1248_v44 = vunpack.c.h.bf16 %v1200_v30 }
 0x210   : > { %1555 = vst [vmem:[#allocation3 + $0x90] sm:$0xff] %v1491_v48  ;;  %v1301_v53 = vsub.f32 %v1076_v51, %v1237_v43  ;;  %v1078_v54 = vpop.f32.mrb[21].mxu0  ;;  %1770 = vmatpush1.bf16.msra.mxu1 %v1673_v41  ;;  %v1247_v41 = vunpack.c.l.bf16 %v1200_v30 }
 0x211   : > { %1556 = vst [vmem:[#allocation3 + $0x98] sm:$0xff] %v1492_v50  ;;  %v1302_v56 = vsub.f32 %v1078_v54, %v1238_v47  ;;  %v1080_v57 = vpop.f32.mrb[22].mxu0  ;;  %v1373_v47 = vld [vmem:[#allocation3 + $0xe0] sm:$0xff] }
 0x212   : > { %v1429_v59 = vmul.f32 %v1301_v53, %v1301_v53  ;;  %v1303_v61 = vsub.f32 %v1080_v57, %v1239_v49  ;;  %v1082_v62 = vpop.f32.mrb[23].mxu0  ;;  %v1201_v50 = vld [vmem:[%s3819_s7 + $0x80] sm:$0xff] }
 0x213   : > { %v1430_v63 = vmul.f32 %v1302_v56, %v1302_v56  ;;  %v1304_v1 = vsub.f32 %v1082_v62, %v1240_v52  ;;  %v1374_v52 = vld [vmem:[#allocation3 + $0xe8] sm:$0xff]  ;;  %v1376_v62 = vld [vmem:[#allocation3 + $0xf8] sm:$0xff] }
 0x214   : > { %v1493_v3 = vadd.f32 %v1429_v59, %v1365_v55  ;;  %v1431_v4 = vmul.f32 %v1303_v61, %v1303_v61  ;;  %v1675_v5 = vpack.c.bf16 %v1303_v61, %v1301_v53 }
 0x215   : > { %v1494_v8 = vadd.f32 %v1430_v63, %v1366_v60  ;;  %v1432_v9 = vmul.f32 %v1304_v1, %v1304_v1  ;;  %v1676_v10 = vpack.c.bf16 %v1304_v1, %v1302_v56  ;;  %v1375_v56 = vld [vmem:[#allocation3 + $0xf0] sm:$0xff]  ;;  %v1249_v63 = vunpack.c.l.bf16 %v1201_v50 }
 0x216   : > { %1557 = vst [vmem:[#allocation3 + $0xa0] sm:$0xff] %v1493_v3  ;;  %v1495_v12 = vadd.f32 %v1431_v4, %v1367_v0  ;;  %v1250_v3 = vunpack.c.h.bf16 %v1201_v50  ;;  %v1206_v50 = vld [vmem:[%s3819_s7 + $0xa8] sm:$0xff] }
 0x217   : > { %1558 = vst [vmem:[#allocation3 + $0xa8] sm:$0xff] %v1494_v8  ;;  %v1496_v14 = vadd.f32 %v1432_v9, %v1368_v6  ;;  %v1086_v15 = vpop.f32.mrb[24].mxu0  ;;  %1771 = vmatprep.subr.bf16.mxu1 %v1676_v10  ;;  %v1252_v8 = vunpack.c.h.bf16 %v1202_v58 }
 0x218   : > { %1559 = vst [vmem:[#allocation3 + $0xb0] sm:$0xff] %v1495_v12  ;;  %v1305_v17 = vsub.f32 %v1086_v15, %v1241_v7  ;;  %v1088_v18 = vpop.f32.mrb[25].mxu0  ;;  %1772 = vmatpush1.bf16.msra.mxu1 %v1675_v5  ;;  %v1251_v5 = vunpack.c.l.bf16 %v1202_v58 }
 0x219   : > { %1560 = vst [vmem:[#allocation3 + $0xb8] sm:$0xff] %v1496_v14  ;;  %v1306_v20 = vsub.f32 %v1088_v18, %v1242_v11  ;;  %v1090_v21 = vpop.f32.mrb[26].mxu0  ;;  %v1377_v11 = vld [vmem:[#allocation3 + $0x100] sm:$0xff]  ;;  %v1203_v14 = vld [vmem:[%s3819_s7 + $0x90] sm:$0xff] }
 0x21a   : > { %v1433_v23 = vmul.f32 %v1305_v17, %v1305_v17  ;;  %v1307_v25 = vsub.f32 %v1090_v21, %v1243_v13  ;;  %v1092_v26 = vpop.f32.mrb[27].mxu0 }
 0x21b   : > { %v1434_v27 = vmul.f32 %v1306_v20, %v1306_v20  ;;  %v1308_v29 = vsub.f32 %v1092_v26, %v1244_v16  ;;  %v1378_v16 = vld [vmem:[#allocation3 + $0x108] sm:$0xff]  ;;  %v1380_v26 = vld [vmem:[#allocation3 + $0x118] sm:$0xff] }
 0x21c   : > { %v1497_v31 = vadd.f32 %v1433_v23, %v1369_v19  ;;  %v1435_v32 = vmul.f32 %v1307_v25, %v1307_v25  ;;  %v1677_v33 = vpack.c.bf16 %v1307_v25, %v1305_v17 }
 0x21d   : > { %v1498_v36 = vadd.f32 %v1434_v27, %v1370_v24  ;;  %v1436_v37 = vmul.f32 %v1308_v29, %v1308_v29  ;;  %v1678_v38 = vpack.c.bf16 %v1308_v29, %v1306_v20  ;;  %v1379_v20 = vld [vmem:[#allocation3 + $0x110] sm:$0xff]  ;;  %v1253_v27 = vunpack.c.l.bf16 %v1203_v14 }
 0x21e   : > { %1561 = vst [vmem:[#allocation3 + $0xc0] sm:$0xff] %v1497_v31  ;;  %v1499_v40 = vadd.f32 %v1435_v32, %v1371_v28  ;;  %v1254_v31 = vunpack.c.h.bf16 %v1203_v14  ;;  %v1208_v14 = vld [vmem:[%s3819_s7 + $0xb8] sm:$0xff] }
 0x21f   : > { %1562 = vst [vmem:[#allocation3 + $0xc8] sm:$0xff] %v1498_v36  ;;  %v1500_v42 = vadd.f32 %v1436_v37, %v1372_v34  ;;  %v1096_v43 = vpop.f32.mrb[28].mxu0  ;;  %1773 = vmatprep.subr.bf16.mxu1 %v1678_v38  ;;  %v1256_v36 = vunpack.c.h.bf16 %v1204_v22 }
 0x220   : > { %1563 = vst [vmem:[#allocation3 + $0xd0] sm:$0xff] %v1499_v40  ;;  %v1309_v45 = vsub.f32 %v1096_v43, %v1245_v35  ;;  %v1098_v46 = vpop.f32.mrb[29].mxu0  ;;  %1774 = vmatpush1.bf16.msra.mxu1 %v1677_v33  ;;  %v1255_v33 = vunpack.c.l.bf16 %v1204_v22 }
 0x221   : > { %1564 = vst [vmem:[#allocation3 + $0xd8] sm:$0xff] %v1500_v42  ;;  %v1310_v48 = vsub.f32 %v1098_v46, %v1246_v39  ;;  %v1100_v49 = vpop.f32.mrb[30].mxu0  ;;  %v1381_v39 = vld [vmem:[#allocation3 + $0x120] sm:$0xff] }
 0x222   : > { %v1437_v51 = vmul.f32 %v1309_v45, %v1309_v45  ;;  %v1311_v53 = vsub.f32 %v1100_v49, %v1247_v41  ;;  %v1102_v54 = vpop.f32.mrb[31].mxu0  ;;  %v1205_v42 = vld [vmem:[%s3819_s7 + $0xa0] sm:$0xff] }
 0x223   : > { %v1438_v55 = vmul.f32 %v1310_v48, %v1310_v48  ;;  %v1312_v57 = vsub.f32 %v1102_v54, %v1248_v44  ;;  %v1382_v44 = vld [vmem:[#allocation3 + $0x128] sm:$0xff]  ;;  %v1384_v54 = vld [vmem:[#allocation3 + $0x138] sm:$0xff] }
 0x224   : > { %v1501_v59 = vadd.f32 %v1437_v51, %v1373_v47  ;;  %v1439_v60 = vmul.f32 %v1311_v53, %v1311_v53  ;;  %v1679_v61 = vpack.c.bf16 %v1311_v53, %v1309_v45 }
 0x225   : > { %v1502_v0 = vadd.f32 %v1438_v55, %v1374_v52  ;;  %v1440_v1 = vmul.f32 %v1312_v57, %v1312_v57  ;;  %v1680_v2 = vpack.c.bf16 %v1312_v57, %v1310_v48  ;;  %v1383_v48 = vld [vmem:[#allocation3 + $0x130] sm:$0xff]  ;;  %v1257_v55 = vunpack.c.l.bf16 %v1205_v42 }
 0x226   : > { %1565 = vst [vmem:[#allocation3 + $0xe0] sm:$0xff] %v1501_v59  ;;  %v1503_v4 = vadd.f32 %v1439_v60, %v1375_v56  ;;  %v1258_v59 = vunpack.c.h.bf16 %v1205_v42  ;;  %v1210_v42 = vld [vmem:[%s3819_s7 + $0xc8] sm:$0xff] }
 0x227   : > { %1566 = vst [vmem:[#allocation3 + $0xe8] sm:$0xff] %v1502_v0  ;;  %v1504_v6 = vadd.f32 %v1440_v1, %v1376_v62  ;;  %v1106_v7 = vpop.f32.mrb[32].mxu0  ;;  %1775 = vmatprep.subr.bf16.mxu1 %v1680_v2  ;;  %v1260_v0 = vunpack.c.h.bf16 %v1206_v50 }
 0x228   : > { %1567 = vst [vmem:[#allocation3 + $0xf0] sm:$0xff] %v1503_v4  ;;  %v1313_v9 = vsub.f32 %v1106_v7, %v1249_v63  ;;  %v1108_v10 = vpop.f32.mrb[33].mxu0  ;;  %1776 = vmatpush1.bf16.msra.mxu1 %v1679_v61  ;;  %v1259_v61 = vunpack.c.l.bf16 %v1206_v50 }
 0x229   : > { %1568 = vst [vmem:[#allocation3 + $0xf8] sm:$0xff] %v1504_v6  ;;  %v1314_v12 = vsub.f32 %v1108_v10, %v1250_v3  ;;  %v1110_v13 = vpop.f32.mrb[34].mxu0  ;;  %v1385_v3 = vld [vmem:[#allocation3 + $0x140] sm:$0xff]  ;;  %v1207_v6 = vld [vmem:[%s3819_s7 + $0xb0] sm:$0xff] }
 0x22a   : > { %v1441_v15 = vmul.f32 %v1313_v9, %v1313_v9  ;;  %v1315_v17 = vsub.f32 %v1110_v13, %v1251_v5  ;;  %v1112_v18 = vpop.f32.mrb[35].mxu0 }
 0x22b   : > { %v1442_v19 = vmul.f32 %v1314_v12, %v1314_v12  ;;  %v1316_v21 = vsub.f32 %v1112_v18, %v1252_v8  ;;  %v1386_v8 = vld [vmem:[#allocation3 + $0x148] sm:$0xff]  ;;  %v1388_v18 = vld [vmem:[#allocation3 + $0x158] sm:$0xff] }
 0x22c   : > { %v1505_v23 = vadd.f32 %v1441_v15, %v1377_v11  ;;  %v1443_v24 = vmul.f32 %v1315_v17, %v1315_v17  ;;  %v1681_v25 = vpack.c.bf16 %v1315_v17, %v1313_v9 }
 0x22d   : > { %v1506_v28 = vadd.f32 %v1442_v19, %v1378_v16  ;;  %v1444_v29 = vmul.f32 %v1316_v21, %v1316_v21  ;;  %v1682_v30 = vpack.c.bf16 %v1316_v21, %v1314_v12  ;;  %v1387_v12 = vld [vmem:[#allocation3 + $0x150] sm:$0xff]  ;;  %v1261_v19 = vunpack.c.l.bf16 %v1207_v6 }
 0x22e   : > { %1569 = vst [vmem:[#allocation3 + $0x100] sm:$0xff] %v1505_v23  ;;  %v1507_v32 = vadd.f32 %v1443_v24, %v1379_v20  ;;  %v1262_v23 = vunpack.c.h.bf16 %v1207_v6  ;;  %v1212_v6 = vld [vmem:[%s3819_s7 + $0xd8] sm:$0xff] }
 0x22f   : > { %1570 = vst [vmem:[#allocation3 + $0x108] sm:$0xff] %v1506_v28  ;;  %v1508_v34 = vadd.f32 %v1444_v29, %v1380_v26  ;;  %v1116_v35 = vpop.f32.mrb[36].mxu0  ;;  %1777 = vmatprep.subr.bf16.mxu1 %v1682_v30  ;;  %v1264_v28 = vunpack.c.h.bf16 %v1208_v14 }
 0x230   : > { %1571 = vst [vmem:[#allocation3 + $0x110] sm:$0xff] %v1507_v32  ;;  %v1317_v37 = vsub.f32 %v1116_v35, %v1253_v27  ;;  %v1118_v38 = vpop.f32.mrb[37].mxu0  ;;  %1778 = vmatpush1.bf16.msra.mxu1 %v1681_v25  ;;  %v1263_v25 = vunpack.c.l.bf16 %v1208_v14 }
 0x231   : > { %1572 = vst [vmem:[#allocation3 + $0x118] sm:$0xff] %v1508_v34  ;;  %v1318_v40 = vsub.f32 %v1118_v38, %v1254_v31  ;;  %v1120_v41 = vpop.f32.mrb[38].mxu0  ;;  %v1389_v31 = vld [vmem:[#allocation3 + $0x160] sm:$0xff] }
 0x232   : > { %v1445_v43 = vmul.f32 %v1317_v37, %v1317_v37  ;;  %v1319_v45 = vsub.f32 %v1120_v41, %v1255_v33  ;;  %v1122_v46 = vpop.f32.mrb[39].mxu0  ;;  %v1209_v34 = vld [vmem:[%s3819_s7 + $0xc0] sm:$0xff] }
 0x233   : > { %v1446_v47 = vmul.f32 %v1318_v40, %v1318_v40  ;;  %v1320_v49 = vsub.f32 %v1122_v46, %v1256_v36  ;;  %v1390_v36 = vld [vmem:[#allocation3 + $0x168] sm:$0xff]  ;;  %v1392_v46 = vld [vmem:[#allocation3 + $0x178] sm:$0xff] }
 0x234   : > { %v1509_v51 = vadd.f32 %v1445_v43, %v1381_v39  ;;  %v1447_v52 = vmul.f32 %v1319_v45, %v1319_v45  ;;  %v1683_v53 = vpack.c.bf16 %v1319_v45, %v1317_v37 }
 0x235   : > { %v1510_v56 = vadd.f32 %v1446_v47, %v1382_v44  ;;  %v1448_v57 = vmul.f32 %v1320_v49, %v1320_v49  ;;  %v1684_v58 = vpack.c.bf16 %v1320_v49, %v1318_v40  ;;  %v1391_v40 = vld [vmem:[#allocation3 + $0x170] sm:$0xff]  ;;  %v1265_v47 = vunpack.c.l.bf16 %v1209_v34 }
 0x236   : > { %1573 = vst [vmem:[#allocation3 + $0x120] sm:$0xff] %v1509_v51  ;;  %v1511_v60 = vadd.f32 %v1447_v52, %v1383_v48  ;;  %v1266_v51 = vunpack.c.h.bf16 %v1209_v34  ;;  %v1214_v34 = vld [vmem:[%s3819_s7 + $0xe8] sm:$0xff] }
 0x237   : > { %1574 = vst [vmem:[#allocation3 + $0x128] sm:$0xff] %v1510_v56  ;;  %v1512_v62 = vadd.f32 %v1448_v57, %v1384_v54  ;;  %v1126_v63 = vpop.f32.mrb[40].mxu0  ;;  %1779 = vmatprep.subr.bf16.mxu1 %v1684_v58  ;;  %v1268_v56 = vunpack.c.h.bf16 %v1210_v42 }
 0x238   : > { %1575 = vst [vmem:[#allocation3 + $0x130] sm:$0xff] %v1511_v60  ;;  %v1321_v1 = vsub.f32 %v1126_v63, %v1257_v55  ;;  %v1128_v2 = vpop.f32.mrb[41].mxu0  ;;  %1780 = vmatpush1.bf16.msra.mxu1 %v1683_v53  ;;  %v1267_v53 = vunpack.c.l.bf16 %v1210_v42 }
 0x239   : > { %1576 = vst [vmem:[#allocation3 + $0x138] sm:$0xff] %v1512_v62  ;;  %v1322_v4 = vsub.f32 %v1128_v2, %v1258_v59  ;;  %v1130_v5 = vpop.f32.mrb[42].mxu0  ;;  %v1393_v59 = vld [vmem:[#allocation3 + $0x180] sm:$0xff]  ;;  %v1211_v62 = vld [vmem:[%s3819_s7 + $0xd0] sm:$0xff] }
 0x23a   : > { %v1449_v7 = vmul.f32 %v1321_v1, %v1321_v1  ;;  %v1323_v9 = vsub.f32 %v1130_v5, %v1259_v61  ;;  %v1132_v10 = vpop.f32.mrb[43].mxu0 }
 0x23b   : > { %v1450_v11 = vmul.f32 %v1322_v4, %v1322_v4  ;;  %v1324_v13 = vsub.f32 %v1132_v10, %v1260_v0  ;;  %v1394_v0 = vld [vmem:[#allocation3 + $0x188] sm:$0xff]  ;;  %v1396_v10 = vld [vmem:[#allocation3 + $0x198] sm:$0xff] }
 0x23c   : > { %v1513_v15 = vadd.f32 %v1449_v7, %v1385_v3  ;;  %v1451_v16 = vmul.f32 %v1323_v9, %v1323_v9  ;;  %v1685_v17 = vpack.c.bf16 %v1323_v9, %v1321_v1 }
 0x23d   : > { %v1514_v20 = vadd.f32 %v1450_v11, %v1386_v8  ;;  %v1452_v21 = vmul.f32 %v1324_v13, %v1324_v13  ;;  %v1686_v22 = vpack.c.bf16 %v1324_v13, %v1322_v4  ;;  %v1395_v4 = vld [vmem:[#allocation3 + $0x190] sm:$0xff]  ;;  %v1269_v11 = vunpack.c.l.bf16 %v1211_v62 }
 0x23e   : > { %1577 = vst [vmem:[#allocation3 + $0x140] sm:$0xff] %v1513_v15  ;;  %v1515_v24 = vadd.f32 %v1451_v16, %v1387_v12  ;;  %v1270_v15 = vunpack.c.h.bf16 %v1211_v62  ;;  %v1216_v62 = vld [vmem:[%s3819_s7 + $0xf8] sm:$0xff] }
 0x23f   : > { %1578 = vst [vmem:[#allocation3 + $0x148] sm:$0xff] %v1514_v20  ;;  %v1516_v26 = vadd.f32 %v1452_v21, %v1388_v18  ;;  %v1136_v27 = vpop.f32.mrb[44].mxu0  ;;  %1781 = vmatprep.subr.bf16.mxu1 %v1686_v22  ;;  %v1272_v20 = vunpack.c.h.bf16 %v1212_v6 }
 0x240   : > { %1579 = vst [vmem:[#allocation3 + $0x150] sm:$0xff] %v1515_v24  ;;  %v1325_v29 = vsub.f32 %v1136_v27, %v1261_v19  ;;  %v1138_v30 = vpop.f32.mrb[45].mxu0  ;;  %1782 = vmatpush1.bf16.msra.mxu1 %v1685_v17  ;;  %v1271_v17 = vunpack.c.l.bf16 %v1212_v6 }
 0x241   : > { %1580 = vst [vmem:[#allocation3 + $0x158] sm:$0xff] %v1516_v26  ;;  %v1326_v32 = vsub.f32 %v1138_v30, %v1262_v23  ;;  %v1140_v33 = vpop.f32.mrb[46].mxu0  ;;  %v1397_v23 = vld [vmem:[#allocation3 + $0x1a0] sm:$0xff] }
 0x242   : > { %v1453_v35 = vmul.f32 %v1325_v29, %v1325_v29  ;;  %v1327_v37 = vsub.f32 %v1140_v33, %v1263_v25  ;;  %v1142_v38 = vpop.f32.mrb[47].mxu0  ;;  %v1213_v26 = vld [vmem:[%s3819_s7 + $0xe0] sm:$0xff] }
 0x243   : > { %v1454_v39 = vmul.f32 %v1326_v32, %v1326_v32  ;;  %v1328_v41 = vsub.f32 %v1142_v38, %v1264_v28  ;;  %v1398_v28 = vld [vmem:[#allocation3 + $0x1a8] sm:$0xff]  ;;  %v1400_v38 = vld [vmem:[#allocation3 + $0x1b8] sm:$0xff] }
 0x244   : > { %v1517_v43 = vadd.f32 %v1453_v35, %v1389_v31  ;;  %v1455_v44 = vmul.f32 %v1327_v37, %v1327_v37  ;;  %v1687_v45 = vpack.c.bf16 %v1327_v37, %v1325_v29 }
 0x245   : > { %v1518_v48 = vadd.f32 %v1454_v39, %v1390_v36  ;;  %v1456_v49 = vmul.f32 %v1328_v41, %v1328_v41  ;;  %v1688_v50 = vpack.c.bf16 %v1328_v41, %v1326_v32  ;;  %v1399_v32 = vld [vmem:[#allocation3 + $0x1b0] sm:$0xff]  ;;  %v1273_v39 = vunpack.c.l.bf16 %v1213_v26 }
 0x246   : > { %1581 = vst [vmem:[#allocation3 + $0x160] sm:$0xff] %v1517_v43  ;;  %v1519_v52 = vadd.f32 %v1455_v44, %v1391_v40  ;;  %v1274_v43 = vunpack.c.h.bf16 %v1213_v26 }
 0x247   : > { %1582 = vst [vmem:[#allocation3 + $0x168] sm:$0xff] %v1518_v48  ;;  %v1520_v54 = vadd.f32 %v1456_v49, %v1392_v46  ;;  %v1146_v55 = vpop.f32.mrb[48].mxu0  ;;  %1783 = vmatprep.subr.bf16.mxu1 %v1688_v50  ;;  %v1276_v48 = vunpack.c.h.bf16 %v1214_v34 }
 0x248   : > { %1583 = vst [vmem:[#allocation3 + $0x170] sm:$0xff] %v1519_v52  ;;  %v1329_v57 = vsub.f32 %v1146_v55, %v1265_v47  ;;  %v1148_v58 = vpop.f32.mrb[49].mxu0  ;;  %1784 = vmatpush1.bf16.msra.mxu1 %v1687_v45  ;;  %v1275_v45 = vunpack.c.l.bf16 %v1214_v34  ;;  %v1705_v34 = vpop.trf.xlu1 }
 0x249   : > { %1584 = vst [vmem:[#allocation3 + $0x178] sm:$0xff] %v1520_v54  ;;  %v1330_v60 = vsub.f32 %v1148_v58, %v1266_v51  ;;  %v1150_v61 = vpop.f32.mrb[50].mxu0  ;;  %v1401_v51 = vld [vmem:[#allocation3 + $0x1c0] sm:$0xff]  ;;  %v1215_v54 = vld [vmem:[%s3819_s7 + $0xf0] sm:$0xff] }
 0x24a   : > { %v1457_v63 = vmul.f32 %v1329_v57, %v1329_v57  ;;  %v1331_v1 = vsub.f32 %v1150_v61, %v1267_v53  ;;  %v1152_v2 = vpop.f32.mrb[51].mxu0 }
 0x24b   : > { %v1458_v3 = vmul.f32 %v1330_v60, %v1330_v60  ;;  %v1332_v5 = vsub.f32 %v1152_v2, %v1268_v56  ;;  %v1402_v56 = vld [vmem:[#allocation3 + $0x1c8] sm:$0xff]  ;;  %v1404_v2 = vld [vmem:[#allocation3 + $0x1d8] sm:$0xff] }
 0x24c   : > { %v1521_v7 = vadd.f32 %v1457_v63, %v1393_v59  ;;  %v1459_v8 = vmul.f32 %v1331_v1, %v1331_v1  ;;  %v1689_v9 = vpack.c.bf16 %v1331_v1, %v1329_v57 }
 0x24d   : > { %v1522_v12 = vadd.f32 %v1458_v3, %v1394_v0  ;;  %v1460_v13 = vmul.f32 %v1332_v5, %v1332_v5  ;;  %v1690_v14 = vpack.c.bf16 %v1332_v5, %v1330_v60  ;;  %v1403_v60 = vld [vmem:[#allocation3 + $0x1d0] sm:$0xff]  ;;  %v1277_v3 = vunpack.c.l.bf16 %v1215_v54 }
 0x24e   : > { %1585 = vst [vmem:[#allocation3 + $0x180] sm:$0xff] %v1521_v7  ;;  %v1523_v16 = vadd.f32 %v1459_v8, %v1395_v4  ;;  %v1278_v7 = vunpack.c.h.bf16 %v1215_v54 }
 0x24f   : > { %1586 = vst [vmem:[#allocation3 + $0x188] sm:$0xff] %v1522_v12  ;;  %v1524_v18 = vadd.f32 %v1460_v13, %v1396_v10  ;;  %v1156_v19 = vpop.f32.mrb[52].mxu0  ;;  %1785 = vmatprep.subr.bf16.mxu1 %v1690_v14  ;;  %v1280_v12 = vunpack.c.h.bf16 %v1216_v62 }
 0x250   : > { %1587 = vst [vmem:[#allocation3 + $0x190] sm:$0xff] %v1523_v16  ;;  %v1333_v21 = vsub.f32 %v1156_v19, %v1269_v11  ;;  %v1158_v22 = vpop.f32.mrb[53].mxu0  ;;  %1786 = vmatpush1.bf16.msra.mxu1 %v1689_v9  ;;  %v1279_v9 = vunpack.c.l.bf16 %v1216_v62  ;;  %v1406_v19 = vld [vmem:[#allocation3 + $0x1e8] sm:$0xff] }
 0x251   : > { %1588 = vst [vmem:[#allocation3 + $0x198] sm:$0xff] %v1524_v18  ;;  %v1334_v24 = vsub.f32 %v1158_v22, %v1270_v15  ;;  %v1160_v25 = vpop.f32.mrb[54].mxu0  ;;  %v1405_v15 = vld [vmem:[#allocation3 + $0x1e0] sm:$0xff] }
 0x252   : > { %v1461_v27 = vmul.f32 %v1333_v21, %v1333_v21  ;;  %v1335_v29 = vsub.f32 %v1160_v25, %v1271_v17  ;;  %v1162_v30 = vpop.f32.mrb[55].mxu0 }
 0x253   : > { %v1462_v31 = vmul.f32 %v1334_v24, %v1334_v24  ;;  %v1336_v33 = vsub.f32 %v1162_v30, %v1272_v20 }
 0x254   : > { %v1525_v35 = vadd.f32 %v1461_v27, %v1397_v23  ;;  %v1463_v36 = vmul.f32 %v1335_v29, %v1335_v29  ;;  %v1691_v37 = vpack.c.bf16 %v1335_v29, %v1333_v21  ;;  %v1407_v23 = vld [vmem:[#allocation3 + $0x1f0] sm:$0xff] }
 0x255   : > { %v1526_v40 = vadd.f32 %v1462_v31, %v1398_v28  ;;  %v1464_v41 = vmul.f32 %v1336_v33, %v1336_v33  ;;  %v1692_v42 = vpack.c.bf16 %v1336_v33, %v1334_v24  ;;  %v1408_v28 = vld [vmem:[#allocation3 + $0x1f8] sm:$0xff] }
 0x256   : > { %1589 = vst [vmem:[#allocation3 + $0x1a0] sm:$0xff] %v1525_v35  ;;  %v1527_v44 = vadd.f32 %v1463_v36, %v1399_v32  ;;  %v1738_v35 = vpop.trf.xlu0  ;;  %v1706_v36 = vpop.trf.xlu1 }
 0x257   : > { %1590 = vst [vmem:[#allocation3 + $0x1a8] sm:$0xff] %v1526_v40  ;;  %v1528_v46 = vadd.f32 %v1464_v41, %v1400_v38  ;;  %v1166_v47 = vpop.f32.mrb[56].mxu0  ;;  %1787 = vmatprep.subr.bf16.mxu1 %v1692_v42 }
 0x258   : > { %1591 = vst [vmem:[#allocation3 + $0x1b0] sm:$0xff] %v1527_v44  ;;  %v1337_v49 = vsub.f32 %v1166_v47, %v1273_v39  ;;  %v1168_v50 = vpop.f32.mrb[57].mxu0  ;;  %1788 = vmatpush1.bf16.msra.mxu1 %v1691_v37 }
 0x259   : > { %1592 = vst [vmem:[#allocation3 + $0x1b8] sm:$0xff] %v1528_v46  ;;  %v1338_v52 = vsub.f32 %v1168_v50, %v1274_v43  ;;  %v1170_v53 = vpop.f32.mrb[58].mxu0 }
 0x25a   : > { %v1465_v55 = vmul.f32 %v1337_v49, %v1337_v49  ;;  %v1339_v57 = vsub.f32 %v1170_v53, %v1275_v45  ;;  %v1172_v58 = vpop.f32.mrb[59].mxu0  ;;  %v1739_v37 = vpop.trf.xlu0 }
 0x25b   : > { %v1466_v59 = vmul.f32 %v1338_v52, %v1338_v52  ;;  %v1340_v61 = vsub.f32 %v1172_v58, %v1276_v48  ;;  %v1707_v38 = vpop.trf.xlu1 }
 0x25c   : > { %v1529_v63 = vadd.f32 %v1465_v55, %v1401_v51  ;;  %v1467_v0 = vmul.f32 %v1339_v57, %v1339_v57  ;;  %v1693_v1 = vpack.c.bf16 %v1339_v57, %v1337_v49 }
 0x25d   : > { %v1530_v4 = vadd.f32 %v1466_v59, %v1402_v56  ;;  %v1468_v5 = vmul.f32 %v1340_v61, %v1340_v61  ;;  %v1694_v6 = vpack.c.bf16 %v1340_v61, %v1338_v52 }
 0x25e   : > { %1593 = vst [vmem:[#allocation3 + $0x1c0] sm:$0xff] %v1529_v63  ;;  %v1531_v8 = vadd.f32 %v1467_v0, %v1403_v60  ;;  %v1740_v39 = vpop.trf.xlu0 }
 0x25f   : > { %1594 = vst [vmem:[#allocation3 + $0x1c8] sm:$0xff] %v1530_v4  ;;  %v1532_v10 = vadd.f32 %v1468_v5, %v1404_v2  ;;  %v1176_v11 = vpop.f32.mrb[60].mxu0  ;;  %1789 = vmatprep.subr.bf16.mxu1 %v1694_v6  ;;  %v1708_v40 = vpop.trf.xlu1  ;;  %v1602_v2 = vld [vmem:[#allocation2 + $0x8] sm:$0xff]  ;;  %v1603_v4 = vld [vmem:[#allocation2 + $0x10] sm:$0xff] }
 0x260   : > { %1595 = vst [vmem:[#allocation3 + $0x1d0] sm:$0xff] %v1531_v8  ;;  %v1341_v13 = vsub.f32 %v1176_v11, %v1277_v3  ;;  %v1178_v14 = vpop.f32.mrb[61].mxu0  ;;  %1790 = vmatpush1.bf16.msra.mxu1 %v1693_v1  ;;  %v1601_v1 = vld [vmem:[#allocation2] sm:$0xff] }
 0x261   : > { %1596 = vst [vmem:[#allocation3 + $0x1d8] sm:$0xff] %v1532_v10  ;;  %v1342_v16 = vsub.f32 %v1178_v14, %v1278_v7  ;;  %v1180_v17 = vpop.f32.mrb[62].mxu0  ;;  %v1604_v7 = vld [vmem:[#allocation2 + $0x18] sm:$0xff]  ;;  %v1606_v14 = vld [vmem:[#allocation2 + $0x28] sm:$0xff] }
 0x262   : > { %v1469_v18 = vmul.f32 %v1341_v13, %v1341_v13  ;;  %v1343_v20 = vsub.f32 %v1180_v17, %v1279_v9  ;;  %v1182_v21 = vpop.f32.mrb[63].mxu0  ;;  %v1741_v41 = vpop.trf.xlu0 }
 0x263   : > { %v1470_v22 = vmul.f32 %v1342_v16, %v1342_v16  ;;  %v1344_v24 = vsub.f32 %v1182_v21, %v1280_v12  ;;  %v1709_v42 = vpop.trf.xlu1 }
 0x264   : > { %v1533_v25 = vadd.f32 %v1469_v18, %v1405_v15  ;;  %v1471_v26 = vmul.f32 %v1343_v20, %v1343_v20  ;;  %v1695_v27 = vpack.c.bf16 %v1343_v20, %v1341_v13  ;;  %v1605_v13 = vld [vmem:[#allocation2 + $0x20] sm:$0xff] }
 0x265   : > { %v1534_v29 = vadd.f32 %v1470_v22, %v1406_v19  ;;  %v1472_v30 = vmul.f32 %v1344_v24, %v1344_v24  ;;  %v1696_v31 = vpack.c.bf16 %v1344_v24, %v1342_v16  ;;  %v1607_v16 = vld [vmem:[#allocation2 + $0x30] sm:$0xff]  ;;  %v1608_v19 = vld [vmem:[#allocation2 + $0x38] sm:$0xff] }
 0x266   : > { %1597 = vst [vmem:[#allocation3 + $0x1e0] sm:$0xff] %v1533_v25  ;;  %v1535_v32 = vadd.f32 %v1471_v26, %v1407_v23  ;;  %v1742_v43 = vpop.trf.xlu0  ;;  %v1609_v25 = vld [vmem:[#allocation2 + $0x40] sm:$0xff]  ;;  %v1610_v26 = vld [vmem:[#allocation2 + $0x48] sm:$0xff] }
 0x267   : > { %1598 = vst [vmem:[#allocation3 + $0x1e8] sm:$0xff] %v1534_v29  ;;  %v1536_v33 = vadd.f32 %v1472_v30, %v1408_v28  ;;  %1791 = vmatprep.subr.bf16.mxu1 %v1696_v31  ;;  %v1710_v44 = vpop.trf.xlu1  ;;  %v1611_v28 = vld [vmem:[#allocation2 + $0x50] sm:$0xff]  ;;  %v1612_v31 = vld [vmem:[#allocation2 + $0x58] sm:$0xff] }
 0x268   : > { %1599 = vst [vmem:[#allocation3 + $0x1f0] sm:$0xff] %v1535_v32  ;;  %1792 = vmatpush1.bf16.msra.mxu1 %v1695_v27 }
 0x269   : > { %1600 = vst [vmem:[#allocation3 + $0x1f8] sm:$0xff] %v1536_v33 }
 0x26a   : > { %v1743_v45 = vpop.trf.xlu0 }
 0x26b   : > { %1794 = vmatmul.mubr.bf16.vlgmr.msra.gmra.mrb[0].mxu1 %v1705_v34  ;;  %v1711_v46 = vpop.trf.xlu1 }
 0x26c   : > { %1803 = vmatprep.mubr.bf16.mxu1 %v1738_v35 }
 0x26e   : > { %v1744_v47 = vpop.trf.xlu0 }
 0x26f   : > { %v1712_v48 = vpop.trf.xlu1 }
 0x272   : > { %v1753_v49 = vpop.trf.xlu0 }
 0x273   : > { %1804 = vmatmul.mubr.bf16.gmra.mrb[4].mxu1 %v1706_v36  ;;  %v1721_v50 = vpop.trf.xlu1 }
 0x274   : > { %1813 = vmatprep.mubr.bf16.mxu1 %v1739_v37  ;;  %v1613_v37 = vld [vmem:[#allocation2 + $0x60] sm:$0xff] }
 0x276   : > { %v1754_v51 = vpop.trf.xlu0 }
 0x277   : > { %v1722_v52 = vpop.trf.xlu1 }
 0x27a   : > { %v1755_v53 = vpop.trf.xlu0 }
 0x27b   : > { %1814 = vmatmul.mubr.bf16.gmra.mrb[8].mxu1 %v1707_v38  ;;  %v1723_v54 = vpop.trf.xlu1  ;;  %v1614_v38 = vld [vmem:[#allocation2 + $0x68] sm:$0xff] }
 0x27c   : > { %1823 = vmatprep.mubr.bf16.mxu1 %v1740_v39 }
 0x27e   : > { %v1756_v55 = vpop.trf.xlu0 }
 0x27f   : > { %v1724_v56 = vpop.trf.xlu1 }
 0x282   : > { %v1757_v57 = vpop.trf.xlu0 }
 0x283   : > { %1824 = vmatmul.mubr.bf16.gmra.mrb[12].mxu1 %v1708_v40  ;;  %v1725_v58 = vpop.trf.xlu1  ;;  %v1615_v40 = vld [vmem:[#allocation2 + $0x70] sm:$0xff] }
 0x284   : > { %1833 = vmatprep.mubr.bf16.mxu1 %v1741_v41 }
 0x286   : > { %v1758_v59 = vpop.trf.xlu0 }
 0x287   : > { %v1726_v60 = vpop.trf.xlu1 }
 0x28a   : > { %v1759_v61 = vpop.trf.xlu0 }
 0x28b   : > { %1834 = vmatmul.mubr.bf16.gmra.mrb[16].mxu1 %v1709_v42  ;;  %v1727_v62 = vpop.trf.xlu1 }
 0x28c   : > { %1843 = vmatprep.mubr.bf16.mxu1 %v1742_v43  ;;  %v1616_v43 = vld [vmem:[#allocation2 + $0x78] sm:$0xff] }
 0x28e   : > { %v1760_v63 = vpop.trf.xlu0 }
 0x28f   : > { %v1728_v0 = vpop.trf.xlu1 }
 0x293   : > { %1844 = vmatmul.mubr.bf16.gmra.mrb[20].mxu1 %v1710_v44 }
 0x294   : > { %1853 = vmatprep.mubr.bf16.mxu1 %v1743_v45 }
 0x29b   : > { %1854 = vmatmul.mubr.bf16.gmra.mrb[24].mxu1 %v1711_v46 }
 0x29c   : > { %1863 = vmatprep.mubr.bf16.mxu1 %v1744_v47 }
 0x2a3   : > { %1864 = vmatmul.mubr.bf16.gmra.mrb[28].mxu1 %v1712_v48 }
 0x2a4   : > { %1873 = vmatprep.mubr.bf16.mxu1 %v1753_v49  ;;  %v1617_v49 = vld [vmem:[#allocation2 + $0x80] sm:$0xff] }
 0x2ab   : > { %1874 = vmatmul.mubr.bf16.gmra.mrb[32].mxu1 %v1721_v50  ;;  %v1618_v50 = vld [vmem:[#allocation2 + $0x88] sm:$0xff] }
 0x2ac   : > { %1883 = vmatprep.mubr.bf16.mxu1 %v1754_v51 }
 0x2b3   : > { %1884 = vmatmul.mubr.bf16.gmra.mrb[36].mxu1 %v1722_v52  ;;  %v1619_v52 = vld [vmem:[#allocation2 + $0x90] sm:$0xff] }
 0x2b4   : > { %1893 = vmatprep.mubr.bf16.mxu1 %v1755_v53 }
 0x2bb   : > { %1894 = vmatmul.mubr.bf16.gmra.mrb[40].mxu1 %v1723_v54 }
 0x2bc   : > { %1903 = vmatprep.mubr.bf16.mxu1 %v1756_v55  ;;  %v1620_v55 = vld [vmem:[#allocation2 + $0x98] sm:$0xff] }
 0x2c3   : > { %1904 = vmatmul.mubr.bf16.gmra.mrb[44].mxu1 %v1724_v56 }
 0x2c4   : > { %1913 = vmatprep.mubr.bf16.mxu1 %v1757_v57 }
 0x2cb   : > { %1914 = vmatmul.mubr.bf16.gmra.mrb[48].mxu1 %v1725_v58 }
 0x2cc   : > { %1923 = vmatprep.mubr.bf16.mxu1 %v1758_v59 }
 0x2d3   : > { %1924 = vmatmul.mubr.bf16.gmra.mrb[52].mxu1 %v1726_v60 }
 0x2d4   : > { %1933 = vmatprep.mubr.bf16.mxu1 %v1759_v61  ;;  %v1621_v61 = vld [vmem:[#allocation2 + $0xa0] sm:$0xff] }
 0x2db   : > { %1934 = vmatmul.mubr.bf16.gmra.mrb[56].mxu1 %v1727_v62  ;;  %v1622_v62 = vld [vmem:[#allocation2 + $0xa8] sm:$0xff] }
 0x2dc   : > { %1943 = vmatprep.mubr.bf16.mxu1 %v1760_v63 }
 0x2e3   : > { %1944 = vmatmul.mubr.bf16.gmra.mrb[60].mxu1 %v1728_v0  ;;  %v1623_v0 = vld [vmem:[#allocation2 + $0xb0] sm:$0xff] }
 0x33e   : > { %v1795_v3 = vpop.f32.mrb[0].mxu1 }
 0x33f   : > { %v1954_v5 = vadd.f32 %v1795_v3, %v1601_v1  ;;  %v1797_v6 = vpop.f32.mrb[1].mxu1  ;;  %v1624_v3 = vld [vmem:[#allocation2 + $0xb8] sm:$0xff] }
 0x340   : > { %v1955_v8 = vadd.f32 %v1797_v6, %v1602_v2  ;;  %v1799_v9 = vpop.f32.mrb[2].mxu1 }
 0x341   : > { %2018 = vst [vmem:[#allocation2] sm:$0xff] %v1954_v5  ;;  %v1956_v10 = vadd.f32 %v1799_v9, %v1603_v4  ;;  %v1801_v11 = vpop.f32.mrb[3].mxu1  ;;  %v1625_v9 = vld [vmem:[#allocation2 + $0xc0] sm:$0xff] }
 0x342   : > { %2019 = vst [vmem:[#allocation2 + $0x8] sm:$0xff] %v1955_v8  ;;  %v1957_v12 = vadd.f32 %v1801_v11, %v1604_v7 }
 0x343   : > { %2020 = vst [vmem:[#allocation2 + $0x10] sm:$0xff] %v1956_v10  ;;  %v1626_v10 = vld [vmem:[#allocation2 + $0xc8] sm:$0xff] }
 0x344   : > { %2021 = vst [vmem:[#allocation2 + $0x18] sm:$0xff] %v1957_v12  ;;  %v1627_v12 = vld [vmem:[#allocation2 + $0xd0] sm:$0xff] }
 0x346   : > { %v1805_v15 = vpop.f32.mrb[4].mxu1 }
 0x347   : > { %v1958_v17 = vadd.f32 %v1805_v15, %v1605_v13  ;;  %v1807_v18 = vpop.f32.mrb[5].mxu1  ;;  %v1628_v15 = vld [vmem:[#allocation2 + $0xd8] sm:$0xff] }
 0x348   : > { %v1959_v20 = vadd.f32 %v1807_v18, %v1606_v14  ;;  %v1809_v21 = vpop.f32.mrb[6].mxu1 }
 0x349   : > { %2022 = vst [vmem:[#allocation2 + $0x20] sm:$0xff] %v1958_v17  ;;  %v1960_v22 = vadd.f32 %v1809_v21, %v1607_v16  ;;  %v1811_v23 = vpop.f32.mrb[7].mxu1  ;;  %v1629_v21 = vld [vmem:[#allocation2 + $0xe0] sm:$0xff] }
 0x34a   : > { %2023 = vst [vmem:[#allocation2 + $0x28] sm:$0xff] %v1959_v20  ;;  %v1961_v24 = vadd.f32 %v1811_v23, %v1608_v19 }
 0x34b   : > { %2024 = vst [vmem:[#allocation2 + $0x30] sm:$0xff] %v1960_v22  ;;  %v1630_v22 = vld [vmem:[#allocation2 + $0xe8] sm:$0xff] }
 0x34c   : > { %2025 = vst [vmem:[#allocation2 + $0x38] sm:$0xff] %v1961_v24  ;;  %v1631_v24 = vld [vmem:[#allocation2 + $0xf0] sm:$0xff] }
 0x34e   : > { %v1815_v27 = vpop.f32.mrb[8].mxu1 }
 0x34f   : > { %v1962_v29 = vadd.f32 %v1815_v27, %v1609_v25  ;;  %v1817_v30 = vpop.f32.mrb[9].mxu1  ;;  %v1632_v27 = vld [vmem:[#allocation2 + $0xf8] sm:$0xff] }
 0x350   : > { %v1963_v32 = vadd.f32 %v1817_v30, %v1610_v26  ;;  %v1819_v33 = vpop.f32.mrb[10].mxu1 }
 0x351   : > { %2026 = vst [vmem:[#allocation2 + $0x40] sm:$0xff] %v1962_v29  ;;  %v1964_v34 = vadd.f32 %v1819_v33, %v1611_v28  ;;  %v1821_v35 = vpop.f32.mrb[11].mxu1  ;;  %v1633_v33 = vld [vmem:[#allocation2 + $0x100] sm:$0xff] }
 0x352   : > { %2027 = vst [vmem:[#allocation2 + $0x48] sm:$0xff] %v1963_v32  ;;  %v1965_v36 = vadd.f32 %v1821_v35, %v1612_v31 }
 0x353   : > { %2028 = vst [vmem:[#allocation2 + $0x50] sm:$0xff] %v1964_v34  ;;  %v1634_v34 = vld [vmem:[#allocation2 + $0x108] sm:$0xff] }
 0x354   : > { %2029 = vst [vmem:[#allocation2 + $0x58] sm:$0xff] %v1965_v36  ;;  %v1635_v36 = vld [vmem:[#allocation2 + $0x110] sm:$0xff] }
 0x356   : > { %v1825_v39 = vpop.f32.mrb[12].mxu1 }
 0x357   : > { %v1966_v41 = vadd.f32 %v1825_v39, %v1613_v37  ;;  %v1827_v42 = vpop.f32.mrb[13].mxu1  ;;  %v1636_v39 = vld [vmem:[#allocation2 + $0x118] sm:$0xff] }
 0x358   : > { %v1967_v44 = vadd.f32 %v1827_v42, %v1614_v38  ;;  %v1829_v45 = vpop.f32.mrb[14].mxu1 }
 0x359   : > { %2030 = vst [vmem:[#allocation2 + $0x60] sm:$0xff] %v1966_v41  ;;  %v1968_v46 = vadd.f32 %v1829_v45, %v1615_v40  ;;  %v1831_v47 = vpop.f32.mrb[15].mxu1  ;;  %v1637_v45 = vld [vmem:[#allocation2 + $0x120] sm:$0xff] }
 0x35a   : > { %2031 = vst [vmem:[#allocation2 + $0x68] sm:$0xff] %v1967_v44  ;;  %v1969_v48 = vadd.f32 %v1831_v47, %v1616_v43 }
 0x35b   : > { %2032 = vst [vmem:[#allocation2 + $0x70] sm:$0xff] %v1968_v46  ;;  %v1638_v46 = vld [vmem:[#allocation2 + $0x128] sm:$0xff] }
 0x35c   : > { %2033 = vst [vmem:[#allocation2 + $0x78] sm:$0xff] %v1969_v48  ;;  %v1639_v48 = vld [vmem:[#allocation2 + $0x130] sm:$0xff] }
 0x35e   : > { %v1835_v51 = vpop.f32.mrb[16].mxu1 }
 0x35f   : > { %v1970_v53 = vadd.f32 %v1835_v51, %v1617_v49  ;;  %v1837_v54 = vpop.f32.mrb[17].mxu1  ;;  %v1640_v51 = vld [vmem:[#allocation2 + $0x138] sm:$0xff] }
 0x360   : > { %v1971_v56 = vadd.f32 %v1837_v54, %v1618_v50  ;;  %v1839_v57 = vpop.f32.mrb[18].mxu1 }
 0x361   : > { %2034 = vst [vmem:[#allocation2 + $0x80] sm:$0xff] %v1970_v53  ;;  %v1972_v58 = vadd.f32 %v1839_v57, %v1619_v52  ;;  %v1841_v59 = vpop.f32.mrb[19].mxu1  ;;  %v1641_v57 = vld [vmem:[#allocation2 + $0x140] sm:$0xff] }
 0x362   : > { %2035 = vst [vmem:[#allocation2 + $0x88] sm:$0xff] %v1971_v56  ;;  %v1973_v60 = vadd.f32 %v1841_v59, %v1620_v55 }
 0x363   : > { %2036 = vst [vmem:[#allocation2 + $0x90] sm:$0xff] %v1972_v58  ;;  %v1642_v58 = vld [vmem:[#allocation2 + $0x148] sm:$0xff] }
 0x364   : > { %2037 = vst [vmem:[#allocation2 + $0x98] sm:$0xff] %v1973_v60  ;;  %v1643_v60 = vld [vmem:[#allocation2 + $0x150] sm:$0xff] }
 0x366   : > { %v1845_v63 = vpop.f32.mrb[20].mxu1 }
 0x367   : > { %v1974_v1 = vadd.f32 %v1845_v63, %v1621_v61  ;;  %v1847_v2 = vpop.f32.mrb[21].mxu1  ;;  %v1644_v63 = vld [vmem:[#allocation2 + $0x158] sm:$0xff] }
 0x368   : > { %v1975_v4 = vadd.f32 %v1847_v2, %v1622_v62  ;;  %v1849_v5 = vpop.f32.mrb[22].mxu1 }
 0x369   : > { %2038 = vst [vmem:[#allocation2 + $0xa0] sm:$0xff] %v1974_v1  ;;  %v1976_v6 = vadd.f32 %v1849_v5, %v1623_v0  ;;  %v1851_v7 = vpop.f32.mrb[23].mxu1  ;;  %v1645_v5 = vld [vmem:[#allocation2 + $0x160] sm:$0xff] }
 0x36a   : > { %2039 = vst [vmem:[#allocation2 + $0xa8] sm:$0xff] %v1975_v4  ;;  %v1977_v8 = vadd.f32 %v1851_v7, %v1624_v3 }
 0x36b   : > { %2040 = vst [vmem:[#allocation2 + $0xb0] sm:$0xff] %v1976_v6  ;;  %v1646_v6 = vld [vmem:[#allocation2 + $0x168] sm:$0xff] }
 0x36c   : > { %2041 = vst [vmem:[#allocation2 + $0xb8] sm:$0xff] %v1977_v8  ;;  %v1647_v8 = vld [vmem:[#allocation2 + $0x170] sm:$0xff] }
 0x36e   : > { %v1855_v11 = vpop.f32.mrb[24].mxu1 }
 0x36f   : > { %v1978_v13 = vadd.f32 %v1855_v11, %v1625_v9  ;;  %v1857_v14 = vpop.f32.mrb[25].mxu1  ;;  %v1648_v11 = vld [vmem:[#allocation2 + $0x178] sm:$0xff] }
 0x370   : > { %v1979_v16 = vadd.f32 %v1857_v14, %v1626_v10  ;;  %v1859_v17 = vpop.f32.mrb[26].mxu1 }
 0x371   : > { %2042 = vst [vmem:[#allocation2 + $0xc0] sm:$0xff] %v1978_v13  ;;  %v1980_v18 = vadd.f32 %v1859_v17, %v1627_v12  ;;  %v1861_v19 = vpop.f32.mrb[27].mxu1  ;;  %v1649_v17 = vld [vmem:[#allocation2 + $0x180] sm:$0xff] }
 0x372   : > { %2043 = vst [vmem:[#allocation2 + $0xc8] sm:$0xff] %v1979_v16  ;;  %v1981_v20 = vadd.f32 %v1861_v19, %v1628_v15 }
 0x373   : > { %2044 = vst [vmem:[#allocation2 + $0xd0] sm:$0xff] %v1980_v18  ;;  %v1650_v18 = vld [vmem:[#allocation2 + $0x188] sm:$0xff] }
 0x374   : > { %2045 = vst [vmem:[#allocation2 + $0xd8] sm:$0xff] %v1981_v20  ;;  %v1651_v20 = vld [vmem:[#allocation2 + $0x190] sm:$0xff] }
 0x376   : > { %v1865_v23 = vpop.f32.mrb[28].mxu1 }
 0x377   : > { %v1982_v25 = vadd.f32 %v1865_v23, %v1629_v21  ;;  %v1867_v26 = vpop.f32.mrb[29].mxu1  ;;  %v1652_v23 = vld [vmem:[#allocation2 + $0x198] sm:$0xff] }
 0x378   : > { %v1983_v28 = vadd.f32 %v1867_v26, %v1630_v22  ;;  %v1869_v29 = vpop.f32.mrb[30].mxu1 }
 0x379   : > { %2046 = vst [vmem:[#allocation2 + $0xe0] sm:$0xff] %v1982_v25  ;;  %v1984_v30 = vadd.f32 %v1869_v29, %v1631_v24  ;;  %v1871_v31 = vpop.f32.mrb[31].mxu1  ;;  %v1653_v29 = vld [vmem:[#allocation2 + $0x1a0] sm:$0xff] }
 0x37a   : > { %2047 = vst [vmem:[#allocation2 + $0xe8] sm:$0xff] %v1983_v28  ;;  %v1985_v32 = vadd.f32 %v1871_v31, %v1632_v27 }
 0x37b   : > { %2048 = vst [vmem:[#allocation2 + $0xf0] sm:$0xff] %v1984_v30  ;;  %v1654_v30 = vld [vmem:[#allocation2 + $0x1a8] sm:$0xff] }
 0x37c   : > { %2049 = vst [vmem:[#allocation2 + $0xf8] sm:$0xff] %v1985_v32  ;;  %v1655_v32 = vld [vmem:[#allocation2 + $0x1b0] sm:$0xff] }
 0x37e   : > { %v1875_v35 = vpop.f32.mrb[32].mxu1 }
 0x37f   : > { %v1986_v37 = vadd.f32 %v1875_v35, %v1633_v33  ;;  %v1877_v38 = vpop.f32.mrb[33].mxu1  ;;  %v1656_v35 = vld [vmem:[#allocation2 + $0x1b8] sm:$0xff] }
 0x380   : > { %v1987_v40 = vadd.f32 %v1877_v38, %v1634_v34  ;;  %v1879_v41 = vpop.f32.mrb[34].mxu1 }
 0x381   : > { %2050 = vst [vmem:[#allocation2 + $0x100] sm:$0xff] %v1986_v37  ;;  %v1988_v42 = vadd.f32 %v1879_v41, %v1635_v36  ;;  %v1881_v43 = vpop.f32.mrb[35].mxu1  ;;  %v1657_v41 = vld [vmem:[#allocation2 + $0x1c0] sm:$0xff] }
 0x382   : > { %2051 = vst [vmem:[#allocation2 + $0x108] sm:$0xff] %v1987_v40  ;;  %v1989_v44 = vadd.f32 %v1881_v43, %v1636_v39 }
 0x383   : > { %2052 = vst [vmem:[#allocation2 + $0x110] sm:$0xff] %v1988_v42  ;;  %v1658_v42 = vld [vmem:[#allocation2 + $0x1c8] sm:$0xff] }
 0x384   : > { %2053 = vst [vmem:[#allocation2 + $0x118] sm:$0xff] %v1989_v44  ;;  %v1659_v44 = vld [vmem:[#allocation2 + $0x1d0] sm:$0xff] }
 0x386   : > { %v1885_v47 = vpop.f32.mrb[36].mxu1 }
 0x387   : > { %v1990_v49 = vadd.f32 %v1885_v47, %v1637_v45  ;;  %v1887_v50 = vpop.f32.mrb[37].mxu1  ;;  %v1660_v47 = vld [vmem:[#allocation2 + $0x1d8] sm:$0xff] }
 0x388   : > { %v1991_v52 = vadd.f32 %v1887_v50, %v1638_v46  ;;  %v1889_v53 = vpop.f32.mrb[38].mxu1 }
 0x389   : > { %2054 = vst [vmem:[#allocation2 + $0x120] sm:$0xff] %v1990_v49  ;;  %v1992_v54 = vadd.f32 %v1889_v53, %v1639_v48  ;;  %v1891_v55 = vpop.f32.mrb[39].mxu1  ;;  %v1661_v53 = vld [vmem:[#allocation2 + $0x1e0] sm:$0xff] }
 0x38a   : > { %2055 = vst [vmem:[#allocation2 + $0x128] sm:$0xff] %v1991_v52  ;;  %v1993_v56 = vadd.f32 %v1891_v55, %v1640_v51 }
 0x38b   : > { %2056 = vst [vmem:[#allocation2 + $0x130] sm:$0xff] %v1992_v54  ;;  %v1662_v54 = vld [vmem:[#allocation2 + $0x1e8] sm:$0xff] }
 0x38c   : > { %2057 = vst [vmem:[#allocation2 + $0x138] sm:$0xff] %v1993_v56  ;;  %v1663_v56 = vld [vmem:[#allocation2 + $0x1f0] sm:$0xff] }
 0x38e   : > { %v1895_v59 = vpop.f32.mrb[40].mxu1 }
 0x38f   : > { %v1994_v61 = vadd.f32 %v1895_v59, %v1641_v57  ;;  %v1897_v62 = vpop.f32.mrb[41].mxu1  ;;  %v1664_v59 = vld [vmem:[#allocation2 + $0x1f8] sm:$0xff] }
 0x390   : > { %v1995_v0 = vadd.f32 %v1897_v62, %v1642_v58  ;;  %v1899_v1 = vpop.f32.mrb[42].mxu1 }
 0x391   : > { %2058 = vst [vmem:[#allocation2 + $0x140] sm:$0xff] %v1994_v61  ;;  %v1996_v2 = vadd.f32 %v1899_v1, %v1643_v60  ;;  %v1901_v3 = vpop.f32.mrb[43].mxu1 }
 0x392   : > { %2059 = vst [vmem:[#allocation2 + $0x148] sm:$0xff] %v1995_v0  ;;  %v1997_v4 = vadd.f32 %v1901_v3, %v1644_v63 }
 0x393   : > { %2060 = vst [vmem:[#allocation2 + $0x150] sm:$0xff] %v1996_v2 }
 0x394   : > { %2061 = vst [vmem:[#allocation2 + $0x158] sm:$0xff] %v1997_v4 }
 0x396   : > { %v1905_v7 = vpop.f32.mrb[44].mxu1 }
 0x397   : > { %v1998_v9 = vadd.f32 %v1905_v7, %v1645_v5  ;;  %v1907_v10 = vpop.f32.mrb[45].mxu1 }
 0x398   : > { %v1999_v12 = vadd.f32 %v1907_v10, %v1646_v6  ;;  %v1909_v13 = vpop.f32.mrb[46].mxu1 }
 0x399   : > { %2062 = vst [vmem:[#allocation2 + $0x160] sm:$0xff] %v1998_v9  ;;  %v2000_v14 = vadd.f32 %v1909_v13, %v1647_v8  ;;  %v1911_v15 = vpop.f32.mrb[47].mxu1 }
 0x39a   : > { %2063 = vst [vmem:[#allocation2 + $0x168] sm:$0xff] %v1999_v12  ;;  %v2001_v16 = vadd.f32 %v1911_v15, %v1648_v11 }
 0x39b   : > { %2064 = vst [vmem:[#allocation2 + $0x170] sm:$0xff] %v2000_v14 }
 0x39c   : > { %2065 = vst [vmem:[#allocation2 + $0x178] sm:$0xff] %v2001_v16 }
 0x39e   : > { %v1915_v19 = vpop.f32.mrb[48].mxu1 }
 0x39f   : > { %v2002_v21 = vadd.f32 %v1915_v19, %v1649_v17  ;;  %v1917_v22 = vpop.f32.mrb[49].mxu1 }
 0x3a0   : > { %v2003_v24 = vadd.f32 %v1917_v22, %v1650_v18  ;;  %v1919_v25 = vpop.f32.mrb[50].mxu1 }
 0x3a1   : > { %2066 = vst [vmem:[#allocation2 + $0x180] sm:$0xff] %v2002_v21  ;;  %v2004_v26 = vadd.f32 %v1919_v25, %v1651_v20  ;;  %v1921_v27 = vpop.f32.mrb[51].mxu1 }
 0x3a2   : > { %2067 = vst [vmem:[#allocation2 + $0x188] sm:$0xff] %v2003_v24  ;;  %v2005_v28 = vadd.f32 %v1921_v27, %v1652_v23 }
 0x3a3   : > { %2068 = vst [vmem:[#allocation2 + $0x190] sm:$0xff] %v2004_v26 }
 0x3a4   : > { %2069 = vst [vmem:[#allocation2 + $0x198] sm:$0xff] %v2005_v28 }
 0x3a6   : > { %v1925_v31 = vpop.f32.mrb[52].mxu1 }
 0x3a7   : > { %v2006_v33 = vadd.f32 %v1925_v31, %v1653_v29  ;;  %v1927_v34 = vpop.f32.mrb[53].mxu1 }
 0x3a8   : > { %v2007_v36 = vadd.f32 %v1927_v34, %v1654_v30  ;;  %v1929_v37 = vpop.f32.mrb[54].mxu1 }
 0x3a9   : > { %2070 = vst [vmem:[#allocation2 + $0x1a0] sm:$0xff] %v2006_v33  ;;  %v2008_v38 = vadd.f32 %v1929_v37, %v1655_v32  ;;  %v1931_v39 = vpop.f32.mrb[55].mxu1 }
 0x3aa   : > { %2071 = vst [vmem:[#allocation2 + $0x1a8] sm:$0xff] %v2007_v36  ;;  %v2009_v40 = vadd.f32 %v1931_v39, %v1656_v35 }
 0x3ab   : > { %2072 = vst [vmem:[#allocation2 + $0x1b0] sm:$0xff] %v2008_v38 }
 0x3ac   : > { %2073 = vst [vmem:[#allocation2 + $0x1b8] sm:$0xff] %v2009_v40 }
 0x3ae   : > { %v1935_v43 = vpop.f32.mrb[56].mxu1 }
 0x3af   : > { %v2010_v45 = vadd.f32 %v1935_v43, %v1657_v41  ;;  %v1937_v46 = vpop.f32.mrb[57].mxu1 }
 0x3b0   : > { %v2011_v48 = vadd.f32 %v1937_v46, %v1658_v42  ;;  %v1939_v49 = vpop.f32.mrb[58].mxu1 }
 0x3b1   : > { %2074 = vst [vmem:[#allocation2 + $0x1c0] sm:$0xff] %v2010_v45  ;;  %v2012_v50 = vadd.f32 %v1939_v49, %v1659_v44  ;;  %v1941_v51 = vpop.f32.mrb[59].mxu1 }
 0x3b2   : > { %2075 = vst [vmem:[#allocation2 + $0x1c8] sm:$0xff] %v2011_v48  ;;  %v2013_v52 = vadd.f32 %v1941_v51, %v1660_v47 }
 0x3b3   : > { %2076 = vst [vmem:[#allocation2 + $0x1d0] sm:$0xff] %v2012_v50 }
 0x3b4   : > { %2077 = vst [vmem:[#allocation2 + $0x1d8] sm:$0xff] %v2013_v52 }
 0x3b6   : > { %v1945_v55 = vpop.f32.mrb[60].mxu1  ;;  %2085 = sbr.rel (%p3010_p10) target bundleno = 1374 (0x55e), region = 90 }
 0x3b7   : > { %v2014_v57 = vadd.f32 %v1945_v55, %v1661_v53  ;;  %v1947_v58 = vpop.f32.mrb[61].mxu1 }
 0x3b8   : > { %v2015_v60 = vadd.f32 %v1947_v58, %v1662_v54  ;;  %v1949_v61 = vpop.f32.mrb[62].mxu1 }
 0x3b9   : > { %2078 = vst [vmem:[#allocation2 + $0x1e0] sm:$0xff] %v2014_v57  ;;  %v2016_v62 = vadd.f32 %v1949_v61, %v1663_v56  ;;  %v1951_v63 = vpop.f32.mrb[63].mxu1 }
 0x3ba   : > { %2079 = vst [vmem:[#allocation2 + $0x1e8] sm:$0xff] %v2015_v60  ;;  %v2017_v0 = vadd.f32 %v1951_v63, %v1664_v59 }
 0x3bb   : > { %2080 = vst [vmem:[#allocation2 + $0x1f0] sm:$0xff] %v2016_v62 }
 0x3bc   : > { %2081 = vst [vmem:[#allocation2 + $0x1f8] sm:$0xff] %v2017_v0 }
 0x3bd   : > { %v4127_v1 = vld [vmem:[%s3822_s17] sm:$0xff]  ;;  %v4130_v2 = vld [vmem:[%s3822_s17 + $0x8] sm:$0xff]  ;;  %v4133_v3 = vld [vmem:[%s3822_s17 + $0x10] sm:$0xff]  ;;  %s4178_s25 = sld [smem:[#allocation4]] }
 0x3be   : > { %v4136_v4 = vld [vmem:[%s3822_s17 + $0x18] sm:$0xff]  ;;  %v4139_v5 = vld [vmem:[%s3822_s17 + $0x20] sm:$0xff]  ;;  %v4142_v6 = vld [vmem:[%s3822_s17 + $0x28] sm:$0xff] }
 0x3bf   : > { %v4146_v8 = vld [vmem:[%s3822_s17 + $0x30] sm:$0xff]  ;;  %v4149_v9 = vld [vmem:[%s3822_s17 + $0x38] sm:$0xff]  ;;  %v4152_v10 = vld [vmem:[%s3822_s17 + $0x40] sm:$0xff] }
 0x3c0   : > { %v4159_v15 = vld [vmem:[%s3822_s17 + $0x48] sm:$0xff]  ;;  %v4162_v16 = vld [vmem:[%s3822_s17 + $0x50] sm:$0xff]  ;;  %v4169_v21 = vld [vmem:[%s3822_s17 + $0x58] sm:$0xff] }
 0x3c1   : > { %v4172_v22 = vld [vmem:[%s3822_s17 + $0x60] sm:$0xff]  ;;  %v4181_v27 = vld [vmem:[%s3822_s17 + $0x68] sm:$0xff]  ;;  %v4184_v28 = vld [vmem:[%s3822_s17 + $0x70] sm:$0xff] }
 0x3c2   : > { %5078 = vst [vmem:[#allocation24_spill] sm:$0xff] %v4172_v22  ;;  %5079 = vst [vmem:[#allocation25_spill] sm:$0xff] %v4181_v27  ;;  %v4191_v33 = vld [vmem:[%s3822_s17 + $0x78] sm:$0xff]  ;;  %v4194_v34 = vld [vmem:[%s3822_s17 + $0x80] sm:$0xff] }
 0x3c3   : > { %5080 = vst [vmem:[#allocation26_spill] sm:$0xff] %v4184_v28  ;;  %5081 = vst [vmem:[#allocation27_spill] sm:$0xff] %v4191_v33  ;;  %v4201_v39 = vld [vmem:[%s3822_s17 + $0x88] sm:$0xff]  ;;  %v4204_v40 = vld [vmem:[%s3822_s17 + $0x90] sm:$0xff]  ;;  %s2183_s4 = smul.f32 7.6293945e-06, %s4178_s25 }
 0x3c4   : > { %5082 = vst [vmem:[#allocation28_spill] sm:$0xff] %v4194_v34  ;;  %5083 = vst [vmem:[#allocation29_spill] sm:$0xff] %v4201_v39  ;;  %v4211_v45 = vld [vmem:[%s3822_s17 + $0x98] sm:$0xff]  ;;  %v4214_v46 = vld [vmem:[%s3822_s17 + $0xa0] sm:$0xff] }
 0x3c5   : > { %5084 = vst [vmem:[#allocation30_spill] sm:$0xff] %v4204_v40  ;;  %5085 = vst [vmem:[#allocation31_spill] sm:$0xff] %v4211_v45  ;;  %v4221_v51 = vld [vmem:[%s3822_s17 + $0xa8] sm:$0xff]  ;;  %v4224_v52 = vld [vmem:[%s3822_s17 + $0xb0] sm:$0xff]  ;;  %v4291_v54 = vstv %s2183_s4 }
 0x3c6   : > { %5086 = vst [vmem:[#allocation32_spill] sm:$0xff] %v4214_v46  ;;  %5087 = vst [vmem:[#allocation33_spill] sm:$0xff] %v4221_v51  ;;  %v4231_v57 = vld [vmem:[%s3822_s17 + $0xb8] sm:$0xff]  ;;  %v4234_v58 = vld [vmem:[%s3822_s17 + $0xc0] sm:$0xff] }
 0x3c7   : > { %5088 = vst [vmem:[#allocation34_spill] sm:$0xff] %v4224_v52  ;;  %5089 = vst [vmem:[#allocation35_spill] sm:$0xff] %v4231_v57  ;;  %v4237_v59 = vld [vmem:[%s3822_s17 + $0xc8] sm:$0xff]  ;;  %v4244_v0 = vld [vmem:[%s3822_s17 + $0xd0] sm:$0xff] }
 0x3c8   : > { %5090 = vst [vmem:[#allocation36_spill] sm:$0xff] %v4234_v58  ;;  %5091 = vst [vmem:[#allocation37_spill] sm:$0xff] %v4237_v59  ;;  %v4247_v55 = vld [vmem:[%s3822_s17 + $0xd8] sm:$0xff]  ;;  %v4250_v56 = vld [vmem:[%s3822_s17 + $0xe0] sm:$0xff] }
 0x3c9   : > { %5092 = vst [vmem:[#allocation38_spill] sm:$0xff] %v4244_v0  ;;  %5093 = vst [vmem:[#allocation39_spill] sm:$0xff] %v4247_v55  ;;  %v4257_v61 = vld [vmem:[%s3822_s17 + $0xe8] sm:$0xff]  ;;  %v4260_v62 = vld [vmem:[%s3822_s17 + $0xf0] sm:$0xff] }
 0x3ca   : > { %5094 = vst [vmem:[#allocation40_spill] sm:$0xff] %v4250_v56  ;;  %5095 = vst [vmem:[#allocation41_spill] sm:$0xff] %v4257_v61  ;;  %v4263_v63 = vld [vmem:[%s3822_s17 + $0xf8] sm:$0xff]  ;;  %v2184_v43 = vld [vmem:[#allocation2] sm:$0xff] }
 0x3cb   : > { %5096 = vst [vmem:[#allocation42_spill] sm:$0xff] %v4260_v62  ;;  %5097 = vst [vmem:[#allocation43_spill] sm:$0xff] %v4263_v63  ;;  %v2185_v42 = vld [vmem:[#allocation2 + $0x8] sm:$0xff]  ;;  %v2186_v41 = vld [vmem:[#allocation2 + $0x10] sm:$0xff]  ;;  %v4294_v13 = vmul.f32 %v4291_v54, %v2184_v43 }
 0x3cc   : > { %v2187_v38 = vld [vmem:[#allocation2 + $0x18] sm:$0xff]  ;;  %v2188_v53 = vld [vmem:[#allocation2 + $0x20] sm:$0xff]  ;;  %v2189_v37 = vld [vmem:[#allocation2 + $0x28] sm:$0xff]  ;;  %v4297_v35 = vmul.f32 %v4291_v54, %v2185_v42  ;;  %v4300_v32 = vmul.f32 %v4291_v54, %v2186_v41 }
 0x3cd   : > { %v2190_v50 = vld [vmem:[#allocation2 + $0x30] sm:$0xff]  ;;  %v2191_v36 = vld [vmem:[#allocation2 + $0x38] sm:$0xff]  ;;  %v2192_v31 = vld [vmem:[#allocation2 + $0x40] sm:$0xff]  ;;  %v4303_v23 = vmul.f32 %v4291_v54, %v2187_v38  ;;  %v4306_v62 = vmul.f32 %v4291_v54, %v2188_v53  ;;  %v4309_v61 = vmul.f32 %v4291_v54, %v2189_v37 }
 0x3ce   : > { %v2193_v49 = vld [vmem:[#allocation2 + $0x48] sm:$0xff]  ;;  %v2194_v30 = vld [vmem:[#allocation2 + $0x50] sm:$0xff]  ;;  %v2195_v48 = vld [vmem:[#allocation2 + $0x58] sm:$0xff]  ;;  %v4312_v43 = vmul.f32 %v4291_v54, %v2190_v50  ;;  %v4315_v42 = vmul.f32 %v4291_v54, %v2191_v36  ;;  %v4318_v55 = vmul.f32 %v4291_v54, %v2192_v31 }
 0x3cf   : > { %v2196_v60 = vld [vmem:[#allocation2 + $0x60] sm:$0xff]  ;;  %v2197_v25 = vld [vmem:[#allocation2 + $0x68] sm:$0xff]  ;;  %v2198_v44 = vld [vmem:[#allocation2 + $0x70] sm:$0xff]  ;;  %v4321_v0 = vmul.f32 %v4291_v54, %v2193_v49  ;;  %v4324_v53 = vmul.f32 %v4291_v54, %v2194_v30  ;;  %v4327_v37 = vmul.f32 %v4291_v54, %v2195_v48 }
 0x3d0   : > { %v2199_v24 = vld [vmem:[#allocation2 + $0x78] sm:$0xff]  ;;  %v2200_v20 = vld [vmem:[#allocation2 + $0x80] sm:$0xff]  ;;  %v2201_v19 = vld [vmem:[#allocation2 + $0x88] sm:$0xff]  ;;  %v4330_v36 = vmul.f32 %v4291_v54, %v2196_v60  ;;  %v4333_v57 = vmul.f32 %v4291_v54, %v2197_v25  ;;  %v4336_v31 = vmul.f32 %v4291_v54, %v2198_v44 }
 0x3d1   : > { %v2202_v18 = vld [vmem:[#allocation2 + $0x90] sm:$0xff]  ;;  %v2203_v47 = vld [vmem:[#allocation2 + $0x98] sm:$0xff]  ;;  %v2204_v29 = vld [vmem:[#allocation2 + $0xa0] sm:$0xff]  ;;  %v4339_v49 = vmul.f32 %v4291_v54, %v2199_v24  ;;  %v4342_v48 = vmul.f32 %v4291_v54, %v2200_v20  ;;  %v4345_v46 = vmul.f32 %v4291_v54, %v2201_v19 }
 0x3d2   : > { %v2205_v17 = vld [vmem:[#allocation2 + $0xa8] sm:$0xff]  ;;  %v2206_v26 = vld [vmem:[#allocation2 + $0xb0] sm:$0xff]  ;;  %v2207_v14 = vld [vmem:[#allocation2 + $0xb8] sm:$0xff]  ;;  %v4348_v60 = vmul.f32 %v4291_v54, %v2202_v18  ;;  %v4351_v25 = vmul.f32 %v4291_v54, %v2203_v47  ;;  %v4354_v24 = vmul.f32 %v4291_v54, %v2204_v29 }
 0x3d3   : > { %v2208_v12 = vld [vmem:[#allocation2 + $0xc0] sm:$0xff]  ;;  %v2209_v11 = vld [vmem:[#allocation2 + $0xc8] sm:$0xff]  ;;  %v2210_v7 = vld [vmem:[#allocation2 + $0xd0] sm:$0xff]  ;;  %v4357_v39 = vmul.f32 %v4291_v54, %v2205_v17  ;;  %v4360_v20 = vmul.f32 %v4291_v54, %v2206_v26  ;;  %v4363_v19 = vmul.f32 %v4291_v54, %v2207_v14 }
 0x3d4   : > { %v2211_v63 = vld [vmem:[#allocation2 + $0xd8] sm:$0xff]  ;;  %v2212_v41 = vld [vmem:[#allocation2 + $0xe0] sm:$0xff]  ;;  %v2213_v56 = vld [vmem:[#allocation2 + $0xe8] sm:$0xff]  ;;  %v4366_v47 = vmul.f32 %v4291_v54, %v2208_v12  ;;  %v4369_v28 = vmul.f32 %v4291_v54, %v2209_v11  ;;  %v4372_v29 = vmul.f32 %v4291_v54, %v2210_v7 }
 0x3d5   : > { %v2214_v38 = vld [vmem:[#allocation2 + $0xf0] sm:$0xff]  ;;  %v2215_v50 = vld [vmem:[#allocation2 + $0xf8] sm:$0xff]  ;;  %v2216_v59 = vld [vmem:[#allocation2 + $0x100] sm:$0xff]  ;;  %5098 = vst [vmem:[#allocation44_spill] sm:$0xff] %v4363_v19  ;;  %v4375_v17 = vmul.f32 %v4291_v54, %v2211_v63  ;;  %v4378_v14 = vmul.f32 %v4291_v54, %v2212_v41  ;;  %v4381_v19 = vmul.f32 %v4291_v54, %v2213_v56 }
 0x3d6   : > { %v2217_v58 = vld [vmem:[#allocation2 + $0x108] sm:$0xff]  ;;  %v2218_v30 = vld [vmem:[#allocation2 + $0x110] sm:$0xff]  ;;  %v2219_v52 = vld [vmem:[#allocation2 + $0x118] sm:$0xff]  ;;  %5099 = vst [vmem:[#allocation45_spill] sm:$0xff] %v4369_v28  ;;  %v4384_v12 = vmul.f32 %v4291_v54, %v2214_v38  ;;  %v4387_v11 = vmul.f32 %v4291_v54, %v2215_v50  ;;  %v4390_v63 = vmul.f32 %v4291_v54, %v2216_v59 }
 0x3d7   : > { %v2220_v51 = vld [vmem:[#allocation2 + $0x120] sm:$0xff]  ;;  %v2221_v44 = vld [vmem:[#allocation2 + $0x128] sm:$0xff]  ;;  %v2222_v45 = vld [vmem:[#allocation2 + $0x130] sm:$0xff]  ;;  %5100 = vst [vmem:[#allocation46_spill] sm:$0xff] %v4372_v29  ;;  %v4396_v41 = vmul.f32 %v4291_v54, %v2218_v30  ;;  %v4399_v56 = vmul.f32 %v4291_v54, %v2219_v52 }
 0x3d8   : > { %v2223_v40 = vld [vmem:[#allocation2 + $0x138] sm:$0xff]  ;;  %v2224_v18 = vld [vmem:[#allocation2 + $0x140] sm:$0xff]  ;;  %v2225_v34 = vld [vmem:[#allocation2 + $0x148] sm:$0xff]  ;;  %5101 = vst [vmem:[#allocation47_spill] sm:$0xff] %v4375_v17  ;;  %v4393_v17 = vmul.f32 %v4291_v54, %v2217_v58  ;;  %v4402_v50 = vmul.f32 %v4291_v54, %v2220_v51  ;;  %v4408_v59 = vmul.f32 %v4291_v54, %v2222_v45 }
 0x3d9   : > { %v2226_v33 = vld [vmem:[#allocation2 + $0x150] sm:$0xff]  ;;  %v2227_v26 = vld [vmem:[#allocation2 + $0x158] sm:$0xff]  ;;  %v2228_v27 = vld [vmem:[#allocation2 + $0x160] sm:$0xff]  ;;  %5102 = vst [vmem:[#allocation48_spill] sm:$0xff] %v4381_v19  ;;  %v4411_v58 = vmul.f32 %v4291_v54, %v2223_v40  ;;  %v4414_v52 = vmul.f32 %v4291_v54, %v2224_v18 }
 0x3da   : > { %v2229_v22 = vld [vmem:[#allocation2 + $0x168] sm:$0xff]  ;;  %5103 = vst [vmem:[#allocation49_spill] sm:$0xff] %v4384_v12  ;;  %5104 = vst [vmem:[#allocation50_spill] sm:$0xff] %v4387_v11  ;;  %v2230_v7 = vld [vmem:[#allocation2 + $0x170] sm:$0xff]  ;;  %v4405_v11 = vmul.f32 %v4291_v54, %v2221_v44  ;;  %v4420_v51 = vmul.f32 %v4291_v54, %v2226_v33  ;;  %v4423_v44 = vmul.f32 %v4291_v54, %v2227_v26 }
 0x3db   : > { %v2231_v29 = vld [vmem:[#allocation2 + $0x178] sm:$0xff]  ;;  %v2232_v28 = vld [vmem:[#allocation2 + $0x180] sm:$0xff]  ;;  %5105 = vst [vmem:[#allocation51_spill] sm:$0xff] %v4393_v17  ;;  %5106 = vst [vmem:[#allocation52_spill] sm:$0xff] %v4396_v41  ;;  %v4426_v40 = vmul.f32 %v4291_v54, %v2228_v27  ;;  %v4432_v18 = vmul.f32 %v4291_v54, %v2230_v7 }
 0x3dc   : > { %5107 = vst [vmem:[#allocation53_spill] sm:$0xff] %v4399_v56  ;;  %v2233_v38 = vld [vmem:[#allocation2 + $0x188] sm:$0xff]  ;;  %v2234_v12 = vld [vmem:[#allocation2 + $0x190] sm:$0xff]  ;;  %v2235_v19 = vld [vmem:[#allocation2 + $0x198] sm:$0xff]  ;;  %v4417_v56 = vmul.f32 %v4291_v54, %v2225_v34  ;;  %v4435_v34 = vmul.f32 %v4291_v54, %v2231_v29  ;;  %v4438_v26 = vmul.f32 %v4291_v54, %v2232_v28 }
 0x3dd   : > { %5108 = vst [vmem:[#allocation54_spill] sm:$0xff] %v4405_v11  ;;  %5109 = vst [vmem:[#allocation55_spill] sm:$0xff] %v4408_v59  ;;  %v2236_v30 = vld [vmem:[#allocation2 + $0x1a0] sm:$0xff]  ;;  %v2237_v41 = vld [vmem:[#allocation2 + $0x1a8] sm:$0xff]  ;;  %v4444_v27 = vmul.f32 %v4291_v54, %v2234_v12 }
 0x3de   : > { %5110 = vst [vmem:[#allocation56_spill] sm:$0xff] %v4411_v58  ;;  %v2238_v17 = vld [vmem:[#allocation2 + $0x1b0] sm:$0xff]  ;;  %5111 = vst [vmem:[#allocation57_spill] sm:$0xff] %v4417_v56  ;;  %v2239_v45 = vld [vmem:[#allocation2 + $0x1b8] sm:$0xff]  ;;  %v4429_v58 = vmul.f32 %v4291_v54, %v2229_v22  ;;  %v4447_v22 = vmul.f32 %v4291_v54, %v2235_v19  ;;  %v4450_v29 = vmul.f32 %v4291_v54, %v2236_v30 }
 0x3df   : > { %5112 = vst [vmem:[#allocation58_spill] sm:$0xff] %v4420_v51  ;;  %5113 = vst [vmem:[#allocation59_spill] sm:$0xff] %v4423_v44  ;;  %v2240_v59 = vld [vmem:[#allocation2 + $0x1c0] sm:$0xff]  ;;  %v2241_v11 = vld [vmem:[#allocation2 + $0x1c8] sm:$0xff]  ;;  %v4441_v44 = vmul.f32 %v4291_v54, %v2233_v38  ;;  %v4456_v28 = vmul.f32 %v4291_v54, %v2238_v17  ;;  %v4459_v38 = vmul.f32 %v4291_v54, %v2239_v45 }
 0x3e0   : > { %5114 = vst [vmem:[#allocation60_spill] sm:$0xff] %v4429_v58  ;;  %5115 = vst [vmem:[#allocation61_spill] sm:$0xff] %v4432_v18  ;;  %v2242_v33 = vld [vmem:[#allocation2 + $0x1d0] sm:$0xff]  ;;  %v2243_v51 = vld [vmem:[#allocation2 + $0x1d8] sm:$0xff]  ;;  %v4462_v12 = vmul.f32 %v4291_v54, %v2240_v59  ;;  %v4465_v19 = vmul.f32 %v4291_v54, %v2241_v11  ;;  %v5119_v11 = vunpack.c.l.bf16 %v4127_v1 }
 0x3e1   : > { %5116 = vst [vmem:[#allocation62_spill] sm:$0xff] %v4435_v34  ;;  %v2244_v56 = vld [vmem:[#allocation2 + $0x1e0] sm:$0xff]  ;;  %5117 = vst [vmem:[#allocation63_spill] sm:$0xff] %v4447_v22  ;;  %v2245_v7 = vld [vmem:[#allocation2 + $0x1e8] sm:$0xff]  ;;  %v4453_v34 = vmul.f32 %v4291_v54, %v2237_v41  ;;  %v4468_v22 = vmul.f32 %v4291_v54, %v2242_v33  ;;  %v4471_v30 = vmul.f32 %v4291_v54, %v2243_v51  ;;  %v5120_v51 = vunpack.c.h.bf16 %v4127_v1 }
 0x3e2   : > { %v2246_v18 = vld [vmem:[#allocation2 + $0x1f0] sm:$0xff]  ;;  %v2247_v58 = vld [vmem:[#allocation2 + $0x1f8] sm:$0xff]  ;;  %v4474_v41 = vmul.f32 %v4291_v54, %v2244_v56  ;;  %v4477_v17 = vmul.f32 %v4291_v54, %v2245_v7  ;;  %v4488_v33 = vsub.f32 %v5119_v11, %v4294_v13  ;;  %v5121_v56 = vunpack.c.l.bf16 %v4130_v2 }
 0x3e3   : > { %5118 = vst [vmem:[#allocation64_spill] sm:$0xff] %v4471_v30  ;;  %v4480_v45 = vmul.f32 %v4291_v54, %v2246_v18  ;;  %v4483_v59 = vmul.f32 %v4291_v54, %v2247_v58  ;;  %v4493_v30 = vsub.f32 %v5120_v51, %v4297_v35  ;;  %v5122_v18 = vunpack.c.h.bf16 %v4130_v2 }
 0x3e4   : > { %v4498_v7 = vsub.f32 %v5121_v56, %v4300_v32  ;;  %v5123_v58 = vunpack.c.l.bf16 %v4133_v3  ;;  %v5124_v1 = vunpack.c.h.bf16 %v4133_v3  ;;  %v5125_v11 = vunpack.c.l.bf16 %v4136_v4 }
 0x3e5   : > { %v4503_v54 = vsub.f32 %v5122_v18, %v4303_v23  ;;  %v5126_v2 = vunpack.c.h.bf16 %v4136_v4  ;;  %v5127_v51 = vunpack.c.l.bf16 %v4139_v5  ;;  %v5128_v3 = vunpack.c.h.bf16 %v4139_v5 }
 0x3e6   : > { %v4508_v13 = vsub.f32 %v5123_v58, %v4306_v62  ;;  %v4513_v35 = vsub.f32 %v5124_v1, %v4309_v61  ;;  %v4518_v32 = vsub.f32 %v5125_v11, %v4312_v43  ;;  %v5129_v56 = vunpack.c.l.bf16 %v4142_v6 }
 0x3e7   : > { %v4523_v23 = vsub.f32 %v5126_v2, %v4315_v42  ;;  %v4528_v62 = vsub.f32 %v5127_v51, %v4318_v55  ;;  %v4533_v61 = vsub.f32 %v5128_v3, %v4321_v0  ;;  %v5130_v4 = vunpack.c.h.bf16 %v4142_v6  ;;  %v5142_v3 = vld [vmem:[#allocation44_spill] sm:$0xff] }
 0x3e8   : > { %v4538_v43 = vsub.f32 %v5129_v56, %v4324_v53  ;;  %v5131_v18 = vunpack.c.l.bf16 %v4146_v8  ;;  %v5132_v5 = vunpack.c.h.bf16 %v4146_v8  ;;  %v5133_v58 = vunpack.c.l.bf16 %v4149_v9  ;;  %v5144_v56 = vld [vmem:[#allocation24_spill] sm:$0xff] }
 0x3e9   : > { %v4543_v42 = vsub.f32 %v5130_v4, %v4327_v37  ;;  %v5134_v6 = vunpack.c.h.bf16 %v4149_v9  ;;  %v5135_v1 = vunpack.c.l.bf16 %v4152_v10  ;;  %v5136_v8 = vunpack.c.h.bf16 %v4152_v10 }
 0x3ea   : > { %v4548_v55 = vsub.f32 %v5131_v18, %v4330_v36  ;;  %v4553_v0 = vsub.f32 %v5132_v5, %v4333_v57  ;;  %v4558_v53 = vsub.f32 %v5133_v58, %v4336_v31  ;;  %v5137_v11 = vunpack.c.l.bf16 %v4159_v15  ;;  %v5146_v18 = vld [vmem:[#allocation45_spill] sm:$0xff]  ;;  %v5148_v5 = vld [vmem:[#allocation46_spill] sm:$0xff] }
 0x3eb   : > { %v4563_v37 = vsub.f32 %v5134_v6, %v4339_v49  ;;  %v4568_v36 = vsub.f32 %v5135_v1, %v4342_v48  ;;  %v4573_v57 = vsub.f32 %v5136_v8, %v4345_v46  ;;  %v5138_v9 = vunpack.c.h.bf16 %v4159_v15  ;;  %v5149_v58 = vld [vmem:[#allocation25_spill] sm:$0xff]  ;;  %v5151_v1 = vld [vmem:[#allocation47_spill] sm:$0xff] }
 0x3ec   : > { %v4578_v31 = vsub.f32 %v5137_v11, %v4348_v60  ;;  %v5139_v2 = vunpack.c.l.bf16 %v4162_v16  ;;  %v5140_v10 = vunpack.c.h.bf16 %v4162_v16  ;;  %v5141_v51 = vunpack.c.l.bf16 %v4169_v21  ;;  %v5153_v11 = vld [vmem:[#allocation26_spill] sm:$0xff] }
 0x3ed   : > { %v4583_v49 = vsub.f32 %v5138_v9, %v4351_v25  ;;  %v5143_v15 = vunpack.c.h.bf16 %v4169_v21  ;;  %v5145_v4 = vunpack.c.l.bf16 %v5144_v56  ;;  %v5147_v16 = vunpack.c.h.bf16 %v5144_v56 }
 0x3ee   : > { %v4588_v48 = vsub.f32 %v5139_v2, %v4354_v24  ;;  %v4593_v46 = vsub.f32 %v5140_v10, %v4357_v39  ;;  %v4598_v60 = vsub.f32 %v5141_v51, %v4360_v20  ;;  %v5150_v6 = vunpack.c.l.bf16 %v5149_v58  ;;  %v5155_v2 = vld [vmem:[#allocation48_spill] sm:$0xff] }
 0x3ef   : > { %v4603_v25 = vsub.f32 %v5143_v15, %v5142_v3  ;;  %v4608_v24 = vsub.f32 %v5145_v4, %v4366_v47  ;;  %v4613_v39 = vsub.f32 %v5147_v16, %v5146_v18  ;;  %v5152_v21 = vunpack.c.h.bf16 %v5149_v58  ;;  %v5157_v3 = vld [vmem:[#allocation49_spill] sm:$0xff]  ;;  %v5158_v15 = vld [vmem:[#allocation27_spill] sm:$0xff]  ;;  %v5160_v18 = vld [vmem:[#allocation50_spill] sm:$0xff] }
 0x3f0   : > { %v4618_v20 = vsub.f32 %v5150_v6, %v5148_v5  ;;  %v5154_v9 = vunpack.c.l.bf16 %v5153_v11  ;;  %v5156_v10 = vunpack.c.h.bf16 %v5153_v11  ;;  %v5159_v56 = vunpack.c.l.bf16 %v5158_v15  ;;  %v5163_v58 = vld [vmem:[#allocation28_spill] sm:$0xff] }
 0x3f1   : > { %v4623_v8 = vsub.f32 %v5152_v21, %v5151_v1  ;;  %v5161_v16 = vunpack.c.h.bf16 %v5158_v15  ;;  %v5164_v6 = vunpack.c.l.bf16 %v5163_v58  ;;  %v5166_v1 = vld [vmem:[#allocation51_spill] sm:$0xff]  ;;  %v5167_v21 = vunpack.c.h.bf16 %v5163_v58 }
 0x3f2   : > { %v4628_v47 = vsub.f32 %v5154_v9, %v4378_v14  ;;  %v4633_v51 = vsub.f32 %v5156_v10, %v5155_v2  ;;  %v4638_v4 = vsub.f32 %v5159_v56, %v5157_v3  ;;  %v5169_v9 = vld [vmem:[#allocation52_spill] sm:$0xff]  ;;  %v5170_v2 = vld [vmem:[#allocation29_spill] sm:$0xff] }
 0x3f3   : > { %v4643_v5 = vsub.f32 %v5161_v16, %v5160_v18  ;;  %v4648_v14 = vsub.f32 %v5164_v6, %v4390_v63  ;;  %v4653_v11 = vsub.f32 %v5167_v21, %v5166_v1  ;;  %v5171_v10 = vunpack.c.l.bf16 %v5170_v2  ;;  %v5172_v56 = vld [vmem:[#allocation53_spill] sm:$0xff]  ;;  %v5175_v16 = vld [vmem:[#allocation30_spill] sm:$0xff]  ;;  %v5181_v21 = vld [vmem:[#allocation55_spill] sm:$0xff] }
 0x3f4   : > { %v5173_v15 = vunpack.c.h.bf16 %v5170_v2  ;;  %v5178_v6 = vld [vmem:[#allocation54_spill] sm:$0xff]  ;;  %v5179_v58 = vunpack.c.h.bf16 %v5175_v16 }
 0x3f5   : > { %5162 = vst [vmem:[#allocation44_spill] sm:$0xff] %v4643_v5  ;;  %5165 = vst [vmem:[#allocation24_spill] sm:$0xff] %v4648_v14  ;;  %v4658_v3 = vsub.f32 %v5171_v10, %v5169_v9  ;;  %v5176_v5 = vunpack.c.l.bf16 %v5175_v16  ;;  %v5184_v10 = vld [vmem:[#allocation56_spill] sm:$0xff] }
 0x3f6   : > { %5168 = vst [vmem:[#allocation45_spill] sm:$0xff] %v4653_v11  ;;  %v4663_v18 = vsub.f32 %v5173_v15, %v5172_v56  ;;  %v4673_v1 = vsub.f32 %v5179_v58, %v5178_v6  ;;  %v5182_v11 = vld [vmem:[#allocation31_spill] sm:$0xff]  ;;  %v5187_v15 = vld [vmem:[#allocation32_spill] sm:$0xff]  ;;  %v5193_v58 = vld [vmem:[#allocation58_spill] sm:$0xff] }
 0x3f7   : > { %v4668_v63 = vsub.f32 %v5176_v5, %v4402_v50  ;;  %v5183_v14 = vunpack.c.l.bf16 %v5182_v11  ;;  %v5185_v2 = vunpack.c.h.bf16 %v5182_v11  ;;  %v5190_v5 = vld [vmem:[#allocation57_spill] sm:$0xff]  ;;  %v5191_v16 = vunpack.c.h.bf16 %v5187_v15 }
 0x3f8   : > { %5174 = vst [vmem:[#allocation46_spill] sm:$0xff] %v4663_v18  ;;  %5180 = vst [vmem:[#allocation47_spill] sm:$0xff] %v4673_v1  ;;  %v5188_v18 = vunpack.c.l.bf16 %v5187_v15  ;;  %v5194_v1 = vld [vmem:[#allocation33_spill] sm:$0xff] }
 0x3f9   : > { %5177 = vst [vmem:[#allocation25_spill] sm:$0xff] %v4668_v63  ;;  %v4678_v9 = vsub.f32 %v5183_v14, %v5181_v21  ;;  %v4683_v56 = vsub.f32 %v5185_v2, %v5184_v10  ;;  %v4693_v6 = vsub.f32 %v5191_v16, %v5190_v5  ;;  %v5195_v63 = vunpack.c.l.bf16 %v5194_v1  ;;  %v5196_v21 = vld [vmem:[#allocation59_spill] sm:$0xff]  ;;  %v5199_v2 = vld [vmem:[#allocation34_spill] sm:$0xff]  ;;  %v5203_v16 = vld [vmem:[#allocation61_spill] sm:$0xff] }
 0x3fa   : > { %v4688_v50 = vsub.f32 %v5188_v18, %v4414_v52  ;;  %v5197_v11 = vunpack.c.h.bf16 %v5194_v1  ;;  %v5201_v18 = vld [vmem:[#allocation60_spill] sm:$0xff]  ;;  %v5202_v15 = vunpack.c.h.bf16 %v5199_v2 }
 0x3fb   : > { %5186 = vst [vmem:[#allocation26_spill] sm:$0xff] %v4683_v56  ;;  %5192 = vst [vmem:[#allocation49_spill] sm:$0xff] %v4693_v6  ;;  %v4698_v14 = vsub.f32 %v5195_v63, %v5193_v58  ;;  %v5200_v56 = vunpack.c.l.bf16 %v5199_v2  ;;  %v5204_v6 = vld [vmem:[#allocation35_spill] sm:$0xff]  ;;  %v5206_v58 = vld [vmem:[#allocation62_spill] sm:$0xff] }
 0x3fc   : > { %5189 = vst [vmem:[#allocation48_spill] sm:$0xff] %v4688_v50  ;;  %v4703_v10 = vsub.f32 %v5197_v11, %v5196_v21  ;;  %v4713_v5 = vsub.f32 %v5202_v15, %v5201_v18  ;;  %v5205_v50 = vunpack.c.l.bf16 %v5204_v6  ;;  %v5207_v1 = vunpack.c.h.bf16 %v5204_v6  ;;  %v5209_v11 = vld [vmem:[#allocation36_spill] sm:$0xff]  ;;  %v5212_v18 = vld [vmem:[#allocation37_spill] sm:$0xff] }
 0x3fd   : > { %v4708_v52 = vsub.f32 %v5200_v56, %v4426_v40  ;;  %v5211_v56 = vunpack.c.h.bf16 %v5209_v11  ;;  %v5213_v15 = vunpack.c.l.bf16 %v5212_v18  ;;  %v5215_v6 = vunpack.c.h.bf16 %v5212_v18 }
 0x3fe   : > { %5198 = vst [vmem:[#allocation27_spill] sm:$0xff] %v4703_v10  ;;  %v4718_v63 = vsub.f32 %v5205_v50, %v5203_v16  ;;  %v4723_v21 = vsub.f32 %v5207_v1, %v5206_v58  ;;  %v5210_v10 = vunpack.c.l.bf16 %v5209_v11  ;;  %v5214_v16 = vld [vmem:[#allocation63_spill] sm:$0xff]  ;;  %v5216_v1 = vld [vmem:[#allocation38_spill] sm:$0xff] }
 0x3ff   : > { %v4733_v2 = vsub.f32 %v5211_v56, %v4441_v44  ;;  %v4738_v50 = vsub.f32 %v5213_v15, %v4444_v27  ;;  %v4743_v58 = vsub.f32 %v5215_v6, %v5214_v16  ;;  %v5219_v11 = vld [vmem:[#allocation39_spill] sm:$0xff]  ;;  %v5223_v16 = vld [vmem:[#allocation40_spill] sm:$0xff] }
 0x400   : > { %5208 = vst [vmem:[#allocation50_spill] sm:$0xff] %v4723_v21  ;;  %v4728_v40 = vsub.f32 %v5210_v10, %v4438_v26  ;;  %v5217_v21 = vunpack.c.l.bf16 %v5216_v1  ;;  %v5218_v10 = vunpack.c.h.bf16 %v5216_v1  ;;  %v5220_v56 = vunpack.c.l.bf16 %v5219_v11  ;;  %v5226_v1 = vld [vmem:[#allocation41_spill] sm:$0xff] }
 0x401   : > { %v5221_v18 = vunpack.c.h.bf16 %v5219_v11  ;;  %v5224_v6 = vunpack.c.l.bf16 %v5223_v16  ;;  %v5229_v11 = vunpack.c.h.bf16 %v5226_v1 }
 0x402   : > { %v4748_v26 = vsub.f32 %v5217_v21, %v4450_v29  ;;  %v4753_v44 = vsub.f32 %v5218_v10, %v4453_v34  ;;  %v4758_v27 = vsub.f32 %v5220_v56, %v4456_v28  ;;  %v5225_v21 = vunpack.c.h.bf16 %v5223_v16  ;;  %v5228_v56 = vld [vmem:[#allocation64_spill] sm:$0xff] }
 0x403   : > { %v4763_v15 = vsub.f32 %v5221_v18, %v4459_v38  ;;  %v4768_v29 = vsub.f32 %v5224_v6, %v4462_v12  ;;  %v5227_v10 = vunpack.c.l.bf16 %v5226_v1  ;;  %v4783_v38 = vsub.f32 %v5229_v11, %v5228_v56  ;;  %v5230_v18 = vld [vmem:[#allocation42_spill] sm:$0xff]  ;;  %v5233_v6 = vld [vmem:[#allocation43_spill] sm:$0xff] }
 0x404   : > { %v4773_v34 = vsub.f32 %v5225_v21, %v4465_v19  ;;  %v5232_v16 = vunpack.c.h.bf16 %v5230_v18  ;;  %v5235_v1 = vunpack.c.h.bf16 %v5233_v6  ;;  %v3057_v56 = vpack.c.bf16 %v4533_v61, %v4528_v62  ;;  %v5236_v61 = vld [vmem:[#allocation44_spill] sm:$0xff] }
 0x405   : > { %5222 = vst [vmem:[#allocation28_spill] sm:$0xff] %v4763_v15  ;;  %v4778_v28 = vsub.f32 %v5227_v10, %v4468_v22  ;;  %v5231_v15 = vunpack.c.l.bf16 %v5230_v18  ;;  %v5234_v22 = vunpack.c.l.bf16 %v5233_v6  ;;  %v3067_v62 = vpack.c.bf16 %v4633_v51, %v4628_v47  ;;  %v2601_v51 = vld [vmem:[#allocation3] sm:$0xff] }
 0x406   : > { %v4793_v19 = vsub.f32 %v5232_v16, %v4477_v17  ;;  %v4803_v10 = vsub.f32 %v5235_v1, %v4483_v59  ;;  %v3054_v17 = vpack.c.bf16 %v4503_v54, %v4498_v7  ;;  %v3058_v59 = vpack.c.bf16 %v4543_v42, %v4538_v43  ;;  %2573 = vst [vmem:[%s3831_s23 + $0x20] sm:$0xff] %v3057_v56  ;;  %v5237_v42 = vld [vmem:[#allocation24_spill] sm:$0xff]  ;;  %v2614_v56 = vld [vmem:[#allocation3 + $0x68] sm:$0xff] }
 0x407   : > { %v4788_v12 = vsub.f32 %v5231_v15, %v4474_v41  ;;  %v4798_v21 = vsub.f32 %v5234_v22, %v4480_v45  ;;  %v3053_v41 = vpack.c.bf16 %v4493_v30, %v4488_v33  ;;  %v3055_v15 = vpack.c.bf16 %v4513_v35, %v4508_v13  ;;  %2583 = vst [vmem:[%s3831_s23 + $0x70] sm:$0xff] %v3067_v62  ;;  %v2610_v22 = vld [vmem:[#allocation3 + $0x48] sm:$0xff]  ;;  %v2611_v1 = vld [vmem:[#allocation3 + $0x50] sm:$0xff] }
 0x408   : > { %v3056_v45 = vpack.c.bf16 %v4523_v23, %v4518_v32  ;;  %v3059_v30 = vpack.c.bf16 %v4553_v0, %v4548_v55  ;;  %v3060_v33 = vpack.c.bf16 %v4563_v37, %v4558_v53  ;;  %v3061_v7 = vpack.c.bf16 %v4573_v57, %v4568_v36  ;;  %2570 = vst [vmem:[%s3831_s23 + $0x8] sm:$0xff] %v3054_v17  ;;  %v5238_v55 = vld [vmem:[#allocation45_spill] sm:$0xff]  ;;  %v5239_v53 = vld [vmem:[#allocation46_spill] sm:$0xff]  ;;  %v5241_v57 = vld [vmem:[#allocation47_spill] sm:$0xff] }
 0x409   : > { %v3062_v54 = vpack.c.bf16 %v4583_v49, %v4578_v31  ;;  %v3063_v13 = vpack.c.bf16 %v4593_v46, %v4588_v48  ;;  %v3064_v35 = vpack.c.bf16 %v4603_v25, %v4598_v60  ;;  %2569 = vst [vmem:[%s3831_s23] sm:$0xff] %v3053_v41  ;;  %2571 = vst [vmem:[%s3831_s23 + $0x10] sm:$0xff] %v3055_v15  ;;  %v5240_v36 = vld [vmem:[#allocation25_spill] sm:$0xff]  ;;  %v5242_v49 = vld [vmem:[#allocation26_spill] sm:$0xff] }
 0x40a   : > { %2572 = vst [vmem:[%s3831_s23 + $0x18] sm:$0xff] %v3056_v45  ;;  %v3065_v32 = vpack.c.bf16 %v4613_v39, %v4608_v24  ;;  %v3066_v23 = vpack.c.bf16 %v4623_v8, %v4618_v20  ;;  %v3068_v43 = vpack.c.bf16 %v5236_v61, %v4638_v4  ;;  %2574 = vst [vmem:[%s3831_s23 + $0x28] sm:$0xff] %v3058_v59  ;;  %v5243_v46 = vld [vmem:[#allocation48_spill] sm:$0xff]  ;;  %v5244_v60 = vld [vmem:[#allocation49_spill] sm:$0xff] }
 0x40b   : > { %2575 = vst [vmem:[%s3831_s23 + $0x30] sm:$0xff] %v3059_v30  ;;  %2576 = vst [vmem:[%s3831_s23 + $0x38] sm:$0xff] %v3060_v33  ;;  %v3069_v0 = vpack.c.bf16 %v5238_v55, %v5237_v42  ;;  %v3070_v37 = vpack.c.bf16 %v5239_v53, %v4658_v3  ;;  %v3071_v31 = vpack.c.bf16 %v5241_v57, %v5240_v36  ;;  %v5245_v24 = vld [vmem:[#allocation27_spill] sm:$0xff]  ;;  %v5246_v8 = vld [vmem:[#allocation50_spill] sm:$0xff] }
 0x40c   : > { %v3072_v48 = vpack.c.bf16 %v5242_v49, %v4678_v9  ;;  %2577 = vst [vmem:[%s3831_s23 + $0x40] sm:$0xff] %v3061_v7  ;;  %2578 = vst [vmem:[%s3831_s23 + $0x48] sm:$0xff] %v3062_v54  ;;  %v3073_v25 = vpack.c.bf16 %v5244_v60, %v5243_v46  ;;  %v3074_v39 = vpack.c.bf16 %v5245_v24, %v4698_v14  ;;  %v2602_v4 = vld [vmem:[#allocation3 + $0x8] sm:$0xff]  ;;  %v2612_v41 = vld [vmem:[#allocation3 + $0x58] sm:$0xff] }
 0x40d   : > { %2579 = vst [vmem:[%s3831_s23 + $0x50] sm:$0xff] %v3063_v13  ;;  %2580 = vst [vmem:[%s3831_s23 + $0x58] sm:$0xff] %v3064_v35  ;;  %v3075_v20 = vpack.c.bf16 %v4713_v5, %v4708_v52  ;;  %v3076_v47 = vpack.c.bf16 %v5246_v8, %v4718_v63  ;;  %v3077_v3 = vpack.c.bf16 %v4733_v2, %v4728_v40  ;;  %v5247_v52 = vld [vmem:[#allocation28_spill] sm:$0xff]  ;;  %v2613_v15 = vld [vmem:[#allocation3 + $0x60] sm:$0xff] }
 0x40e   : > { %2581 = vst [vmem:[%s3831_s23 + $0x60] sm:$0xff] %v3065_v32  ;;  %2582 = vst [vmem:[%s3831_s23 + $0x68] sm:$0xff] %v3066_v23  ;;  %v3078_v9 = vpack.c.bf16 %v4743_v58, %v4738_v50  ;;  %v3079_v14 = vpack.c.bf16 %v4753_v44, %v4748_v26  ;;  %v3080_v5 = vpack.c.bf16 %v5247_v52, %v4758_v27  ;;  %v2603_v58 = vld [vmem:[#allocation3 + $0x10] sm:$0xff]  ;;  %v2604_v44 = vld [vmem:[#allocation3 + $0x18] sm:$0xff] }
 0x40f   : > { %2584 = vst [vmem:[%s3831_s23 + $0x78] sm:$0xff] %v3068_v43  ;;  %2585 = vst [vmem:[%s3831_s23 + $0x80] sm:$0xff] %v3069_v0  ;;  %v3081_v63 = vpack.c.bf16 %v4773_v34, %v4768_v29  ;;  %v3082_v40 = vpack.c.bf16 %v4783_v38, %v4778_v28  ;;  %v3083_v2 = vpack.c.bf16 %v4793_v19, %v4788_v12  ;;  %v2605_v29 = vld [vmem:[#allocation3 + $0x20] sm:$0xff]  ;;  %v2606_v28 = vld [vmem:[#allocation3 + $0x28] sm:$0xff] }
 0x410   : > { %2586 = vst [vmem:[%s3831_s23 + $0x88] sm:$0xff] %v3070_v37  ;;  %2587 = vst [vmem:[%s3831_s23 + $0x90] sm:$0xff] %v3071_v31  ;;  %v3084_v50 = vpack.c.bf16 %v4803_v10, %v4798_v21  ;;  %v2665_v26 = vadd.f32 %v2602_v4, %v2601_v51  ;;  %v2607_v38 = vld [vmem:[#allocation3 + $0x30] sm:$0xff]  ;;  %v2608_v12 = vld [vmem:[#allocation3 + $0x38] sm:$0xff] }
 0x411   : > { %2588 = vst [vmem:[%s3831_s23 + $0x98] sm:$0xff] %v3072_v48  ;;  %2589 = vst [vmem:[%s3831_s23 + $0xa0] sm:$0xff] %v3073_v25  ;;  %v2609_v19 = vld [vmem:[#allocation3 + $0x40] sm:$0xff]  ;;  %v2615_v30 = vld [vmem:[#allocation3 + $0x70] sm:$0xff] }
 0x412   : > { %2590 = vst [vmem:[%s3831_s23 + $0xa8] sm:$0xff] %v3074_v39  ;;  %2591 = vst [vmem:[%s3831_s23 + $0xb0] sm:$0xff] %v3075_v20  ;;  %v2666_v27 = vadd.f32 %v2665_v26, %v2603_v58  ;;  %v2616_v7 = vld [vmem:[#allocation3 + $0x78] sm:$0xff]  ;;  %v2617_v13 = vld [vmem:[#allocation3 + $0x80] sm:$0xff] }
 0x413   : > { %2592 = vst [vmem:[%s3831_s23 + $0xb8] sm:$0xff] %v3076_v47  ;;  %2593 = vst [vmem:[%s3831_s23 + $0xc0] sm:$0xff] %v3077_v3  ;;  %v2618_v32 = vld [vmem:[#allocation3 + $0x88] sm:$0xff]  ;;  %v2619_v62 = vld [vmem:[#allocation3 + $0x90] sm:$0xff] }
 0x414   : > { %2594 = vst [vmem:[%s3831_s23 + $0xc8] sm:$0xff] %v3078_v9  ;;  %2595 = vst [vmem:[%s3831_s23 + $0xd0] sm:$0xff] %v3079_v14  ;;  %v2667_v34 = vadd.f32 %v2666_v27, %v2604_v44  ;;  %v2620_v43 = vld [vmem:[#allocation3 + $0x98] sm:$0xff]  ;;  %v2621_v55 = vld [vmem:[#allocation3 + $0xa0] sm:$0xff] }
 0x415   : > { %2596 = vst [vmem:[%s3831_s23 + $0xd8] sm:$0xff] %v3080_v5  ;;  %2597 = vst [vmem:[%s3831_s23 + $0xe0] sm:$0xff] %v3081_v63  ;;  %v2622_v53 = vld [vmem:[#allocation3 + $0xa8] sm:$0xff]  ;;  %v2623_v36 = vld [vmem:[#allocation3 + $0xb0] sm:$0xff] }
 0x416   : > { %2598 = vst [vmem:[%s3831_s23 + $0xe8] sm:$0xff] %v3082_v40  ;;  %2599 = vst [vmem:[%s3831_s23 + $0xf0] sm:$0xff] %v3083_v2  ;;  %v2668_v11 = vadd.f32 %v2667_v34, %v2605_v29  ;;  %v2624_v31 = vld [vmem:[#allocation3 + $0xb8] sm:$0xff]  ;;  %v2625_v48 = vld [vmem:[#allocation3 + $0xc0] sm:$0xff] }
 0x417   : > { %2600 = vst [vmem:[%s3831_s23 + $0xf8] sm:$0xff] %v3084_v50  ;;  %v2626_v60 = vld [vmem:[#allocation3 + $0xc8] sm:$0xff]  ;;  %v2627_v24 = vld [vmem:[#allocation3 + $0xd0] sm:$0xff]  ;;  %v2628_v20 = vld [vmem:[#allocation3 + $0xd8] sm:$0xff] }
 0x418   : > { %v2669_v18 = vadd.f32 %v2668_v11, %v2606_v28  ;;  %v2629_v47 = vld [vmem:[#allocation3 + $0xe0] sm:$0xff]  ;;  %v2630_v4 = vld [vmem:[#allocation3 + $0xe8] sm:$0xff]  ;;  %v2631_v9 = vld [vmem:[#allocation3 + $0xf0] sm:$0xff] }
 0x419   : > { %v2632_v52 = vld [vmem:[#allocation3 + $0xf8] sm:$0xff]  ;;  %v2633_v63 = vld [vmem:[#allocation3 + $0x100] sm:$0xff]  ;;  %v2634_v2 = vld [vmem:[#allocation3 + $0x108] sm:$0xff] }
 0x41a   : > { %v2670_v16 = vadd.f32 %v2669_v18, %v2607_v38  ;;  %v2635_v58 = vld [vmem:[#allocation3 + $0x110] sm:$0xff]  ;;  %v2636_v44 = vld [vmem:[#allocation3 + $0x118] sm:$0xff]  ;;  %v2637_v29 = vld [vmem:[#allocation3 + $0x120] sm:$0xff] }
 0x41b   : > { %v2638_v28 = vld [vmem:[#allocation3 + $0x128] sm:$0xff]  ;;  %v2639_v38 = vld [vmem:[#allocation3 + $0x130] sm:$0xff] }
 0x41c   : > { %v2671_v6 = vadd.f32 %v2670_v16, %v2608_v12  ;;  %v2640_v12 = vld [vmem:[#allocation3 + $0x138] sm:$0xff] }
 0x41e   : > { %v2672_v21 = vadd.f32 %v2671_v6, %v2609_v19  ;;  %v2641_v19 = vld [vmem:[#allocation3 + $0x140] sm:$0xff] }
 0x420   : > { %v2673_v10 = vadd.f32 %v2672_v21, %v2610_v22  ;;  %v2642_v22 = vld [vmem:[#allocation3 + $0x148] sm:$0xff] }
 0x422   : > { %v2674_v17 = vadd.f32 %v2673_v10, %v2611_v1  ;;  %v2643_v1 = vld [vmem:[#allocation3 + $0x150] sm:$0xff] }
 0x424   : > { %v2675_v45 = vadd.f32 %v2674_v17, %v2612_v41  ;;  %v2644_v41 = vld [vmem:[#allocation3 + $0x158] sm:$0xff] }
 0x426   : > { %v2676_v59 = vadd.f32 %v2675_v45, %v2613_v15  ;;  %v2645_v15 = vld [vmem:[#allocation3 + $0x160] sm:$0xff] }
 0x428   : > { %v2677_v33 = vadd.f32 %v2676_v59, %v2614_v56  ;;  %v2646_v56 = vld [vmem:[#allocation3 + $0x168] sm:$0xff] }
 0x42a   : > { %v2678_v54 = vadd.f32 %v2677_v33, %v2615_v30  ;;  %v2647_v30 = vld [vmem:[#allocation3 + $0x170] sm:$0xff] }
 0x42c   : > { %v2679_v35 = vadd.f32 %v2678_v54, %v2616_v7  ;;  %v2648_v7 = vld [vmem:[#allocation3 + $0x178] sm:$0xff] }
 0x42e   : > { %v2680_v23 = vadd.f32 %v2679_v35, %v2617_v13  ;;  %v2649_v13 = vld [vmem:[#allocation3 + $0x180] sm:$0xff] }
 0x430   : > { %v2681_v61 = vadd.f32 %v2680_v23, %v2618_v32  ;;  %v2650_v32 = vld [vmem:[#allocation3 + $0x188] sm:$0xff] }
 0x432   : > { %v2682_v42 = vadd.f32 %v2681_v61, %v2619_v62  ;;  %v2651_v62 = vld [vmem:[#allocation3 + $0x190] sm:$0xff] }
 0x434   : > { %v2683_v0 = vadd.f32 %v2682_v42, %v2620_v43  ;;  %v2652_v43 = vld [vmem:[#allocation3 + $0x198] sm:$0xff] }
 0x436   : > { %v2684_v37 = vadd.f32 %v2683_v0, %v2621_v55  ;;  %v2653_v55 = vld [vmem:[#allocation3 + $0x1a0] sm:$0xff] }
 0x438   : > { %v2685_v57 = vadd.f32 %v2684_v37, %v2622_v53  ;;  %v2654_v53 = vld [vmem:[#allocation3 + $0x1a8] sm:$0xff] }
 0x43a   : > { %v2686_v49 = vadd.f32 %v2685_v57, %v2623_v36  ;;  %v2655_v36 = vld [vmem:[#allocation3 + $0x1b0] sm:$0xff] }
 0x43c   : > { %v2687_v46 = vadd.f32 %v2686_v49, %v2624_v31  ;;  %v2656_v31 = vld [vmem:[#allocation3 + $0x1b8] sm:$0xff] }
 0x43e   : > { %v2688_v25 = vadd.f32 %v2687_v46, %v2625_v48  ;;  %v2657_v48 = vld [vmem:[#allocation3 + $0x1c0] sm:$0xff] }
 0x440   : > { %v2689_v39 = vadd.f32 %v2688_v25, %v2626_v60  ;;  %v2658_v60 = vld [vmem:[#allocation3 + $0x1c8] sm:$0xff] }
 0x442   : > { %v2690_v8 = vadd.f32 %v2689_v39, %v2627_v24  ;;  %v2659_v24 = vld [vmem:[#allocation3 + $0x1d0] sm:$0xff] }
 0x444   : > { %v2691_v51 = vadd.f32 %v2690_v8, %v2628_v20  ;;  %v2660_v20 = vld [vmem:[#allocation3 + $0x1d8] sm:$0xff] }
 0x446   : > { %v2692_v3 = vadd.f32 %v2691_v51, %v2629_v47  ;;  %v2661_v47 = vld [vmem:[#allocation3 + $0x1e0] sm:$0xff] }
 0x448   : > { %v2693_v14 = vadd.f32 %v2692_v3, %v2630_v4  ;;  %v2662_v4 = vld [vmem:[#allocation3 + $0x1e8] sm:$0xff] }
 0x44a   : > { %v2694_v5 = vadd.f32 %v2693_v14, %v2631_v9  ;;  %v2663_v9 = vld [vmem:[#allocation3 + $0x1f0] sm:$0xff] }
 0x44c   : > { %v2695_v40 = vadd.f32 %v2694_v5, %v2632_v52  ;;  %v2664_v52 = vld [vmem:[#allocation3 + $0x1f8] sm:$0xff] }
 0x44e   : > { %v2696_v50 = vadd.f32 %v2695_v40, %v2633_v63 }
 0x450   : > { %v2697_v26 = vadd.f32 %v2696_v50, %v2634_v2 }
 0x452   : > { %v2698_v27 = vadd.f32 %v2697_v26, %v2635_v58 }
 0x454   : > { %v2699_v34 = vadd.f32 %v2698_v27, %v2636_v44 }
 0x456   : > { %v2700_v11 = vadd.f32 %v2699_v34, %v2637_v29 }
 0x458   : > { %v2701_v18 = vadd.f32 %v2700_v11, %v2638_v28 }
 0x45a   : > { %v2702_v16 = vadd.f32 %v2701_v18, %v2639_v38 }
 0x45c   : > { %v2703_v6 = vadd.f32 %v2702_v16, %v2640_v12 }
 0x45e   : > { %v2704_v21 = vadd.f32 %v2703_v6, %v2641_v19 }
 0x460   : > { %v2705_v10 = vadd.f32 %v2704_v21, %v2642_v22 }
 0x462   : > { %v2706_v17 = vadd.f32 %v2705_v10, %v2643_v1 }
 0x464   : > { %v2707_v45 = vadd.f32 %v2706_v17, %v2644_v41 }
 0x466   : > { %v2708_v59 = vadd.f32 %v2707_v45, %v2645_v15 }
 0x468   : > { %v2709_v33 = vadd.f32 %v2708_v59, %v2646_v56 }
 0x46a   : > { %v2710_v54 = vadd.f32 %v2709_v33, %v2647_v30 }
 0x46c   : > { %v2711_v35 = vadd.f32 %v2710_v54, %v2648_v7 }
 0x46e   : > { %v2712_v23 = vadd.f32 %v2711_v35, %v2649_v13 }
 0x470   : > { %v2713_v61 = vadd.f32 %v2712_v23, %v2650_v32 }
 0x472   : > { %v2714_v42 = vadd.f32 %v2713_v61, %v2651_v62 }
 0x474   : > { %v2715_v0 = vadd.f32 %v2714_v42, %v2652_v43 }
 0x476   : > { %v2716_v37 = vadd.f32 %v2715_v0, %v2653_v55 }
 0x478   : > { %v2717_v57 = vadd.f32 %v2716_v37, %v2654_v53 }
 0x47a   : > { %v2718_v49 = vadd.f32 %v2717_v57, %v2655_v36 }
 0x47c   : > { %v2719_v46 = vadd.f32 %v2718_v49, %v2656_v31 }
 0x47e   : > { %v2720_v25 = vadd.f32 %v2719_v46, %v2657_v48 }
 0x480   : > { %v2721_v39 = vadd.f32 %v2720_v25, %v2658_v60 }
 0x482   : > { %v2722_v8 = vadd.f32 %v2721_v39, %v2659_v24 }
 0x484   : > { %v2723_v51 = vadd.f32 %v2722_v8, %v2660_v20 }
 0x486   : > { %v2724_v3 = vadd.f32 %v2723_v51, %v2661_v47 }
 0x488   : > { %v2725_v14 = vadd.f32 %v2724_v3, %v2662_v4 }
 0x48a   : > { %v2726_v5 = vadd.f32 %v2725_v14, %v2663_v9 }
 0x48c   : > { %v2727_v63 = vadd.f32 %v2726_v5, %v2664_v52 }
 0x48e   : > { %2728 = vadd.xlane.f32.xlu0 %v2727_v63 }
 0x51b   : > { %v2729_v40 = vpop.xlane.xlu0 %2728 }
 0x51c   : > { %v2730_v2 = vrot.slane %v2729_v40, 4 }
 0x51e   : > { %v2731_v50 = vadd.f32 %v2730_v2, %v2729_v40 }
 0x520   : > { %v2732_v58 = vrot.slane %v2731_v50, 2 }
 0x522   : > { %v2733_v26 = vadd.f32 %v2732_v58, %v2731_v50 }
 0x524   : > { %v2734_v44 = vrot.slane %v2733_v26, 1 }
 0x526   : > { %v2735_v27 = vadd.f32 %v2734_v44, %v2733_v26 }
 0x528   : > { %3086 = vpush %v2735_v27 }
 0x559   : > { %s3087_s20 = spop %3086 }
 0x55a   : > { %s2737_s11 = smul.f32 3.8146973e-06, %s3087_s20 }
 0x55c   : > { %v2738_v29 = vstv %s2737_s11 }
 0x55d   : > { %2739 = vst [vmem:[%s3829_s10] sm:$0xff] %v2738_v29 }
 0x55e PF: > { %s3045_s6 = sshll.u32 %s3492_s0, 7  ;;  %s5248_s8 = sld [smem:[#allocation65_spill]] }
 0x55f   : > { %s2759_s12 = sshll.u32 %s3829_s10, 4  ;;  %s5249_s9 = sld [smem:[#allocation66_spill]]  ;;  %s4909_s12 = int_to_ptr.vmem [resolvable:$true] %s2759_s12 }
 0x560   : > { %s2741_s13 = scalar_lea.sflag [#allocation7], %s3816_s14  ;;  %s3354_s16 = scalar_lea.vmem %s4909_s12, 128 }
 0x561   : > { %p3355_p0 = scmp.ne.s32.totalorder %s4909_s12, %s3354_s16  ;;  %p5250_p1 = scmp.ne.s32.totalorder %s5068_s19, 0 }
 0x562   : > { %s3514_s0 = smov [#allocation11]  }
 0x563   : > { %p3356_p2 = pnand %p3355_p0, %p5250_p1  ;;  %s3358_s5 = sshll.u32 %s3514_s0, 4  ;;  %s3359_s5 = int_to_ptr.vmem [resolvable:$false] %s3358_s5 }
 0x564   : > { %s4906_s30 = scalar_lea.hbm %s5248_s8, %s3045_s6  ;;  %s3360_s10 = scalar_lea.vmem %s3359_s5, 256 }
 0x565   : > { %s4914_s17 = scalar_lea.hbm %s5249_s9, %s3045_s6  ;;  %p3357_p5 = pneg %p3356_p2 }
 0x566   : > { %p3361_p6 = scmp.lt.s32.totalorder %s4909_s12, %s3359_s5  ;;  %p3362_p11 = scmp.lt.s32.totalorder %s3360_s10, %s3354_s16 }
 0x568   : > { %p3363_p3 = por %p3362_p11, %p3361_p6 }
 0x56a   : > { %p3364_p8 = pnand %p3363_p3, %p3357_p5 }
 0x56c   : > { %3367 = shalt.err (!%p3364_p8)
}
 0x56d   : > { %s3368_s25 = scalar_lea.hbm %s4906_s30, 128  ;;  %s3372_s11 = scalar_lea.hbm %s5248_s8, 256 }
 0x56e   : > { %p3369_p13 = scmp.ne.s32.totalorder %s4906_s30, %s3368_s25  ;;  %p3373_p7 = scmp.lt.u32.totalorder %s4906_s30, %s5248_s8 }
 0x56f   : > { %p3374_p9 = scmp.lt.u32.totalorder %s3372_s11, %s3368_s25  ;;  %p3376_p0 = scmp.lt.u32.totalorder %s3368_s25, %s4906_s30 }
 0x570   : > { %p3370_p12 = pnand %p3369_p13, %p5250_p1 }
 0x571   : > { %p3375_p10 = por %p3374_p9, %p3373_p7 }
 0x572   : > { %p3371_p4 = pneg %p3370_p12 }
 0x573   : > { %p3377_p2 = por %p3376_p0, %p3375_p10 }
 0x575   : > { %p3378_p5 = pnand %p3377_p2, %p3371_p4 }
 0x577   : > { %3381 = shalt.err (!%p3378_p5)
}
 0x578   : > { %3094 = dma.vmem_to_hbm [thread:$0]  (%p5250_p1), %s4909_s12, 128, %s4906_s30, %s2741_s13  }
 0x579   : > { %s2772_s29 = sshll.u32 %s3831_s23, 4  ;;  %s2746_s18 = scalar_lea.sflag [#allocation13], %s3816_s14  ;;  %s4939_s29 = int_to_ptr.vmem [resolvable:$true] %s2772_s29 }
 0x57a   : > { %s3382_s7 = scalar_lea.vmem %s4939_s29, 4096  ;;  %s3515_s16 = smov [#allocation12]  }
 0x57b   : > { %p3383_p6 = scmp.ne.s32.totalorder %s4939_s29, %s3382_s7  ;;  %s3386_s0 = sshll.u32 %s3515_s16, 4  ;;  %s3387_s0 = int_to_ptr.vmem [resolvable:$false] %s3386_s0 }
 0x57c   : > { %s3388_s5 = scalar_lea.vmem %s3387_s0, 8192  ;;  %p3389_p8 = scmp.lt.s32.totalorder %s4939_s29, %s3387_s0 }
 0x57d   : > { %p3384_p11 = pnand %p3383_p6, %p5250_p1  ;;  %p3390_p13 = scmp.lt.s32.totalorder %s3388_s5, %s3382_s7 }
 0x57f   : > { %p3385_p3 = pneg %p3384_p11  ;;  %p3391_p12 = por %p3390_p13, %p3389_p8 }
 0x581   : > { %p3392_p4 = pnand %p3391_p12, %p3385_p3 }
 0x583   : > { %3395 = shalt.err (!%p3392_p4)
}
 0x584   : > { %s3396_s23 = scalar_lea.hbm %s4914_s17, 4096  ;;  %s3400_s13 = scalar_lea.hbm %s5249_s9, 8192 }
 0x585   : > { %p3397_p7 = scmp.ne.s32.totalorder %s4914_s17, %s3396_s23  ;;  %p3401_p0 = scmp.lt.u32.totalorder %s4914_s17, %s5249_s9 }
 0x586   : > { %p3402_p2 = scmp.lt.u32.totalorder %s3400_s13, %s3396_s23  ;;  %p3404_p6 = scmp.lt.u32.totalorder %s3396_s23, %s4914_s17 }
 0x587   : > { %p3398_p9 = pnand %p3397_p7, %p5250_p1 }
 0x588   : > { %p3403_p5 = por %p3402_p2, %p3401_p0 }
 0x589   : > { %p3399_p10 = pneg %p3398_p9 }
 0x58a   : > { %p3405_p11 = por %p3404_p6, %p3403_p5 }
 0x58c   : > { %p3406_p3 = pnand %p3405_p11, %p3399_p10 }
 0x58e   : > { %3409 = shalt.err (!%p3406_p3)
}
 0x58f   : > { %s3516_s4 = smov 128   ;;  %s3517_s20 = smov 256  }
 0x590   : > { %s3518_s11 = smov 8  }
 0x591   : > { %3095 = dma.vmem_to_hbm [thread:$0]  (%p5250_p1), %s4939_s29, 4096, %s4914_s17, %s2746_s18, %s3516_s4, %s3517_s20, %s3518_s11  }
 0x592 PF: > { %s5251_s6 = sld [smem:[#allocation18_spill]]  ;;  %s5252_s15 = sld [smem:[#allocation23_spill]] }
 0x593   : > { %p3111_p8 = scmp.ge.s32.totalorder %s3504_s28, 2 }
 0x598   : > { %s2787_s7 = sand.u32 1, %s5251_s6   ;;  %p5253_p13 = scmp.ne.s32.totalorder %s5252_s15, 0 }
 0x599   : > { %s2788_s16 = scalar_lea.sflag [#allocation7], %s2787_s7 }
 0x59a   : > { %p3103_p12 = pnand %p3111_p8, %p5253_p13 }
 0x59c   : > { %3459 = dma.done.wait (!%p3103_p12), %s2788_s16, 128  }
 0x59d   : > { %3461 = vsyncadd (!%p3103_p12), %s2788_s16, 4294967168  ;;  %s2797_s0 = scalar_lea.sflag [#allocation13], %s2787_s7 }
 0x59e   : > { %3463 = dma.done.wait (!%p3103_p12), %s2797_s0, 4096  }
 0x59f   : > { %3465 = vsyncadd (!%p3103_p12), %s2797_s0, 4294963200  ;;  %s27_s28 = sadd.s32 1, %s3504_s28   ;;  %s5254_s19 = sld [smem:[#allocation21_spill]] }
 0x5a0   : > { %p24_p4 = scmp.ge.s32.totalorder %s27_s28, 6   ;;  %s5255_s14 = sld [smem:[#allocation22_spill]] }
 0x5a1   : > { %s5256_s17 = sld [smem:[#allocation19_spill]]  ;;  %s5257_s29 = sld [smem:[#allocation20_spill]] }
 0x5a2   : > { %s5258_s20 = smov %s3472_s21  ;;  %s5259_s21 = smov %s3476_s22 }
 0x5a3   : > { %s5261_s23 = smov %s3484_s24  ;;  %s5263_s25 = smov %s3496_s26 }
 0x5a4   : > { %s5264_s0 = smov %s3500_s27  ;;  %26 = sbr.rel (!%p24_p4) target bundleno = 15 (0xf), region = 158 }
 0x5a5   : > { %s5260_s22 = smov %s5254_s19 }
 0x5a6   : > { %s5262_s24 = smov %s5255_s14 }
 0x5a7   : > { %s5265_s26 = smov %s5256_s17  ;;  %s5266_s27 = smov %s5257_s29 }
 0x5ab   :  { %2802 = vsyncpa [#allocation6], 1 }
 0x5ac   :  { %2804 = vsyncpa [#allocation6 + $0x1], 1 }
 0x5ad   :  { %2805 = vsyncpa [#allocation10], 1 }
 0x5ae   :  { %2807 = vsyncpa [#allocation10 + $0x1], 1 }
 0x5af   :  { %2808 = vsyncpa [#allocation7], 1 }
 0x5b0   :  { %2810 = vsyncpa [#allocation7 + $0x1], 1 }
 0x5b1   :  { %2811 = vsyncpa [#allocation13], 1 }
 0x5b2   :  { %2813 = vsyncpa [#allocation13 + $0x1], 1 }

</bundles_post_ra>
